<compile_context>
chip_gen: v7x
topology: tpu7x:2x2x1
jax: 0.10.0
libtpu: 0.0.40
codegen_flags: <defaults>
</compile_context>

<pallas_src>
import jax
import jax.numpy as jnp
from jax.experimental import pallas as pl
from jax.experimental.pallas import tpu as pltpu

LEAKY_SLOPE = 0.01   # torch.nn.functional.leaky_relu default negative_slope
IN_EPS = 1e-5        # nn.InstanceNorm2d default eps
_HALO = 16           # interior column offset in the padded scratch: aligned for both
                     # f32 (8-sublane) and packed bf16 (16-row) tiling.


def _vmem_limit_bytes():
    # ~75% of the physical per-core VMEM of whatever generation we run on
    # (v5e/v6e: 128 MiB -> 96 MiB; v7x: 64 MiB -> 48 MiB).
    try:
        return int(pltpu.get_tpu_info().vmem_capacity_bytes) * 3 // 4
    except Exception:
        return 32 << 20  # conservative fallback (default scoped limit)


def _conv3x3(xp_ref, w_ref, h, w, s):
    """3x3 'SAME' conv as 9 per-tap matmuls accumulated in f32 (no im2col matrix).

    xp_ref : (h+2, w+2*_HALO, Cin) bf16 VMEM scratch; the image interior lives at rows
             [1, h+1) and columns [_HALO, _HALO+w); the 1-pixel halo around it is zero.
    w_ref  : (9, Cin, Cout) bf16 (tap index = 3*kh + kw)
    returns: (s, Cout) f32
    """
    c_in = xp_ref.shape[-1]
    c_out = w_ref.shape[-1]
    acc = jnp.zeros((s, c_out), jnp.float32)
    for kh in range(3):              # static unroll: 9 shallow MXU matmuls, f32 accum
        for kw in range(3):
            col0 = _HALO - 1 + kw    # 15 / 16 / 17: only halo-tap reads are unaligned
            tap = xp_ref[kh:kh + h, col0:col0 + w, :].reshape(s, c_in)
            acc = acc + jnp.dot(tap, w_ref[3 * kh + kw],
                                preferred_element_type=jnp.float32)
    return acc


def _instnorm_lrelu(acc, g, b, s):
    """InstanceNorm2d (biased var, eps=1e-5) + affine + LeakyReLU, folded to one
    per-channel scale/shift epilogue.  Single reduction pass over [acc | acc*acc]."""
    c = acc.shape[-1]
    stats = jnp.sum(jnp.concatenate([acc, acc * acc], axis=-1),
                    axis=0, keepdims=True) * (1.0 / s)              # (1, 2c)
    mean = stats[:, :c]
    # E[x^2] - mean^2 in f32 (clamped).  Fine at these activation scales; the bf16
    # operands dominate the error budget (see the tolerance check in __main__).
    var = jnp.maximum(stats[:, c:] - mean * mean, 0.0)
    scale = g * jax.lax.rsqrt(var + IN_EPS)
    shift = b - mean * scale
    y = acc * scale + shift
    return jnp.where(y >= 0, y, LEAKY_SLOPE * y)                    # LeakyReLU(0.01)


def _double_conv_kernel(x_ref, w1_ref, g1_ref, b1_ref, w2_ref, g2_ref, b2_ref,
                        o_ref, xp1_ref, xp2_ref):
    # x_ref : (1, H, W, Cin)         bf16
    # w*_ref: (9, Cin, Cout)         bf16
    # g*/b* : (1, C)                 f32
    # o_ref : (1, Cout, S)           f32   (S = H*W on lanes -> unmasked stores)
    # xp*   : (H+2, W+2*_HALO, C)    bf16  VMEM scratch (zero halo + interior)
    h = x_ref.shape[1]
    w = x_ref.shape[2]
    s = h * w

    # Zero ONLY the halo border (the interior is fully overwritten below).  Done every
    # step so the kernel stays correct under any megacore grid split; all four stores
    # are tile-aligned and tiny.
    def zero_halo(xp_ref):
        wp = xp_ref.shape[1]
        c = xp_ref.shape[2]
        xp_ref[0:1] = jnp.zeros((1, wp, c), xp_ref.dtype)            # top halo row
        xp_ref[h + 1:h + 2] = jnp.zeros((1, wp, c), xp_ref.dtype)    # bottom halo row
        xp_ref[:, 0:_HALO, :] = jnp.zeros((h + 2, _HALO, c), xp_ref.dtype)
        xp_ref[:, _HALO + w:, :] = jnp.zeros((h + 2, _HALO, c), xp_ref.dtype)

    zero_halo(xp1_ref)
    zero_halo(xp2_ref)

    # ---- stage 1: conv -> IN -> LeakyReLU (interior store is tile-aligned) ----------
    xp1_ref[1:h + 1, _HALO:_HALO + w, :] = x_ref[0].astype(xp1_ref.dtype)
    acc1 = _conv3x3(xp1_ref, w1_ref, h, w, s)
    h1 = _instnorm_lrelu(acc1, g1_ref[...], b1_ref[...], s)         # (S, Cmid) f32

    # ---- stage 2: hidden activation never leaves VMEM --------------------------------
    xp2_ref[1:h + 1, _HALO:_HALO + w, :] = h1.reshape(h, w, -1).astype(xp2_ref.dtype)
    acc2 = _conv3x3(xp2_ref, w2_ref, h, w, s)
    y2 = _instnorm_lrelu(acc2, g2_ref[...], b2_ref[...], s)         # (S, Cout) f32

    # Store channels-major: (Cout, S) with S lane-dense; the small (S,Cout)->(Cout,S)
    # transpose is an XLU op, the HBM writeback carries zero channel padding.
    o_ref[0] = jnp.transpose(y2).astype(o_ref.dtype)


def double_conv2d_forward(x_nchw, params):
    n, cin, h, w = x_nchw.shape
    cmid = params["w1"].shape[-1]
    cout = params["w2"].shape[-1]
    s = h * w

    # TODO(synk): for W % 8 != 0 pad W wrapper-side (with IN-stat masking); the
    #             (h, w, c) <-> (h*w, c) reshapes are only free when W % 8 == 0.
    assert w % 8 == 0, "kernel assumes W % 8 == 0"

    # bf16 input: halves input DMA / VMEM (data is rounded to bf16 in-kernel regardless).
    x = jnp.transpose(x_nchw, (0, 2, 3, 1)).astype(jnp.bfloat16)     # NCHW -> NHWC

    # Per-tap weight layout (kh*3+kw, Cin, Cout), bf16 operands (f32 accumulation).
    # Conv biases are intentionally NOT passed: InstanceNorm cancels them exactly.
    w1 = params["w1"].reshape(9, cin, cmid).astype(jnp.bfloat16)
    w2 = params["w2"].reshape(9, cmid, cout).astype(jnp.bfloat16)
    g1 = params["g1"].reshape(1, cmid).astype(jnp.float32)
    b1 = params["b1"].reshape(1, cmid).astype(jnp.float32)
    g2 = params["g2"].reshape(1, cout).astype(jnp.float32)
    b2 = params["b2"].reshape(1, cout).astype(jnp.float32)

    out = pl.pallas_call(
        _double_conv_kernel,
        out_shape=jax.ShapeDtypeStruct((n, cout, s), jnp.float32),
        grid=(n,),
        in_specs=[
            pl.BlockSpec((1, h, w, cin), lambda i: (i, 0, 0, 0)),
            pl.BlockSpec((9, cin, cmid), lambda i: (0, 0, 0)),
            pl.BlockSpec((1, cmid), lambda i: (0, 0)),
            pl.BlockSpec((1, cmid), lambda i: (0, 0)),
            pl.BlockSpec((9, cmid, cout), lambda i: (0, 0, 0)),
            pl.BlockSpec((1, cout), lambda i: (0, 0)),
            pl.BlockSpec((1, cout), lambda i: (0, 0)),
        ],
        out_specs=pl.BlockSpec((1, cout, s), lambda i: (i, 0, 0)),
        scratch_shapes=[
            pltpu.VMEM((h + 2, w + 2 * _HALO, cin), jnp.bfloat16),   # padded input
            pltpu.VMEM((h + 2, w + 2 * _HALO, cmid), jnp.bfloat16),  # padded hidden act
        ],
        compiler_params=pltpu.CompilerParams(
            dimension_semantics=("parallel",),
            vmem_limit_bytes=_vmem_limit_bytes(),
        ),
    )(x, w1, g1, b1, w2, g2, b2)

    # (N, Cout, S) -> (N, Cout, H, W): already NCHW, a free reshape (no HBM pass).
    return out.reshape(n, cout, h, w)


# ---------------------------------------------------------------------------
# Pure-JAX f32 reference of the PyTorch forward.  It DOES apply the conv biases,
# which the kernel omits -- matching results verify the bias/IN cancellation.
# ---------------------------------------------------------------------------
def _reference(x_nchw, params):
    x = jnp.transpose(x_nchw, (0, 2, 3, 1)).astype(jnp.float32)

    def stage(x, w, cbias, g, b):
        y = jax.lax.conv_general_dilated(
            x, w, window_strides=(1, 1), padding="SAME",
            dimension_numbers=("NHWC", "HWIO", "NHWC")) + cbias
        mean = jnp.mean(y, axis=(1, 2), keepdims=True)
        var = jnp.var(y, axis=(1, 2), keepdims=True)
        y = (y - mean) * jax.lax.rsqrt(var + IN_EPS) * g + b
        return jnp.where(y >= 0, y, LEAKY_SLOPE * y)

    y = stage(x, params["w1"], params["c1"], params["g1"], params["b1"])
    y = stage(y, params["w2"], params["c2"], params["g2"], params["b2"])
    return jnp.transpose(y, (0, 3, 1, 2))


def init_params(key, cin, cmid, cout):
    ks = jax.random.split(key, 8)
    # Conv weights in HWIO layout (kh, kw, Cin, Cout).  c1/c2 are the conv biases,
    # used only by the reference (the kernel drops them -- InstanceNorm cancels them).
    return {
        "w1": 0.1 * jax.random.normal(ks[0], (3, 3, cin, cmid), jnp.float32),
        "c1": 0.1 * jax.random.normal(ks[1], (cmid,), jnp.float32),
        "g1": 1.0 + 0.1 * jax.random.normal(ks[2], (cmid,), jnp.float32),
        "b1": 0.1 * jax.random.normal(ks[3], (cmid,), jnp.float32),
        "w2": 0.1 * jax.random.normal(ks[4], (3, 3, cmid, cout), jnp.float32),
        "c2": 0.1 * jax.random.normal(ks[5], (cout,), jnp.float32),
        "g2": 1.0 + 0.1 * jax.random.normal(ks[6], (cout,), jnp.float32),
        "b2": 0.1 * jax.random.normal(ks[7], (cout,), jnp.float32),
    }


if __name__ == "__main__":
    key = jax.random.PRNGKey(0)
    kx, kp = jax.random.split(key)

    N, Cin, Cmid, Cout = 2, 4, 16, 8
    H = W = 16

    x = jax.random.normal(kx, (N, Cin, H, W), jnp.float32)
    params = init_params(kp, Cin, Cmid, Cout)

    out = jax.block_until_ready(jax.jit(double_conv2d_forward)(x, params))

    assert out.shape == (N, Cout, H, W), out.shape
    assert bool(jnp.all(jnp.isfinite(out)))

    ref = _reference(x, params)
    err = float(jnp.max(jnp.abs(out - ref)))
    # bf16 matmul operands + bf16 inter-stage activation; typical max-abs err ~1e-2.
    assert err < 0.08, f"max abs err vs f32 reference too large: {err}"

    print("KERNEL_OK")
</pallas_src>

<mosaic_0001>
module attributes {stable_mosaic.version = 11 : i64} {
  func.func @_double_conv_kernel(%arg0: i32, %arg1: memref<1x16x16x4xbf16, #tpu.memory_space<vmem>>, %arg2: memref<9x4x16xbf16, #tpu.memory_space<vmem>>, %arg3: memref<1x16xf32, #tpu.memory_space<vmem>>, %arg4: memref<1x16xf32, #tpu.memory_space<vmem>>, %arg5: memref<9x16x8xbf16, #tpu.memory_space<vmem>>, %arg6: memref<1x8xf32, #tpu.memory_space<vmem>>, %arg7: memref<1x8xf32, #tpu.memory_space<vmem>>, %arg8: memref<1x8x256xf32, #tpu.memory_space<vmem>>, %arg9: memref<18x48x4xbf16, #tpu.memory_space<vmem>>, %arg10: memref<18x48x16xbf16, #tpu.memory_space<vmem>>) attributes {dimension_semantics = [#tpu.dimension_semantics<parallel>], iteration_bounds = array<i64: 2>, scalar_prefetch = 0 : i64, scratch_operands = 2 : i64, tpu.core_type = #tpu.core_type<tc>, window_params = [{transform_indices = @transform_0, window_bounds = array<i64: 1, 16, 16, 4>}, {pipeline_mode = #tpu.pipeline_mode<synchronous>, transform_indices = @transform_1, window_bounds = array<i64: 9, 4, 16>}, {pipeline_mode = #tpu.pipeline_mode<synchronous>, transform_indices = @transform_2, window_bounds = array<i64: 1, 16>}, {pipeline_mode = #tpu.pipeline_mode<synchronous>, transform_indices = @transform_3, window_bounds = array<i64: 1, 16>}, {pipeline_mode = #tpu.pipeline_mode<synchronous>, transform_indices = @transform_4, window_bounds = array<i64: 9, 16, 8>}, {pipeline_mode = #tpu.pipeline_mode<synchronous>, transform_indices = @transform_5, window_bounds = array<i64: 1, 8>}, {pipeline_mode = #tpu.pipeline_mode<synchronous>, transform_indices = @transform_6, window_bounds = array<i64: 1, 8>}, {transform_indices = @transform_7, window_bounds = array<i64: 1, 8, 256>}]} {
    %cst = arith.constant 0.000000e+00 : bf16
    %0 = vector.broadcast %cst : bf16 to vector<1x48x4xbf16>
    %c0 = arith.constant 0 : index
    %c0_0 = arith.constant 0 : index
    %c0_1 = arith.constant 0 : index
    %1 = vector.load %arg9[%c0, %c0_0, %c0_1] : memref<18x48x4xbf16, #tpu.memory_space<vmem>>, vector<1x48x4xbf16>
    tpu.vector_store %arg9[%c0, %c0_0, %c0_1], %0 {strides = array<i32>} : memref<18x48x4xbf16, #tpu.memory_space<vmem>>, vector<1x48x4xbf16>,
    %cst_2 = arith.constant 0.000000e+00 : bf16
    %2 = vector.broadcast %cst_2 : bf16 to vector<1x48x4xbf16>
    %c17 = arith.constant 17 : index
    %c0_3 = arith.constant 0 : index
    %c0_4 = arith.constant 0 : index
    %3 = vector.load %arg9[%c17, %c0_3, %c0_4] : memref<18x48x4xbf16, #tpu.memory_space<vmem>>, vector<1x48x4xbf16>
    tpu.vector_store %arg9[%c17, %c0_3, %c0_4], %2 {strides = array<i32>} : memref<18x48x4xbf16, #tpu.memory_space<vmem>>, vector<1x48x4xbf16>,
    %cst_5 = arith.constant 0.000000e+00 : bf16
    %4 = vector.broadcast %cst_5 : bf16 to vector<18x16x4xbf16>
    %c0_6 = arith.constant 0 : index
    %c0_7 = arith.constant 0 : index
    %c0_8 = arith.constant 0 : index
    %5 = vector.load %arg9[%c0_6, %c0_7, %c0_8] : memref<18x48x4xbf16, #tpu.memory_space<vmem>>, vector<18x16x4xbf16>
    tpu.vector_store %arg9[%c0_6, %c0_7, %c0_8], %4 {strides = array<i32>} : memref<18x48x4xbf16, #tpu.memory_space<vmem>>, vector<18x16x4xbf16>,
    %cst_9 = arith.constant 0.000000e+00 : bf16
    %6 = vector.broadcast %cst_9 : bf16 to vector<18x16x4xbf16>
    %c0_10 = arith.constant 0 : index
    %c32 = arith.constant 32 : index
    %c0_11 = arith.constant 0 : index
    %7 = vector.load %arg9[%c0_10, %c32, %c0_11] : memref<18x48x4xbf16, #tpu.memory_space<vmem>>, vector<18x16x4xbf16>
    tpu.vector_store %arg9[%c0_10, %c32, %c0_11], %6 {strides = array<i32>} : memref<18x48x4xbf16, #tpu.memory_space<vmem>>, vector<18x16x4xbf16>,
    %cst_12 = arith.constant 0.000000e+00 : bf16
    %8 = vector.broadcast %cst_12 : bf16 to vector<1x48x16xbf16>
    %c0_13 = arith.constant 0 : index
    %c0_14 = arith.constant 0 : index
    %c0_15 = arith.constant 0 : index
    %9 = vector.load %arg10[%c0_13, %c0_14, %c0_15] : memref<18x48x16xbf16, #tpu.memory_space<vmem>>, vector<1x48x16xbf16>
    tpu.vector_store %arg10[%c0_13, %c0_14, %c0_15], %8 {strides = array<i32>} : memref<18x48x16xbf16, #tpu.memory_space<vmem>>, vector<1x48x16xbf16>,
    %cst_16 = arith.constant 0.000000e+00 : bf16
    %10 = vector.broadcast %cst_16 : bf16 to vector<1x48x16xbf16>
    %c17_17 = arith.constant 17 : index
    %c0_18 = arith.constant 0 : index
    %c0_19 = arith.constant 0 : index
    %11 = vector.load %arg10[%c17_17, %c0_18, %c0_19] : memref<18x48x16xbf16, #tpu.memory_space<vmem>>, vector<1x48x16xbf16>
    tpu.vector_store %arg10[%c17_17, %c0_18, %c0_19], %10 {strides = array<i32>} : memref<18x48x16xbf16, #tpu.memory_space<vmem>>, vector<1x48x16xbf16>,
    %cst_20 = arith.constant 0.000000e+00 : bf16
    %12 = vector.broadcast %cst_20 : bf16 to vector<18x16x16xbf16>
    %c0_21 = arith.constant 0 : index
    %c0_22 = arith.constant 0 : index
    %c0_23 = arith.constant 0 : index
    %13 = vector.load %arg10[%c0_21, %c0_22, %c0_23] : memref<18x48x16xbf16, #tpu.memory_space<vmem>>, vector<18x16x16xbf16>
    tpu.vector_store %arg10[%c0_21, %c0_22, %c0_23], %12 {strides = array<i32>} : memref<18x48x16xbf16, #tpu.memory_space<vmem>>, vector<18x16x16xbf16>,
    %cst_24 = arith.constant 0.000000e+00 : bf16
    %14 = vector.broadcast %cst_24 : bf16 to vector<18x16x16xbf16>
    %c0_25 = arith.constant 0 : index
    %c32_26 = arith.constant 32 : index
    %c0_27 = arith.constant 0 : index
    %15 = vector.load %arg10[%c0_25, %c32_26, %c0_27] : memref<18x48x16xbf16, #tpu.memory_space<vmem>>, vector<18x16x16xbf16>
    tpu.vector_store %arg10[%c0_25, %c32_26, %c0_27], %14 {strides = array<i32>} : memref<18x48x16xbf16, #tpu.memory_space<vmem>>, vector<18x16x16xbf16>,
    %c0_28 = arith.constant 0 : index
    %c0_29 = arith.constant 0 : index
    %c0_30 = arith.constant 0 : index
    %c0_31 = arith.constant 0 : index
    %16 = vector.load %arg1[%c0_28, %c0_29, %c0_30, %c0_31] : memref<1x16x16x4xbf16, #tpu.memory_space<vmem>>, vector<1x16x16x4xbf16>
    %17 = vector.shape_cast %16 : vector<1x16x16x4xbf16> to vector<16x16x4xbf16>
    %c1 = arith.constant 1 : index
    %c16 = arith.constant 16 : index
    %c0_32 = arith.constant 0 : index
    %18 = vector.load %arg9[%c1, %c16, %c0_32] : memref<18x48x4xbf16, #tpu.memory_space<vmem>>, vector<16x16x4xbf16>
    tpu.vector_store %arg9[%c1, %c16, %c0_32], %17 {strides = array<i32>} : memref<18x48x4xbf16, #tpu.memory_space<vmem>>, vector<16x16x4xbf16>,
    %cst_33 = arith.constant 0.000000e+00 : f32
    %19 = vector.broadcast %cst_33 : f32 to vector<256x16xf32>
    %c0_34 = arith.constant 0 : index
    %c15 = arith.constant 15 : index
    %c0_35 = arith.constant 0 : index
    %20 = vector.load %arg9[%c0_34, %c15, %c0_35] : memref<18x48x4xbf16, #tpu.memory_space<vmem>>, vector<16x16x4xbf16>
    %21 = vector.shape_cast %20 : vector<16x16x4xbf16> to vector<256x4xbf16>
    %c0_36 = arith.constant 0 : index
    %c0_37 = arith.constant 0 : index
    %c0_38 = arith.constant 0 : index
    %22 = vector.load %arg2[%c0_36, %c0_37, %c0_38] : memref<9x4x16xbf16, #tpu.memory_space<vmem>>, vector<1x4x16xbf16>
    %23 = vector.shape_cast %22 : vector<1x4x16xbf16> to vector<4x16xbf16>
    %cst_39 = arith.constant dense<0.000000e+00> : vector<256x16xf32>
    %24 = tpu.matmul %21, %23, %cst_39 {dimension_numbers = #tpu.dot_dimension_numbers<[1], [0], [0], [1], [0, 0, 1, 1], [], []>} : vector<256x4xbf16>, vector<4x16xbf16>, vector<256x16xf32> -> vector<256x16xf32>
    %25 = arith.addf %19, %24 : vector<256x16xf32>
    %c0_40 = arith.constant 0 : index
    %c16_41 = arith.constant 16 : index
    %c0_42 = arith.constant 0 : index
    %26 = vector.load %arg9[%c0_40, %c16_41, %c0_42] : memref<18x48x4xbf16, #tpu.memory_space<vmem>>, vector<16x16x4xbf16>
    %27 = vector.shape_cast %26 : vector<16x16x4xbf16> to vector<256x4xbf16>
    %c1_43 = arith.constant 1 : index
    %c0_44 = arith.constant 0 : index
    %c0_45 = arith.constant 0 : index
    %28 = vector.load %arg2[%c1_43, %c0_44, %c0_45] : memref<9x4x16xbf16, #tpu.memory_space<vmem>>, vector<1x4x16xbf16>
    %29 = vector.shape_cast %28 : vector<1x4x16xbf16> to vector<4x16xbf16>
    %cst_46 = arith.constant dense<0.000000e+00> : vector<256x16xf32>
    %30 = tpu.matmul %27, %29, %cst_46 {dimension_numbers = #tpu.dot_dimension_numbers<[1], [0], [0], [1], [0, 0, 1, 1], [], []>} : vector<256x4xbf16>, vector<4x16xbf16>, vector<256x16xf32> -> vector<256x16xf32>
    %31 = arith.addf %25, %30 : vector<256x16xf32>
    %c0_47 = arith.constant 0 : index
    %c17_48 = arith.constant 17 : index
    %c0_49 = arith.constant 0 : index
    %32 = vector.load %arg9[%c0_47, %c17_48, %c0_49] : memref<18x48x4xbf16, #tpu.memory_space<vmem>>, vector<16x16x4xbf16>
    %33 = vector.shape_cast %32 : vector<16x16x4xbf16> to vector<256x4xbf16>
    %c2 = arith.constant 2 : index
    %c0_50 = arith.constant 0 : index
    %c0_51 = arith.constant 0 : index
    %34 = vector.load %arg2[%c2, %c0_50, %c0_51] : memref<9x4x16xbf16, #tpu.memory_space<vmem>>, vector<1x4x16xbf16>
    %35 = vector.shape_cast %34 : vector<1x4x16xbf16> to vector<4x16xbf16>
    %cst_52 = arith.constant dense<0.000000e+00> : vector<256x16xf32>
    %36 = tpu.matmul %33, %35, %cst_52 {dimension_numbers = #tpu.dot_dimension_numbers<[1], [0], [0], [1], [0, 0, 1, 1], [], []>} : vector<256x4xbf16>, vector<4x16xbf16>, vector<256x16xf32> -> vector<256x16xf32>
    %37 = arith.addf %31, %36 : vector<256x16xf32>
    %c1_53 = arith.constant 1 : index
    %c15_54 = arith.constant 15 : index
    %c0_55 = arith.constant 0 : index
    %38 = vector.load %arg9[%c1_53, %c15_54, %c0_55] : memref<18x48x4xbf16, #tpu.memory_space<vmem>>, vector<16x16x4xbf16>
    %39 = vector.shape_cast %38 : vector<16x16x4xbf16> to vector<256x4xbf16>
    %c3 = arith.constant 3 : index
    %c0_56 = arith.constant 0 : index
    %c0_57 = arith.constant 0 : index
    %40 = vector.load %arg2[%c3, %c0_56, %c0_57] : memref<9x4x16xbf16, #tpu.memory_space<vmem>>, vector<1x4x16xbf16>
    %41 = vector.shape_cast %40 : vector<1x4x16xbf16> to vector<4x16xbf16>
    %cst_58 = arith.constant dense<0.000000e+00> : vector<256x16xf32>
    %42 = tpu.matmul %39, %41, %cst_58 {dimension_numbers = #tpu.dot_dimension_numbers<[1], [0], [0], [1], [0, 0, 1, 1], [], []>} : vector<256x4xbf16>, vector<4x16xbf16>, vector<256x16xf32> -> vector<256x16xf32>
    %43 = arith.addf %37, %42 : vector<256x16xf32>
    %c1_59 = arith.constant 1 : index
    %c16_60 = arith.constant 16 : index
    %c0_61 = arith.constant 0 : index
    %44 = vector.load %arg9[%c1_59, %c16_60, %c0_61] : memref<18x48x4xbf16, #tpu.memory_space<vmem>>, vector<16x16x4xbf16>
    %45 = vector.shape_cast %44 : vector<16x16x4xbf16> to vector<256x4xbf16>
    %c4 = arith.constant 4 : index
    %c0_62 = arith.constant 0 : index
    %c0_63 = arith.constant 0 : index
    %46 = vector.load %arg2[%c4, %c0_62, %c0_63] : memref<9x4x16xbf16, #tpu.memory_space<vmem>>, vector<1x4x16xbf16>
    %47 = vector.shape_cast %46 : vector<1x4x16xbf16> to vector<4x16xbf16>
    %cst_64 = arith.constant dense<0.000000e+00> : vector<256x16xf32>
    %48 = tpu.matmul %45, %47, %cst_64 {dimension_numbers = #tpu.dot_dimension_numbers<[1], [0], [0], [1], [0, 0, 1, 1], [], []>} : vector<256x4xbf16>, vector<4x16xbf16>, vector<256x16xf32> -> vector<256x16xf32>
    %49 = arith.addf %43, %48 : vector<256x16xf32>
    %c1_65 = arith.constant 1 : index
    %c17_66 = arith.constant 17 : index
    %c0_67 = arith.constant 0 : index
    %50 = vector.load %arg9[%c1_65, %c17_66, %c0_67] : memref<18x48x4xbf16, #tpu.memory_space<vmem>>, vector<16x16x4xbf16>
    %51 = vector.shape_cast %50 : vector<16x16x4xbf16> to vector<256x4xbf16>
    %c5 = arith.constant 5 : index
    %c0_68 = arith.constant 0 : index
    %c0_69 = arith.constant 0 : index
    %52 = vector.load %arg2[%c5, %c0_68, %c0_69] : memref<9x4x16xbf16, #tpu.memory_space<vmem>>, vector<1x4x16xbf16>
    %53 = vector.shape_cast %52 : vector<1x4x16xbf16> to vector<4x16xbf16>
    %cst_70 = arith.constant dense<0.000000e+00> : vector<256x16xf32>
    %54 = tpu.matmul %51, %53, %cst_70 {dimension_numbers = #tpu.dot_dimension_numbers<[1], [0], [0], [1], [0, 0, 1, 1], [], []>} : vector<256x4xbf16>, vector<4x16xbf16>, vector<256x16xf32> -> vector<256x16xf32>
    %55 = arith.addf %49, %54 : vector<256x16xf32>
    %c2_71 = arith.constant 2 : index
    %c15_72 = arith.constant 15 : index
    %c0_73 = arith.constant 0 : index
    %56 = vector.load %arg9[%c2_71, %c15_72, %c0_73] : memref<18x48x4xbf16, #tpu.memory_space<vmem>>, vector<16x16x4xbf16>
    %57 = vector.shape_cast %56 : vector<16x16x4xbf16> to vector<256x4xbf16>
    %c6 = arith.constant 6 : index
    %c0_74 = arith.constant 0 : index
    %c0_75 = arith.constant 0 : index
    %58 = vector.load %arg2[%c6, %c0_74, %c0_75] : memref<9x4x16xbf16, #tpu.memory_space<vmem>>, vector<1x4x16xbf16>
    %59 = vector.shape_cast %58 : vector<1x4x16xbf16> to vector<4x16xbf16>
    %cst_76 = arith.constant dense<0.000000e+00> : vector<256x16xf32>
    %60 = tpu.matmul %57, %59, %cst_76 {dimension_numbers = #tpu.dot_dimension_numbers<[1], [0], [0], [1], [0, 0, 1, 1], [], []>} : vector<256x4xbf16>, vector<4x16xbf16>, vector<256x16xf32> -> vector<256x16xf32>
    %61 = arith.addf %55, %60 : vector<256x16xf32>
    %c2_77 = arith.constant 2 : index
    %c16_78 = arith.constant 16 : index
    %c0_79 = arith.constant 0 : index
    %62 = vector.load %arg9[%c2_77, %c16_78, %c0_79] : memref<18x48x4xbf16, #tpu.memory_space<vmem>>, vector<16x16x4xbf16>
    %63 = vector.shape_cast %62 : vector<16x16x4xbf16> to vector<256x4xbf16>
    %c7 = arith.constant 7 : index
    %c0_80 = arith.constant 0 : index
    %c0_81 = arith.constant 0 : index
    %64 = vector.load %arg2[%c7, %c0_80, %c0_81] : memref<9x4x16xbf16, #tpu.memory_space<vmem>>, vector<1x4x16xbf16>
    %65 = vector.shape_cast %64 : vector<1x4x16xbf16> to vector<4x16xbf16>
    %cst_82 = arith.constant dense<0.000000e+00> : vector<256x16xf32>
    %66 = tpu.matmul %63, %65, %cst_82 {dimension_numbers = #tpu.dot_dimension_numbers<[1], [0], [0], [1], [0, 0, 1, 1], [], []>} : vector<256x4xbf16>, vector<4x16xbf16>, vector<256x16xf32> -> vector<256x16xf32>
    %67 = arith.addf %61, %66 : vector<256x16xf32>
    %c2_83 = arith.constant 2 : index
    %c17_84 = arith.constant 17 : index
    %c0_85 = arith.constant 0 : index
    %68 = vector.load %arg9[%c2_83, %c17_84, %c0_85] : memref<18x48x4xbf16, #tpu.memory_space<vmem>>, vector<16x16x4xbf16>
    %69 = vector.shape_cast %68 : vector<16x16x4xbf16> to vector<256x4xbf16>
    %c8 = arith.constant 8 : index
    %c0_86 = arith.constant 0 : index
    %c0_87 = arith.constant 0 : index
    %70 = vector.load %arg2[%c8, %c0_86, %c0_87] : memref<9x4x16xbf16, #tpu.memory_space<vmem>>, vector<1x4x16xbf16>
    %71 = vector.shape_cast %70 : vector<1x4x16xbf16> to vector<4x16xbf16>
    %cst_88 = arith.constant dense<0.000000e+00> : vector<256x16xf32>
    %72 = tpu.matmul %69, %71, %cst_88 {dimension_numbers = #tpu.dot_dimension_numbers<[1], [0], [0], [1], [0, 0, 1, 1], [], []>} : vector<256x4xbf16>, vector<4x16xbf16>, vector<256x16xf32> -> vector<256x16xf32>
    %73 = arith.addf %67, %72 : vector<256x16xf32>
    %c0_89 = arith.constant 0 : index
    %c0_90 = arith.constant 0 : index
    %74 = vector.load %arg3[%c0_89, %c0_90] : memref<1x16xf32, #tpu.memory_space<vmem>>, vector<1x16xf32>
    %c0_91 = arith.constant 0 : index
    %c0_92 = arith.constant 0 : index
    %75 = vector.load %arg4[%c0_91, %c0_92] : memref<1x16xf32, #tpu.memory_space<vmem>>, vector<1x16xf32>
    %76 = arith.mulf %73, %73 : vector<256x16xf32>
    %77 = tpu.concatenate %73, %76 in 1 : vector<256x16xf32>, vector<256x16xf32> -> vector<256x32xf32>
    %cst_93 = arith.constant dense<0.000000e+00> : vector<32xf32>
    %78 = vector.multi_reduction <add>, %77, %cst_93 [0] : vector<256x32xf32> to vector<32xf32>
    %79 = vector.shape_cast %78 : vector<32xf32> to vector<1x32xf32>
    %cst_94 = arith.constant 3.906250e-03 : f32
    %80 = vector.broadcast %cst_94 : f32 to vector<1x32xf32>
    %81 = arith.mulf %79, %80 : vector<1x32xf32>
    %82 = vector.extract_strided_slice %81 {offsets = [0, 0], sizes = [1, 16], strides = [1, 1]} : vector<1x32xf32> to vector<1x16xf32>
    %83 = vector.extract_strided_slice %81 {offsets = [0, 16], sizes = [1, 16], strides = [1, 1]} : vector<1x32xf32> to vector<1x16xf32>
    %84 = arith.mulf %82, %82 : vector<1x16xf32>
    %85 = arith.subf %83, %84 : vector<1x16xf32>
    %cst_95 = arith.constant 0.000000e+00 : f32
    %86 = vector.broadcast %cst_95 : f32 to vector<1x16xf32>
    %87 = arith.maximumf %85, %86 : vector<1x16xf32>
    %cst_96 = arith.constant 9.99999974E-6 : f32
    %88 = vector.broadcast %cst_96 : f32 to vector<1x16xf32>
    %89 = arith.addf %87, %88 : vector<1x16xf32>
    %90 = math.rsqrt %89 : vector<1x16xf32>
    %91 = arith.mulf %74, %90 : vector<1x16xf32>
    %92 = arith.mulf %82, %91 : vector<1x16xf32>
    %93 = arith.subf %75, %92 : vector<1x16xf32>
    %94 = vector.broadcast %91 : vector<1x16xf32> to vector<256x16xf32>
    %95 = arith.mulf %73, %94 : vector<256x16xf32>
    %96 = vector.broadcast %93 : vector<1x16xf32> to vector<256x16xf32>
    %97 = arith.addf %95, %96 : vector<256x16xf32>
    %cst_97 = arith.constant 0.000000e+00 : f32
    %98 = vector.broadcast %cst_97 : f32 to vector<256x16xf32>
    %99 = arith.cmpf oge, %97, %98 : vector<256x16xf32>
    %cst_98 = arith.constant 0.00999999977 : f32
    %100 = vector.broadcast %cst_98 : f32 to vector<256x16xf32>
    %101 = arith.mulf %100, %97 : vector<256x16xf32>
    %102 = arith.select %99, %97, %101 : vector<256x16xi1>, vector<256x16xf32>
    %103 = vector.shape_cast %102 : vector<256x16xf32> to vector<16x16x16xf32>
    %104 = arith.truncf %103 : vector<16x16x16xf32> to vector<16x16x16xbf16>
    %c1_99 = arith.constant 1 : index
    %c16_100 = arith.constant 16 : index
    %c0_101 = arith.constant 0 : index
    %105 = vector.load %arg10[%c1_99, %c16_100, %c0_101] : memref<18x48x16xbf16, #tpu.memory_space<vmem>>, vector<16x16x16xbf16>
    tpu.vector_store %arg10[%c1_99, %c16_100, %c0_101], %104 {strides = array<i32>} : memref<18x48x16xbf16, #tpu.memory_space<vmem>>, vector<16x16x16xbf16>,
    %cst_102 = arith.constant 0.000000e+00 : f32
    %106 = vector.broadcast %cst_102 : f32 to vector<256x8xf32>
    %c0_103 = arith.constant 0 : index
    %c15_104 = arith.constant 15 : index
    %c0_105 = arith.constant 0 : index
    %107 = vector.load %arg10[%c0_103, %c15_104, %c0_105] : memref<18x48x16xbf16, #tpu.memory_space<vmem>>, vector<16x16x16xbf16>
    %108 = vector.shape_cast %107 : vector<16x16x16xbf16> to vector<256x16xbf16>
    %c0_106 = arith.constant 0 : index
    %c0_107 = arith.constant 0 : index
    %c0_108 = arith.constant 0 : index
    %109 = vector.load %arg5[%c0_106, %c0_107, %c0_108] : memref<9x16x8xbf16, #tpu.memory_space<vmem>>, vector<1x16x8xbf16>
    %110 = vector.shape_cast %109 : vector<1x16x8xbf16> to vector<16x8xbf16>
    %cst_109 = arith.constant dense<0.000000e+00> : vector<256x8xf32>
    %111 = tpu.matmul %108, %110, %cst_109 {dimension_numbers = #tpu.dot_dimension_numbers<[1], [0], [0], [1], [0, 0, 1, 1], [], []>} : vector<256x16xbf16>, vector<16x8xbf16>, vector<256x8xf32> -> vector<256x8xf32>
    %112 = arith.addf %106, %111 : vector<256x8xf32>
    %c0_110 = arith.constant 0 : index
    %c16_111 = arith.constant 16 : index
    %c0_112 = arith.constant 0 : index
    %113 = vector.load %arg10[%c0_110, %c16_111, %c0_112] : memref<18x48x16xbf16, #tpu.memory_space<vmem>>, vector<16x16x16xbf16>
    %114 = vector.shape_cast %113 : vector<16x16x16xbf16> to vector<256x16xbf16>
    %c1_113 = arith.constant 1 : index
    %c0_114 = arith.constant 0 : index
    %c0_115 = arith.constant 0 : index
    %115 = vector.load %arg5[%c1_113, %c0_114, %c0_115] : memref<9x16x8xbf16, #tpu.memory_space<vmem>>, vector<1x16x8xbf16>
    %116 = vector.shape_cast %115 : vector<1x16x8xbf16> to vector<16x8xbf16>
    %cst_116 = arith.constant dense<0.000000e+00> : vector<256x8xf32>
    %117 = tpu.matmul %114, %116, %cst_116 {dimension_numbers = #tpu.dot_dimension_numbers<[1], [0], [0], [1], [0, 0, 1, 1], [], []>} : vector<256x16xbf16>, vector<16x8xbf16>, vector<256x8xf32> -> vector<256x8xf32>
    %118 = arith.addf %112, %117 : vector<256x8xf32>
    %c0_117 = arith.constant 0 : index
    %c17_118 = arith.constant 17 : index
    %c0_119 = arith.constant 0 : index
    %119 = vector.load %arg10[%c0_117, %c17_118, %c0_119] : memref<18x48x16xbf16, #tpu.memory_space<vmem>>, vector<16x16x16xbf16>
    %120 = vector.shape_cast %119 : vector<16x16x16xbf16> to vector<256x16xbf16>
    %c2_120 = arith.constant 2 : index
    %c0_121 = arith.constant 0 : index
    %c0_122 = arith.constant 0 : index
    %121 = vector.load %arg5[%c2_120, %c0_121, %c0_122] : memref<9x16x8xbf16, #tpu.memory_space<vmem>>, vector<1x16x8xbf16>
    %122 = vector.shape_cast %121 : vector<1x16x8xbf16> to vector<16x8xbf16>
    %cst_123 = arith.constant dense<0.000000e+00> : vector<256x8xf32>
    %123 = tpu.matmul %120, %122, %cst_123 {dimension_numbers = #tpu.dot_dimension_numbers<[1], [0], [0], [1], [0, 0, 1, 1], [], []>} : vector<256x16xbf16>, vector<16x8xbf16>, vector<256x8xf32> -> vector<256x8xf32>
    %124 = arith.addf %118, %123 : vector<256x8xf32>
    %c1_124 = arith.constant 1 : index
    %c15_125 = arith.constant 15 : index
    %c0_126 = arith.constant 0 : index
    %125 = vector.load %arg10[%c1_124, %c15_125, %c0_126] : memref<18x48x16xbf16, #tpu.memory_space<vmem>>, vector<16x16x16xbf16>
    %126 = vector.shape_cast %125 : vector<16x16x16xbf16> to vector<256x16xbf16>
    %c3_127 = arith.constant 3 : index
    %c0_128 = arith.constant 0 : index
    %c0_129 = arith.constant 0 : index
    %127 = vector.load %arg5[%c3_127, %c0_128, %c0_129] : memref<9x16x8xbf16, #tpu.memory_space<vmem>>, vector<1x16x8xbf16>
    %128 = vector.shape_cast %127 : vector<1x16x8xbf16> to vector<16x8xbf16>
    %cst_130 = arith.constant dense<0.000000e+00> : vector<256x8xf32>
    %129 = tpu.matmul %126, %128, %cst_130 {dimension_numbers = #tpu.dot_dimension_numbers<[1], [0], [0], [1], [0, 0, 1, 1], [], []>} : vector<256x16xbf16>, vector<16x8xbf16>, vector<256x8xf32> -> vector<256x8xf32>
    %130 = arith.addf %124, %129 : vector<256x8xf32>
    %c1_131 = arith.constant 1 : index
    %c16_132 = arith.constant 16 : index
    %c0_133 = arith.constant 0 : index
    %131 = vector.load %arg10[%c1_131, %c16_132, %c0_133] : memref<18x48x16xbf16, #tpu.memory_space<vmem>>, vector<16x16x16xbf16>
    %132 = vector.shape_cast %131 : vector<16x16x16xbf16> to vector<256x16xbf16>
    %c4_134 = arith.constant 4 : index
    %c0_135 = arith.constant 0 : index
    %c0_136 = arith.constant 0 : index
    %133 = vector.load %arg5[%c4_134, %c0_135, %c0_136] : memref<9x16x8xbf16, #tpu.memory_space<vmem>>, vector<1x16x8xbf16>
    %134 = vector.shape_cast %133 : vector<1x16x8xbf16> to vector<16x8xbf16>
    %cst_137 = arith.constant dense<0.000000e+00> : vector<256x8xf32>
    %135 = tpu.matmul %132, %134, %cst_137 {dimension_numbers = #tpu.dot_dimension_numbers<[1], [0], [0], [1], [0, 0, 1, 1], [], []>} : vector<256x16xbf16>, vector<16x8xbf16>, vector<256x8xf32> -> vector<256x8xf32>
    %136 = arith.addf %130, %135 : vector<256x8xf32>
    %c1_138 = arith.constant 1 : index
    %c17_139 = arith.constant 17 : index
    %c0_140 = arith.constant 0 : index
    %137 = vector.load %arg10[%c1_138, %c17_139, %c0_140] : memref<18x48x16xbf16, #tpu.memory_space<vmem>>, vector<16x16x16xbf16>
    %138 = vector.shape_cast %137 : vector<16x16x16xbf16> to vector<256x16xbf16>
    %c5_141 = arith.constant 5 : index
    %c0_142 = arith.constant 0 : index
    %c0_143 = arith.constant 0 : index
    %139 = vector.load %arg5[%c5_141, %c0_142, %c0_143] : memref<9x16x8xbf16, #tpu.memory_space<vmem>>, vector<1x16x8xbf16>
    %140 = vector.shape_cast %139 : vector<1x16x8xbf16> to vector<16x8xbf16>
    %cst_144 = arith.constant dense<0.000000e+00> : vector<256x8xf32>
    %141 = tpu.matmul %138, %140, %cst_144 {dimension_numbers = #tpu.dot_dimension_numbers<[1], [0], [0], [1], [0, 0, 1, 1], [], []>} : vector<256x16xbf16>, vector<16x8xbf16>, vector<256x8xf32> -> vector<256x8xf32>
    %142 = arith.addf %136, %141 : vector<256x8xf32>
    %c2_145 = arith.constant 2 : index
    %c15_146 = arith.constant 15 : index
    %c0_147 = arith.constant 0 : index
    %143 = vector.load %arg10[%c2_145, %c15_146, %c0_147] : memref<18x48x16xbf16, #tpu.memory_space<vmem>>, vector<16x16x16xbf16>
    %144 = vector.shape_cast %143 : vector<16x16x16xbf16> to vector<256x16xbf16>
    %c6_148 = arith.constant 6 : index
    %c0_149 = arith.constant 0 : index
    %c0_150 = arith.constant 0 : index
    %145 = vector.load %arg5[%c6_148, %c0_149, %c0_150] : memref<9x16x8xbf16, #tpu.memory_space<vmem>>, vector<1x16x8xbf16>
    %146 = vector.shape_cast %145 : vector<1x16x8xbf16> to vector<16x8xbf16>
    %cst_151 = arith.constant dense<0.000000e+00> : vector<256x8xf32>
    %147 = tpu.matmul %144, %146, %cst_151 {dimension_numbers = #tpu.dot_dimension_numbers<[1], [0], [0], [1], [0, 0, 1, 1], [], []>} : vector<256x16xbf16>, vector<16x8xbf16>, vector<256x8xf32> -> vector<256x8xf32>
    %148 = arith.addf %142, %147 : vector<256x8xf32>
    %c2_152 = arith.constant 2 : index
    %c16_153 = arith.constant 16 : index
    %c0_154 = arith.constant 0 : index
    %149 = vector.load %arg10[%c2_152, %c16_153, %c0_154] : memref<18x48x16xbf16, #tpu.memory_space<vmem>>, vector<16x16x16xbf16>
    %150 = vector.shape_cast %149 : vector<16x16x16xbf16> to vector<256x16xbf16>
    %c7_155 = arith.constant 7 : index
    %c0_156 = arith.constant 0 : index
    %c0_157 = arith.constant 0 : index
    %151 = vector.load %arg5[%c7_155, %c0_156, %c0_157] : memref<9x16x8xbf16, #tpu.memory_space<vmem>>, vector<1x16x8xbf16>
    %152 = vector.shape_cast %151 : vector<1x16x8xbf16> to vector<16x8xbf16>
    %cst_158 = arith.constant dense<0.000000e+00> : vector<256x8xf32>
    %153 = tpu.matmul %150, %152, %cst_158 {dimension_numbers = #tpu.dot_dimension_numbers<[1], [0], [0], [1], [0, 0, 1, 1], [], []>} : vector<256x16xbf16>, vector<16x8xbf16>, vector<256x8xf32> -> vector<256x8xf32>
    %154 = arith.addf %148, %153 : vector<256x8xf32>
    %c2_159 = arith.constant 2 : index
    %c17_160 = arith.constant 17 : index
    %c0_161 = arith.constant 0 : index
    %155 = vector.load %arg10[%c2_159, %c17_160, %c0_161] : memref<18x48x16xbf16, #tpu.memory_space<vmem>>, vector<16x16x16xbf16>
    %156 = vector.shape_cast %155 : vector<16x16x16xbf16> to vector<256x16xbf16>
    %c8_162 = arith.constant 8 : index
    %c0_163 = arith.constant 0 : index
    %c0_164 = arith.constant 0 : index
    %157 = vector.load %arg5[%c8_162, %c0_163, %c0_164] : memref<9x16x8xbf16, #tpu.memory_space<vmem>>, vector<1x16x8xbf16>
    %158 = vector.shape_cast %157 : vector<1x16x8xbf16> to vector<16x8xbf16>
    %cst_165 = arith.constant dense<0.000000e+00> : vector<256x8xf32>
    %159 = tpu.matmul %156, %158, %cst_165 {dimension_numbers = #tpu.dot_dimension_numbers<[1], [0], [0], [1], [0, 0, 1, 1], [], []>} : vector<256x16xbf16>, vector<16x8xbf16>, vector<256x8xf32> -> vector<256x8xf32>
    %160 = arith.addf %154, %159 : vector<256x8xf32>
    %c0_166 = arith.constant 0 : index
    %c0_167 = arith.constant 0 : index
    %161 = vector.load %arg6[%c0_166, %c0_167] : memref<1x8xf32, #tpu.memory_space<vmem>>, vector<1x8xf32>
    %c0_168 = arith.constant 0 : index
    %c0_169 = arith.constant 0 : index
    %162 = vector.load %arg7[%c0_168, %c0_169] : memref<1x8xf32, #tpu.memory_space<vmem>>, vector<1x8xf32>
    %163 = arith.mulf %160, %160 : vector<256x8xf32>
    %164 = tpu.concatenate %160, %163 in 1 : vector<256x8xf32>, vector<256x8xf32> -> vector<256x16xf32>
    %cst_170 = arith.constant dense<0.000000e+00> : vector<16xf32>
    %165 = vector.multi_reduction <add>, %164, %cst_170 [0] : vector<256x16xf32> to vector<16xf32>
    %166 = vector.shape_cast %165 : vector<16xf32> to vector<1x16xf32>
    %cst_171 = arith.constant 3.906250e-03 : f32
    %167 = vector.broadcast %cst_171 : f32 to vector<1x16xf32>
    %168 = arith.mulf %166, %167 : vector<1x16xf32>
    %169 = vector.extract_strided_slice %168 {offsets = [0, 0], sizes = [1, 8], strides = [1, 1]} : vector<1x16xf32> to vector<1x8xf32>
    %170 = vector.extract_strided_slice %168 {offsets = [0, 8], sizes = [1, 8], strides = [1, 1]} : vector<1x16xf32> to vector<1x8xf32>
    %171 = arith.mulf %169, %169 : vector<1x8xf32>
    %172 = arith.subf %170, %171 : vector<1x8xf32>
    %cst_172 = arith.constant 0.000000e+00 : f32
    %173 = vector.broadcast %cst_172 : f32 to vector<1x8xf32>
    %174 = arith.maximumf %172, %173 : vector<1x8xf32>
    %cst_173 = arith.constant 9.99999974E-6 : f32
    %175 = vector.broadcast %cst_173 : f32 to vector<1x8xf32>
    %176 = arith.addf %174, %175 : vector<1x8xf32>
    %177 = math.rsqrt %176 : vector<1x8xf32>
    %178 = arith.mulf %161, %177 : vector<1x8xf32>
    %179 = arith.mulf %169, %178 : vector<1x8xf32>
    %180 = arith.subf %162, %179 : vector<1x8xf32>
    %181 = vector.broadcast %178 : vector<1x8xf32> to vector<256x8xf32>
    %182 = arith.mulf %160, %181 : vector<256x8xf32>
    %183 = vector.broadcast %180 : vector<1x8xf32> to vector<256x8xf32>
    %184 = arith.addf %182, %183 : vector<256x8xf32>
    %cst_174 = arith.constant 0.000000e+00 : f32
    %185 = vector.broadcast %cst_174 : f32 to vector<256x8xf32>
    %186 = arith.cmpf oge, %184, %185 : vector<256x8xf32>
    %cst_175 = arith.constant 0.00999999977 : f32
    %187 = vector.broadcast %cst_175 : f32 to vector<256x8xf32>
    %188 = arith.mulf %187, %184 : vector<256x8xf32>
    %189 = arith.select %186, %184, %188 : vector<256x8xi1>, vector<256x8xf32>
    %190 = tpu.transpose %189, [1, 0] : vector<256x8xf32> -> vector<8x256xf32>
    %c0_176 = arith.constant 0 : index
    %c0_177 = arith.constant 0 : index
    %c0_178 = arith.constant 0 : index
    %191 = vector.load %arg8[%c0_176, %c0_177, %c0_178] : memref<1x8x256xf32, #tpu.memory_space<vmem>>, vector<1x8x256xf32>
    %192 = vector.shape_cast %191 : vector<1x8x256xf32> to vector<8x256xf32>
    %193 = vector.shape_cast %190 : vector<8x256xf32> to vector<1x8x256xf32>
    tpu.vector_store %arg8[%c0_176, %c0_177, %c0_178], %193 {strides = array<i32>} : memref<1x8x256xf32, #tpu.memory_space<vmem>>, vector<1x8x256xf32>,
    return
  }
  func.func @transform_0(%arg0: i32) -> (i32, i32, i32, i32) {
    %c0_i32 = arith.constant 0 : i32
    %c0_i32_0 = arith.constant 0 : i32
    %c0_i32_1 = arith.constant 0 : i32
    %c0_i32_2 = arith.constant 0 : i32
    return %arg0, %c0_i32, %c0_i32_0, %c0_i32_1 : i32, i32, i32, i32
  }
  func.func @transform_1(%arg0: i32) -> (i32, i32, i32) {
    %c0_i32 = arith.constant 0 : i32
    %c0_i32_0 = arith.constant 0 : i32
    %c0_i32_1 = arith.constant 0 : i32
    %c0_i32_2 = arith.constant 0 : i32
    return %c0_i32, %c0_i32_0, %c0_i32_1 : i32, i32, i32
  }
  func.func @transform_2(%arg0: i32) -> (i32, i32) {
    %c0_i32 = arith.constant 0 : i32
    %c0_i32_0 = arith.constant 0 : i32
    %c0_i32_1 = arith.constant 0 : i32
    return %c0_i32, %c0_i32_0 : i32, i32
  }
  func.func @transform_3(%arg0: i32) -> (i32, i32) {
    %c0_i32 = arith.constant 0 : i32
    %c0_i32_0 = arith.constant 0 : i32
    %c0_i32_1 = arith.constant 0 : i32
    return %c0_i32, %c0_i32_0 : i32, i32
  }
  func.func @transform_4(%arg0: i32) -> (i32, i32, i32) {
    %c0_i32 = arith.constant 0 : i32
    %c0_i32_0 = arith.constant 0 : i32
    %c0_i32_1 = arith.constant 0 : i32
    %c0_i32_2 = arith.constant 0 : i32
    return %c0_i32, %c0_i32_0, %c0_i32_1 : i32, i32, i32
  }
  func.func @transform_5(%arg0: i32) -> (i32, i32) {
    %c0_i32 = arith.constant 0 : i32
    %c0_i32_0 = arith.constant 0 : i32
    %c0_i32_1 = arith.constant 0 : i32
    return %c0_i32, %c0_i32_0 : i32, i32
  }
  func.func @transform_6(%arg0: i32) -> (i32, i32) {
    %c0_i32 = arith.constant 0 : i32
    %c0_i32_0 = arith.constant 0 : i32
    %c0_i32_1 = arith.constant 0 : i32
    return %c0_i32, %c0_i32_0 : i32, i32
  }
  func.func @transform_7(%arg0: i32) -> (i32, i32, i32) {
    %c0_i32 = arith.constant 0 : i32
    %c0_i32_0 = arith.constant 0 : i32
    %c0_i32_1 = arith.constant 0 : i32
    return %arg0, %c0_i32, %c0_i32_0 : i32, i32, i32
  }
}

</mosaic_0001>

<bundles_post_ra>
// kernel: double_conv2d_forward.1
= control target key start
LH: loop header
LB: loop body
LE: loop exit
PB: predicated region body
PF: predicated region fallthrough
CT: control target
= control target key end

     0   :  { %s10419_s24 = smov 0   ;;  %s13324_s0 = inlined_call_operand.vmem [shape: bf16[2,16,16,4], index: 0, kind: input, shape index: {}]   ;;  %s13325_s1 = inlined_call_operand.vmem [shape: bf16[9,4,16], index: 1, kind: input, shape index: {}]   ;;  %s13326_s2 = inlined_call_operand.vmem [shape: f32[1,16], index: 2, kind: input, shape index: {}]   ;;  %s13327_s3 = inlined_call_operand.vmem [shape: f32[1,16], index: 3, kind: input, shape index: {}]   ;;  %s13328_s4 = inlined_call_operand.vmem [shape: bf16[9,16,8], index: 4, kind: input, shape index: {}]   ;;  %s13329_s5 = inlined_call_operand.vmem [shape: f32[1,8], index: 5, kind: input, shape index: {}]   ;;  %s13330_s6 = inlined_call_operand.vmem [shape: f32[1,8], index: 6, kind: input, shape index: {}]   ;;  %s13331_s7 = inlined_call_operand.vmem [shape: f32[2,8,256], index: 7, kind: output, shape index: {}]  }
   0x1 LB: > { %s8532_s25 = sadd.s32 4294967295, %s10371_s24   ;;  %p8536_p0 = scmp.ge.s32.totalorder %s10371_s24, 1  ;;  %s10371_s24 = sphi %s10419_s24, %s17_s24  }
   0x2   : > { %p237_p1 = scmp.lt.s32.totalorder %s10371_s24, 3 }
   0x4   : > { %p238_p2 = pnand %p8536_p0, %p237_p1 }
   0x6   : > { %241 = sbr.rel (%p238_p2) target bundleno = 2602 (0xa2a), region = 48 }
   0xd   : > { %v8557_v0 = vld [vmem:[%s13325_s1 + $0x2] sm:$0x3]  ;;  %vm773_vm0 = vcmask 1041408   ;;  %vm280_vm1 = vcmask 31744   ;;  %p10432_p3 = scmp.lt.s32.totalorder %s8532_s25, 1  ;;  %v13332_v2 = vmov 0  }
   0xe   : > { %10312 = vmatprep.subr.msk.bf16.mxu0 %vm773_vm0, %v8557_v0  ;;  %v775_v1 = vsel %vm773_vm0, %v8557_v0, 0  ;;  %282 = vst.msk [vmem:[#allocation2 + $0x8] sm:$0xff] %vm280_vm1, %v13332_v2  ;;  %281 = vst.msk [vmem:[#allocation2] sm:$0xff] %vm280_vm1, %v13332_v2  ;;  %v738_v3 = vld [vmem:[%s13325_s1] sm:$0x3]  ;;  %vm13359_vm4 = vcmask 130048  }
   0xf   : > { %283 = vst.msk [vmem:[#allocation2 + $0x10] sm:$0xff] %vm280_vm1, %v13332_v2  ;;  %285 = vst.msk [vmem:[#allocation2 + $0x198] sm:$0xff] %vm280_vm1, %v13332_v2  ;;  %9189 = vmatpush3.bf16.msra.mxu0 %v775_v1  ;;  %s13726_s25 = smov (!%p10432_p3, %s8532_s25), 1  ;;  %v10557_v12 = vld [vmem:[%s13325_s1 + $0x4] sm:$0x3]  ;;  %v987_v13 = vsel %vm773_vm0, %v738_v3, 0 }
  0x10   : > { %286 = vst.msk [vmem:[#allocation2 + $0x1a0] sm:$0xff] %vm280_vm1, %v13332_v2  ;;  %287 = vst.msk [vmem:[#allocation2 + $0x1a8] sm:$0xff] %vm280_vm1, %v13332_v2  ;;  %10313 = vmatprep.subr.msk.bf16.mxu0 %vm773_vm0, %v738_v3  ;;  %s8880_s8 = sshll.u32 %s13726_s25, 7  ;;  %vm13358_vm2 = vsmask.f32 256  ;;  %v1426_v63 = vsel %vm773_vm0, %v10557_v12, 0 }
  0x11   : > { %289 = vst.msk [vmem:[#allocation2 + $0x18] sm:$0xff] %vm280_vm1, %v13332_v2  ;;  %290 = vst.msk [vmem:[#allocation2 + $0x30] sm:$0xff] %vm280_vm1, %v13332_v2  ;;  %s10536_s11 = scalar_lea.vmem %s13324_s0, %s8880_s8  ;;  %vm13357_vm3 = vsmask.f32 7424  ;;  %s10374_s28 = smov 16   ;;  %vm4156_vm5 = vcmask 261120  }
  0x12   : > { %291 = vst.msk [vmem:[#allocation2 + $0x48] sm:$0xff] %vm280_vm1, %v13332_v2  ;;  %292 = vst.msk [vmem:[#allocation2 + $0x60] sm:$0xff] %vm280_vm1, %v13332_v2  ;;  %v10335_v4 = vld [vmem:[%s10536_s11] sm:$0xff]   ;;  %v10336_v5 = vld [vmem:[%s10536_s11 + $0x8] sm:$0xff]   ;;  %s10376_s29 = smov 112   ;;  %s10377_s8 = smov 8  }
  0x13   : > { %293 = vst.msk [vmem:[#allocation2 + $0x78] sm:$0xff] %vm280_vm1, %v13332_v2  ;;  %294 = vst.msk [vmem:[#allocation2 + $0x90] sm:$0xff] %vm280_vm1, %v13332_v2  ;;  %v10337_v7 = vld [vmem:[%s10536_s11 + $0x10] sm:$0xff]   ;;  %v10338_v8 = vld [vmem:[%s10536_s11 + $0x18] sm:$0xff]   ;;  %s10378_s9 = smov 120   ;;  %s8881_s14 = sshll.u32 %s13726_s25, 4 }
  0x14   : > { %295 = vst.msk [vmem:[#allocation2 + $0xa8] sm:$0xff] %vm280_vm1, %v13332_v2  ;;  %296 = vst.msk [vmem:[#allocation2 + $0xc0] sm:$0xff] %vm280_vm1, %v13332_v2  ;;  %v10339_v9 = vld [vmem:[%s10536_s11 + $0x20] sm:$0xff]   ;;  %v10340_v10 = vld [vmem:[%s10536_s11 + $0x28] sm:$0xff]   ;;  %s278_s17 = scalar_lea.vmem %s13331_s7, %s8881_s14 }
  0x15   : > { %297 = vst.msk [vmem:[#allocation2 + $0xd8] sm:$0xff] %vm280_vm1, %v13332_v2  ;;  %298 = vst.msk [vmem:[#allocation2 + $0xf0] sm:$0xff] %vm280_vm1, %v13332_v2  ;;  %v10540_v6 = vld [vmem:[#allocation2 + $0x8] sm:$0xff]  ;;  %v10341_v11 = vld [vmem:[%s10536_s11 + $0x30] sm:$0xff]  }
  0x16   : > { %299 = vst.msk [vmem:[#allocation2 + $0x108] sm:$0xff] %vm280_vm1, %v13332_v2  ;;  %300 = vst.msk [vmem:[#allocation2 + $0x120] sm:$0xff] %vm280_vm1, %v13332_v2  ;;  %9190 = vmatprep.mubr.msk.bf16.mxu0 %vm280_vm1, %v10540_v6  ;;  %v10342_v14 = vld [vmem:[%s10536_s11 + $0x38] sm:$0xff]   ;;  %v10343_v16 = vld [vmem:[%s10536_s11 + $0x40] sm:$0xff]   ;;  %v551_v34 = vshrl.u32 %v10540_v6, 16  ;;  %v554_v38 = vshll.u32 %v10540_v6, 16 }
  0x17   : > { %301 = vst.msk [vmem:[#allocation2 + $0x138] sm:$0xff] %vm280_vm1, %v13332_v2  ;;  %302 = vst.msk [vmem:[#allocation2 + $0x150] sm:$0xff] %vm280_vm1, %v13332_v2  ;;  %v10344_v18 = vld [vmem:[%s10536_s11 + $0x48] sm:$0xff]   ;;  %v10345_v19 = vld [vmem:[%s10536_s11 + $0x50] sm:$0xff]  }
  0x18   : > { %303 = vst.msk [vmem:[#allocation2 + $0x168] sm:$0xff] %vm280_vm1, %v13332_v2  ;;  %304 = vst.msk [vmem:[#allocation2 + $0x180] sm:$0xff] %vm280_vm1, %v13332_v2  ;;  %v10346_v20 = vld [vmem:[%s10536_s11 + $0x58] sm:$0xff]   ;;  %v10347_v23 = vld [vmem:[%s10536_s11 + $0x60] sm:$0xff]   ;;  %v553_v37 = vrot.slane %v551_v34, 7 }
  0x19   : > { %307 = vst.msk [vmem:[#allocation2 + $0x28] sm:$0xff] %vm280_vm1, %v13332_v2  ;;  %308 = vst.msk [vmem:[#allocation2 + $0x40] sm:$0xff] %vm280_vm1, %v13332_v2  ;;  %v10348_v24 = vld [vmem:[%s10536_s11 + $0x68] sm:$0xff]   ;;  %v10349_v25 = vld [vmem:[%s10536_s11 + $0x70] sm:$0xff]  }
  0x1a   : > { %309 = vst.msk [vmem:[#allocation2 + $0x58] sm:$0xff] %vm280_vm1, %v13332_v2  ;;  %310 = vst.msk [vmem:[#allocation2 + $0x70] sm:$0xff] %vm280_vm1, %v13332_v2  ;;  %v556_v42 = vor.u32 %v554_v38, %v553_v37  ;;  %v515_v45 = vld [vmem:[#allocation2 + $0x18] sm:$0x80]  ;;  %v517_v46 = vld [vmem:[#allocation2 + $0x30] sm:$0x80] }
  0x1b   : > { %311 = vst.msk [vmem:[#allocation2 + $0x88] sm:$0xff] %vm280_vm1, %v13332_v2  ;;  %312 = vst.msk [vmem:[#allocation2 + $0xa0] sm:$0xff] %vm280_vm1, %v13332_v2  ;;  %v559_v50 = vshrl.u32 %v515_v45, 16  ;;  %v571_v54 = vshrl.u32 %v517_v46, 16  ;;  %v519_v61 = vld [vmem:[#allocation2 + $0x48] sm:$0x80] }
  0x1c   : > { %313 = vst.msk [vmem:[#allocation2 + $0xb8] sm:$0xff] %vm280_vm1, %v13332_v2  ;;  %314 = vst.msk [vmem:[#allocation2 + $0xd0] sm:$0xff] %vm280_vm1, %v13332_v2  ;;  %v521_v62 = vld [vmem:[#allocation2 + $0x60] sm:$0x80] }
  0x1d   : > { %315 = vst.msk [vmem:[#allocation2 + $0xe8] sm:$0xff] %vm280_vm1, %v13332_v2  ;;  %316 = vst.msk [vmem:[#allocation2 + $0x100] sm:$0xff] %vm280_vm1, %v13332_v2  ;;  %v561_v57 = vrot.slane %v559_v50, 7  ;;  %v573_v60 = vrot.slane %v571_v54, 7  ;;  %v527_v54 = vld [vmem:[#allocation2 + $0xa8] sm:$0x80] }
  0x1e   : > { %317 = vst.msk [vmem:[#allocation2 + $0x118] sm:$0xff] %vm280_vm1, %v13332_v2  ;;  %318 = vst.msk [vmem:[#allocation2 + $0x130] sm:$0xff] %vm280_vm1, %v13332_v2 }
  0x1f   : > { %319 = vst.msk [vmem:[#allocation2 + $0x148] sm:$0xff] %vm280_vm1, %v13332_v2  ;;  %320 = vst.msk [vmem:[#allocation2 + $0x160] sm:$0xff] %vm280_vm1, %v13332_v2 }
  0x20   : > { %321 = vst.msk [vmem:[#allocation2 + $0x178] sm:$0xff] %vm280_vm1, %v13332_v2  ;;  %322 = vst.msk [vmem:[#allocation2 + $0x190] sm:$0xff] %vm280_vm1, %v13332_v2 }
  0x21   : > { %288 = vst.msk [vmem:[#allocation2] sm:$0xff] %vm280_vm1, %v13332_v2  ;;  %305 = vst.msk [vmem:[#allocation2 + $0x198] sm:$0xff] %vm280_vm1, %v13332_v2 }
  0x22   : > { %306 = vst.msk [vmem:[#allocation2 + $0x10] sm:$0xff] %vm280_vm1, %v13332_v2  ;;  %323 = vst.msk [vmem:[#allocation2 + $0x1a8] sm:$0xff] %vm280_vm1, %v13332_v2 }
  0x23   : > { %497 = vst.msk [vmem:[#allocation2 + $0x20] sm:$0xff] %vm280_vm1, %v10335_v4  ;;  %498 = vst.msk [vmem:[#allocation2 + $0x38] sm:$0xff] %vm280_vm1, %v10336_v5  ;;  %v583_v4 = vshrl.u32 %v519_v61, 16 }
  0x24   : > { %499 = vst.msk [vmem:[#allocation2 + $0x50] sm:$0xff] %vm280_vm1, %v10337_v7  ;;  %500 = vst.msk [vmem:[#allocation2 + $0x68] sm:$0xff] %vm280_vm1, %v10338_v8 }
  0x25   : > { %501 = vst.msk [vmem:[#allocation2 + $0x80] sm:$0xff] %vm280_vm1, %v10339_v9  ;;  %502 = vst.msk [vmem:[#allocation2 + $0x98] sm:$0xff] %vm280_vm1, %v10340_v10  ;;  %v595_v9 = vshrl.u32 %v521_v62, 16  ;;  %v10681_v10 = vld [vmem:[%s13325_s1 + $0x6] sm:$0x3] }
  0x26   : > { %503 = vst.msk [vmem:[#allocation2 + $0xb0] sm:$0xff] %vm280_vm1, %v10341_v11  ;;  %504 = vst.msk [vmem:[#allocation2 + $0xc8] sm:$0xff] %vm280_vm1, %v10342_v14 }
  0x27   : > { %505 = vst.msk [vmem:[#allocation2 + $0xe0] sm:$0xff] %vm280_vm1, %v10343_v16  ;;  %506 = vst.msk [vmem:[#allocation2 + $0xf8] sm:$0xff] %vm280_vm1, %v10344_v18  ;;  %v597_v18 = vrot.slane %v595_v9, 7 }
  0x28   : > { %507 = vst.msk [vmem:[#allocation2 + $0x110] sm:$0xff] %vm280_vm1, %v10345_v19  ;;  %508 = vst.msk [vmem:[#allocation2 + $0x128] sm:$0xff] %vm280_vm1, %v10346_v20  ;;  %v513_v35 = vld [vmem:[#allocation2] sm:$0x80]  ;;  %v523_v19 = vld [vmem:[#allocation2 + $0x78] sm:$0x80] }
  0x29   : > { %509 = vst.msk [vmem:[#allocation2 + $0x140] sm:$0xff] %vm280_vm1, %v10347_v23  ;;  %510 = vst.msk [vmem:[#allocation2 + $0x158] sm:$0xff] %vm280_vm1, %v10348_v24  ;;  %v547_v40 = vshrl.u32 %v513_v35, 16  ;;  %v525_v20 = vld [vmem:[#allocation2 + $0x90] sm:$0x80]  ;;  %v607_v35 = vshrl.u32 %v523_v19, 16 }
  0x2a   : > { %v10562_v15 = vld [vmem:[#allocation2 + $0x20] sm:$0xff]  ;;  %v10568_v17 = vld [vmem:[#allocation2 + $0x38] sm:$0xff]  ;;  %511 = vst.msk [vmem:[#allocation2 + $0x170] sm:$0xff] %vm280_vm1, %v10349_v25 }
  0x2b   : > { %9191 = vmatmul.mubr.msk.bf16.vlgmr.msra.gmra.mrb[0].mxu0 %vm280_vm1, %v10562_v15  ;;  %v10581_v21 = vld [vmem:[#allocation2 + $0x50] sm:$0xff]  ;;  %v10583_v22 = vld [vmem:[#allocation2 + $0x68] sm:$0xff]  ;;  %v563_v41 = vshrl.u32 %v10562_v15, 16  ;;  %v575_v43 = vshrl.u32 %v10568_v17, 16  ;;  %v549_v44 = vrot.slane %v547_v40, 7  ;;  %v566_v48 = vshll.u32 %v10562_v15, 16 }
  0x2c   : > { %9223 = vmatpush3.bf16.msra.mxu0 %v987_v13  ;;  %9194 = vmatprep.mubr.msk.bf16.mxu0 %vm280_vm1, %v10568_v17  ;;  %v10596_v26 = vld [vmem:[#allocation2 + $0x80] sm:$0xff]  ;;  %v10598_v27 = vld [vmem:[#allocation2 + $0x98] sm:$0xff]  ;;  %v578_v52 = vshll.u32 %v10568_v17, 16  ;;  %v587_v56 = vshrl.u32 %v10581_v21, 16  ;;  %v599_v59 = vshrl.u32 %v10583_v22, 16  ;;  %v590_v1 = vshll.u32 %v10581_v21, 16 }
  0x2d   : > { %10314 = vmatprep.subr.msk.bf16.mxu0 %vm773_vm0, %v10557_v12  ;;  %v10604_v28 = vld [vmem:[#allocation2 + $0xb0] sm:$0xff]  ;;  %v10606_v29 = vld [vmem:[#allocation2 + $0xc8] sm:$0xff]  ;;  %v565_v47 = vrot.slane %v563_v41, 7  ;;  %v577_v51 = vrot.slane %v575_v43, 7  ;;  %v557_v53 = vsel %vm13358_vm2, %v549_v44, %v556_v42  ;;  %v602_v7 = vshll.u32 %v10583_v22, 16 }
  0x2e   : > { %v10612_v30 = vld [vmem:[#allocation2 + $0xe0] sm:$0xff]  ;;  %v10614_v31 = vld [vmem:[#allocation2 + $0xf8] sm:$0xff]  ;;  %v589_v0 = vrot.slane %v587_v56, 7  ;;  %v601_v5 = vrot.slane %v599_v59, 7  ;;  %v611_v12 = vshrl.u32 %v10596_v26, 16  ;;  %v585_v13 = vrot.slane %v583_v4, 7 }
  0x2f   : > { %v10620_v32 = vld [vmem:[#allocation2 + $0x110] sm:$0xff]  ;;  %v10622_v33 = vld [vmem:[#allocation2 + $0x128] sm:$0xff]  ;;  %v10657_v55 = vor.u32 %v566_v48, %v565_v47  ;;  %v10663_v58 = vor.u32 %v578_v52, %v577_v51  ;;  %v623_v16 = vshrl.u32 %v10598_v27, 16  ;;  %v614_v24 = vshll.u32 %v10596_v26, 16 }
  0x30   : > { %v10629_v36 = vld [vmem:[#allocation2 + $0x140] sm:$0xff]  ;;  %v10634_v39 = vld [vmem:[#allocation2 + $0x158] sm:$0xff]  ;;  %v10686_v11 = vor.u32 %v590_v1, %v589_v0  ;;  %v10692_v14 = vor.u32 %v602_v7, %v601_v5  ;;  %v613_v23 = vrot.slane %v611_v12, 7  ;;  %v626_v40 = vshll.u32 %v10598_v27, 16 }
  0x31   : > { %v10647_v49 = vld [vmem:[#allocation2 + $0x170] sm:$0xff]  ;;  %v569_v3 = vsel %vm13358_vm2, %v561_v57, %v10657_v55  ;;  %v581_v8 = vsel %vm13358_vm2, %v573_v60, %v10663_v58  ;;  %v625_v37 = vrot.slane %v623_v16, 7  ;;  %v619_v44 = vshrl.u32 %v525_v20, 16  ;;  %v529_v57 = vld [vmem:[#allocation2 + $0xc0] sm:$0x80] }
  0x32   : > { %v593_v25 = vsel %vm13358_vm2, %v585_v13, %v10686_v11  ;;  %v605_v42 = vsel %vm13358_vm2, %v597_v18, %v10692_v14  ;;  %v10710_v45 = vor.u32 %v614_v24, %v613_v23  ;;  %v635_v46 = vshrl.u32 %v10604_v28, 16  ;;  %v531_v23 = vld [vmem:[#allocation2 + $0xd8] sm:$0x80] }
  0x33   : > { %9195 = vmatmul.mubr.msk.bf16.gmra.mrb[4].mxu0 %vm280_vm1, %v10581_v21  ;;  %v609_v47 = vrot.slane %v607_v35, 7  ;;  %v10716_v50 = vor.u32 %v626_v40, %v625_v37  ;;  %v647_v51 = vshrl.u32 %v10606_v29, 16  ;;  %v638_v61 = vshll.u32 %v10604_v28, 16 }
  0x34   : > { %9198 = vmatprep.mubr.msk.bf16.mxu0 %vm280_vm1, %v10583_v22  ;;  %v637_v60 = vrot.slane %v635_v46, 7  ;;  %v643_v5 = vshrl.u32 %v529_v57, 16  ;;  %v13338_v9 = vshrl.u32 %v10612_v30, 16  ;;  %v13336_v19 = vshrl.u32 %v10614_v31, 16 }
  0x35   : > { %v617_v62 = vsel %vm13358_vm2, %v609_v47, %v10710_v45  ;;  %v649_v0 = vrot.slane %v647_v51, 7  ;;  %v13344_v37 = vshll.u32 %v10612_v30, 16 }
  0x36   : > { %v645_v20 = vrot.slane %v643_v5, 7  ;;  %v661_v35 = vrot.slane %v13338_v9, 7  ;;  %v673_v47 = vrot.slane %v13336_v19, 7  ;;  %v541_v19 = vld [vmem:[#allocation2 + $0x150] sm:$0x80] }
  0x3b   : > { %9199 = vmatmul.mubr.msk.bf16.gmra.mrb[8].mxu0 %vm280_vm1, %v10596_v26 }
  0x3c   : > { %9202 = vmatprep.mubr.msk.bf16.mxu0 %vm280_vm1, %v10598_v27 }
  0x43   : > { %9203 = vmatmul.mubr.msk.bf16.gmra.mrb[12].mxu0 %vm280_vm1, %v10604_v28 }
  0x44   : > { %9206 = vmatprep.mubr.msk.bf16.mxu0 %vm280_vm1, %v10606_v29 }
  0x4b   : > { %9207 = vmatmul.mubr.msk.bf16.gmra.mrb[16].mxu0 %vm280_vm1, %v10612_v30 }
  0x4c   : > { %9210 = vmatprep.mubr.msk.bf16.mxu0 %vm280_vm1, %v10614_v31 }
  0x53   : > { %9211 = vmatmul.mubr.msk.bf16.gmra.mrb[20].mxu0 %vm280_vm1, %v10620_v32 }
  0x54   : > { %9214 = vmatprep.mubr.msk.bf16.mxu0 %vm280_vm1, %v10622_v33 }
  0x5b   : > { %9215 = vmatmul.mubr.msk.bf16.gmra.mrb[24].mxu0 %vm280_vm1, %v10629_v36 }
  0x5c   : > { %9218 = vmatprep.mubr.msk.bf16.mxu0 %vm280_vm1, %v10634_v39 }
  0x63   : > { %9219 = vmatmul.mubr.msk.bf16.gmra.mrb[28].mxu0 %vm280_vm1, %v10647_v49 }
  0x64   : > { %9224 = vmatprep.mubr.msk.bf16.mxu0 %vm280_vm1, %v557_v53  ;;  %v621_v53 = vrot.slane %v619_v44, 7  ;;  %v655_v44 = vshrl.u32 %v531_v23, 16 }
  0x66   : > { %v629_v4 = vsel %vm13358_vm2, %v621_v53, %v10716_v50  ;;  %v13341_v53 = vshll.u32 %v10614_v31, 16 }
  0x6b   : > { %9225 = vmatmul.mubr.msk.bf16.vlgmr.msra.gmra.mrb[0].mxu0 %vm280_vm1, %v569_v3  ;;  %v650_v3 = vshll.u32 %v10606_v29, 16 }
  0x6c   : > { %9257 = vmatpush3.bf16.msra.mxu0 %v1426_v63  ;;  %9228 = vmatprep.mubr.msk.bf16.mxu0 %vm280_vm1, %v581_v8  ;;  %v631_v63 = vshrl.u32 %v527_v54, 16  ;;  %v10732_v8 = vor.u32 %v638_v61, %v637_v60  ;;  %v10754_v60 = vor.u32 %v13344_v37, %v661_v35 }
  0x6d   : > { %10315 = vmatprep.subr.msk.bf16.mxu0 %vm773_vm0, %v10681_v10  ;;  %v10738_v18 = vor.u32 %v650_v3, %v649_v0  ;;  %v10760_v0 = vor.u32 %v13341_v53, %v673_v47  ;;  %v13339_v47 = vshll.u32 %v10622_v33, 16  ;;  %v13345_v53 = vshrl.u32 %v10647_v49, 16 }
  0x6e   : > { %v633_v13 = vrot.slane %v631_v63, 7  ;;  %v657_v63 = vrot.slane %v655_v44, 7 }
  0x6f   : > { %v653_v54 = vsel %vm13358_vm2, %v645_v20, %v10738_v18  ;;  %v537_v20 = vld [vmem:[#allocation2 + $0x120] sm:$0x80] }
  0x70   : > { %v665_v35 = vsel %vm13358_vm2, %v657_v63, %v10754_v60 }
  0x73   : > { %9229 = vmatmul.mubr.msk.bf16.gmra.mrb[4].mxu0 %vm280_vm1, %v593_v25  ;;  %v533_v25 = vld [vmem:[#allocation2 + $0xf0] sm:$0x80] }
  0x74   : > { %9232 = vmatprep.mubr.msk.bf16.mxu0 %vm280_vm1, %v605_v42  ;;  %v641_v42 = vsel %vm13358_vm2, %v633_v13, %v10732_v8  ;;  %v667_v57 = vshrl.u32 %v533_v25, 16  ;;  %v535_v13 = vld [vmem:[#allocation2 + $0x108] sm:$0x80]  ;;  %v13337_v25 = vshll.u32 %v10620_v32, 16 }
  0x76   : > { %v669_v5 = vrot.slane %v667_v57, 7  ;;  %v691_v57 = vshrl.u32 %v537_v20, 16  ;;  %v539_v20 = vld [vmem:[#allocation2 + $0x138] sm:$0x80] }
  0x77   : > { %v703_v9 = vshrl.u32 %v539_v20, 16 }
  0x7b   : > { %9233 = vmatmul.mubr.msk.bf16.gmra.mrb[8].mxu0 %vm280_vm1, %v617_v62  ;;  %v13334_v62 = vshrl.u32 %v10620_v32, 16 }
  0x7c   : > { %9236 = vmatprep.mubr.msk.bf16.mxu0 %vm280_vm1, %v629_v4  ;;  %v13335_v4 = vshrl.u32 %v10622_v33, 16 }
  0x7d   : > { %v685_v23 = vrot.slane %v13334_v62, 7  ;;  %v13340_v62 = vshrl.u32 %v10629_v36, 16 }
  0x7e   : > { %v697_v44 = vrot.slane %v13335_v4, 7  ;;  %v13342_v4 = vshrl.u32 %v10634_v39, 16 }
  0x7f   : > { %v10776_v2 = vor.u32 %v13337_v25, %v685_v23  ;;  %v13343_v23 = vshll.u32 %v10629_v36, 16 }
  0x83   : > { %9237 = vmatmul.mubr.msk.bf16.gmra.mrb[12].mxu0 %vm280_vm1, %v641_v42  ;;  %v679_v42 = vshrl.u32 %v535_v13, 16  ;;  %v10782_v13 = vor.u32 %v13339_v47, %v697_v44  ;;  %v722_v44 = vshll.u32 %v10634_v39, 16  ;;  %v10350_v47 = vld [vmem:[%s10536_s11 + $0x78] sm:$0xff]  }
  0x84   : > { %9240 = vmatprep.mubr.msk.bf16.mxu0 %vm280_vm1, %v653_v54  ;;  %v677_v54 = vsel %vm13358_vm2, %v669_v5, %v10760_v0  ;;  %v693_v5 = vrot.slane %v691_v57, 7  ;;  %v715_v57 = vshrl.u32 %v541_v19, 16  ;;  %512 = vst.msk [vmem:[#allocation2 + $0x188] sm:$0xff] %vm280_vm1, %v10350_v47  ;;  %v543_v19 = vld [vmem:[#allocation2 + $0x168] sm:$0x80]  ;;  %v1188_v47 = vrot.slane %v554_v38, 1 }
  0x85   : > { %v681_v63 = vrot.slane %v679_v42, 7  ;;  %v721_v42 = vrot.slane %v13342_v4, 7  ;;  %v1151_v4 = vld [vmem:[#allocation2 + $0x10] sm:$0x1]  ;;  %v727_v37 = vshrl.u32 %v543_v19, 16 }
  0x87   : > { %v689_v25 = vsel %vm13358_vm2, %v681_v63, %v10776_v2  ;;  %v705_v63 = vrot.slane %v703_v9, 7  ;;  %v10806_v20 = vor.u32 %v722_v44, %v721_v42  ;;  %v1191_v42 = vshll.u32 %v1151_v4, 16 }
  0x88   : > { %v1200_v4 = vrot.slane %v566_v48, 1  ;;  %v1157_v48 = vld [vmem:[#allocation2 + $0x58] sm:$0x1] }
  0x89   : > { %v1193_v19 = vrot.slane %v1191_v42, 1 }
  0x8a   : > { %v1201_v6 = vor.u32 %v1200_v4, %v563_v41  ;;  %v1236_v41 = vrot.slane %v602_v7, 1  ;;  %v1161_v7 = vld [vmem:[#allocation2 + $0x88] sm:$0x1] }
  0x8b   : > { %9241 = vmatmul.mubr.msk.bf16.gmra.mrb[16].mxu0 %vm280_vm1, %v665_v35  ;;  %v709_v35 = vrot.slane %v13340_v62, 7 }
  0x8c   : > { %9244 = vmatprep.mubr.msk.bf16.mxu0 %vm280_vm1, %v677_v54  ;;  %v701_v54 = vsel %vm13358_vm2, %v693_v5, %v10782_v13  ;;  %v717_v5 = vrot.slane %v715_v57, 7  ;;  %v729_v57 = vrot.slane %v727_v37, 7  ;;  %v1237_v4 = vor.u32 %v1236_v41, %v599_v59 }
  0x8d   : > { %v10799_v62 = vor.u32 %v13343_v23, %v709_v35  ;;  %v734_v35 = vshll.u32 %v10647_v49, 16 }
  0x8e   : > { %v725_v9 = vsel %vm13358_vm2, %v717_v5, %v10806_v20  ;;  %v1155_v5 = vld [vmem:[#allocation2 + $0x40] sm:$0x1] }
  0x8f   : > { %v713_v23 = vsel %vm13358_vm2, %v705_v63, %v10799_v62  ;;  %v1189_v63 = vor.u32 %v1188_v47, %v551_v34  ;;  %v1215_v37 = vshll.u32 %v1155_v5, 16 }
  0x91   : > { %v1217_v42 = vrot.slane %v1215_v37, 1  ;;  %v1248_v37 = vrot.slane %v614_v24, 1  ;;  %v1165_v24 = vld [vmem:[#allocation2 + $0xb8] sm:$0x1] }
  0x93   : > { %9245 = vmatmul.mubr.msk.bf16.gmra.mrb[20].mxu0 %vm280_vm1, %v689_v25  ;;  %v733_v25 = vrot.slane %v13345_v53, 7  ;;  %v1153_v53 = vld [vmem:[#allocation2 + $0x28] sm:$0x1]  ;;  %v1249_v59 = vor.u32 %v1248_v37, %v611_v12 }
  0x94   : > { %9248 = vmatprep.mubr.msk.bf16.mxu0 %vm280_vm1, %v701_v54 }
  0x95   : > { %v10820_v54 = vor.u32 %v734_v35, %v733_v25  ;;  %v1194_v25 = vsel %vm13357_vm3, %v1189_v63, %v1193_v19  ;;  %v1227_v63 = vshll.u32 %v1157_v48, 16  ;;  %v1896_v19 = vsel %vm773_vm0, %v10681_v10, 0 }
  0x97   : > { %v737_v38 = vsel %vm13358_vm2, %v729_v57, %v10820_v54  ;;  %v1229_v10 = vrot.slane %v1227_v63, 1  ;;  %v1275_v63 = vshll.u32 %v1165_v24, 16  ;;  %v13394_v24 = vshll.u32 %v10620_v32, 16 }
  0x9b   : > { %9249 = vmatmul.mubr.msk.bf16.gmra.mrb[24].mxu0 %vm280_vm1, %v713_v23  ;;  %v1203_v23 = vshll.u32 %v1153_v53, 16  ;;  %v1159_v53 = vld [vmem:[#allocation2 + $0x70] sm:$0x1] }
  0x9c   : > { %9252 = vmatprep.mubr.msk.bf16.mxu0 %vm280_vm1, %v725_v9  ;;  %v1212_v9 = vrot.slane %v578_v52, 1  ;;  %v1224_v52 = vrot.slane %v590_v1, 1 }
  0x9d   : > { %v1205_v34 = vrot.slane %v1203_v23, 1 }
  0x9e   : > { %v1213_v47 = vor.u32 %v1212_v9, %v575_v43  ;;  %v10849_v43 = vld [vmem:[%s13325_s1 + $0x8] sm:$0x3]  ;;  %v1225_v1 = vor.u32 %v1224_v52, %v587_v56  ;;  %v1260_v56 = vrot.slane %v626_v40, 1  ;;  %v1272_v40 = vrot.slane %v638_v61, 1 }
  0x9f   : > { %v1206_v57 = vsel %vm13357_vm3, %v1201_v6, %v1205_v34  ;;  %v1251_v6 = vshll.u32 %v1161_v7, 16  ;;  %v1169_v61 = vld [vmem:[#allocation2 + $0xe8] sm:$0x1] }
  0xa0   : > { %v1218_v5 = vsel %vm13357_vm3, %v1213_v47, %v1217_v42  ;;  %v1230_v9 = vsel %vm13357_vm3, %v1225_v1, %v1229_v10  ;;  %v1261_v48 = vor.u32 %v1260_v56, %v623_v16  ;;  %v1273_v12 = vor.u32 %v1272_v40, %v635_v46  ;;  %v1171_v10 = vld [vmem:[#allocation2 + $0x100] sm:$0x1] }
  0xa1   : > { %v1253_v42 = vrot.slane %v1251_v6, 1  ;;  %v1277_v16 = vrot.slane %v1275_v63, 1  ;;  %v1299_v7 = vshll.u32 %v1169_v61, 16  ;;  %v1311_v6 = vshll.u32 %v1171_v10, 16  ;;  %v1177_v10 = vld [vmem:[#allocation2 + $0x148] sm:$0x1] }
  0xa2   : > { %v13392_v46 = vshrl.u32 %v10612_v30, 16  ;;  %v13393_v56 = vshrl.u32 %v10614_v31, 16  ;;  %v13395_v63 = vshll.u32 %v10622_v33, 16 }
  0xa3   : > { %9253 = vmatmul.mubr.msk.bf16.gmra.mrb[28].mxu0 %vm280_vm1, %v737_v38  ;;  %v1239_v38 = vshll.u32 %v1159_v53, 16  ;;  %v1254_v52 = vsel %vm13357_vm3, %v1249_v59, %v1253_v42  ;;  %v1313_v59 = vrot.slane %v1311_v6, 1  ;;  %v1173_v42 = vld [vmem:[#allocation2 + $0x118] sm:$0x1] }
  0xa4   : > { %9258 = vmatprep.mubr.msk.bf16.mxu0 %vm280_vm1, %v1194_v25  ;;  %v1163_v25 = vld [vmem:[#allocation2 + $0xa0] sm:$0x1] }
  0xa5   : > { %v1241_v23 = vrot.slane %v1239_v38, 1  ;;  %v1263_v47 = vshll.u32 %v1163_v25, 16 }
  0xa7   : > { %v1242_v34 = vsel %vm13357_vm3, %v1237_v4, %v1241_v23  ;;  %v1265_v53 = vrot.slane %v1263_v47, 1  ;;  %v1278_v4 = vsel %vm13357_vm3, %v1273_v12, %v1277_v16  ;;  %v13390_v23 = vshll.u32 %v10612_v30, 16 }
  0xab   : > { %9259 = vmatmul.mubr.msk.bf16.vlgmr.msra.gmra.mrb[0].mxu0 %vm280_vm1, %v1206_v57  ;;  %v1167_v57 = vld [vmem:[#allocation2 + $0xd0] sm:$0x1] }
  0xac   : > { %9291 = vmatpush3.bf16.msra.mxu0 %v1896_v19  ;;  %9262 = vmatprep.mubr.msk.bf16.mxu0 %vm280_vm1, %v1218_v5  ;;  %v1266_v19 = vsel %vm13357_vm3, %v1261_v48, %v1265_v53  ;;  %v1284_v5 = vrot.slane %v650_v3, 1  ;;  %v1287_v41 = vshll.u32 %v1167_v57, 16  ;;  %v1296_v3 = vrot.slane %v13390_v23, 1  ;;  %v1175_v48 = vld [vmem:[#allocation2 + $0x130] sm:$0x1] }
  0xad   : > { %10316 = vmatprep.subr.msk.bf16.mxu0 %vm773_vm0, %v10849_v43  ;;  %v1320_v57 = vrot.slane %v13394_v24, 1 }
  0xae   : > { %v1285_v38 = vor.u32 %v1284_v5, %v647_v51  ;;  %v1289_v1 = vrot.slane %v1287_v41, 1  ;;  %v1297_v51 = vor.u32 %v1296_v3, %v13392_v46  ;;  %v1335_v5 = vshll.u32 %v1175_v48, 16  ;;  %v1621_v48 = vld [vmem:[#allocation2 + $0x18] sm:$0x80] }
  0xaf   : > { %v13396_v41 = vshrl.u32 %v10620_v32, 16  ;;  %v13398_v3 = vshll.u32 %v10629_v36, 16  ;;  %v13399_v46 = vshrl.u32 %v10629_v36, 16 }
  0xb0   : > { %v1290_v25 = vsel %vm13357_vm3, %v1285_v38, %v1289_v1  ;;  %v13397_v38 = vshrl.u32 %v10622_v33, 16  ;;  %v1337_v61 = vrot.slane %v1335_v5, 1 }
  0xb1   : > { %v1321_v12 = vor.u32 %v1320_v57, %v13396_v41  ;;  %v1623_v41 = vld [vmem:[#allocation2 + $0x30] sm:$0x80] }
  0xb3   : > { %9263 = vmatmul.mubr.msk.bf16.gmra.mrb[4].mxu0 %vm280_vm1, %v1230_v9  ;;  %v13391_v9 = vshll.u32 %v10614_v31, 16 }
  0xb4   : > { %9266 = vmatprep.mubr.msk.bf16.mxu0 %vm280_vm1, %v1242_v34  ;;  %v1301_v34 = vrot.slane %v1299_v7, 1  ;;  %v1344_v7 = vrot.slane %v13398_v3, 1 }
  0xb5   : > { %v1308_v37 = vrot.slane %v13391_v9, 1 }
  0xb6   : > { %v1302_v53 = vsel %vm13357_vm3, %v1297_v51, %v1301_v34  ;;  %v1345_v51 = vor.u32 %v1344_v7, %v13399_v46  ;;  %v1631_v46 = vld [vmem:[#allocation2 + $0x90] sm:$0x80] }
  0xb7   : > { %v1309_v47 = vor.u32 %v1308_v37, %v13393_v56  ;;  %v1356_v37 = vrot.slane %v722_v44, 1  ;;  %v13400_v56 = vshrl.u32 %v10634_v39, 16  ;;  %v1368_v44 = vrot.slane %v734_v35, 1 }
  0xb9   : > { %v1314_v40 = vsel %vm13357_vm3, %v1309_v47, %v1313_v59  ;;  %v1357_v47 = vor.u32 %v1356_v37, %v13400_v56  ;;  %v10941_v37 = vld [vmem:[%s13325_s1 + $0xa] sm:$0x3] }
  0xbb   : > { %9267 = vmatmul.mubr.msk.bf16.gmra.mrb[8].mxu0 %vm280_vm1, %v1254_v52  ;;  %v1323_v52 = vshll.u32 %v1173_v42, 16  ;;  %v1181_v42 = vld [vmem:[#allocation2 + $0x178] sm:$0x1] }
  0xbc   : > { %9270 = vmatprep.mubr.msk.bf16.mxu0 %vm280_vm1, %v1266_v19  ;;  %v1332_v19 = vrot.slane %v13395_v63, 1  ;;  %v1371_v24 = vshll.u32 %v1181_v42, 16  ;;  %v1635_v42 = vld [vmem:[#allocation2 + $0xc0] sm:$0x80] }
  0xbd   : > { %v1325_v16 = vrot.slane %v1323_v52, 1  ;;  %v1654_v52 = vshrl.u32 %v1621_v48, 16  ;;  %v1637_v48 = vld [vmem:[#allocation2 + $0xd8] sm:$0x80] }
  0xbe   : > { %v1333_v1 = vor.u32 %v1332_v19, %v13397_v38  ;;  %v1373_v19 = vrot.slane %v1371_v24, 1  ;;  %v1666_v38 = vshrl.u32 %v1623_v41, 16  ;;  %v1750_v24 = vshrl.u32 %v1637_v48, 16 }
  0xbf   : > { %v1326_v23 = vsel %vm13357_vm3, %v1321_v12, %v1325_v16  ;;  %v1656_v5 = vrot.slane %v1654_v52, 7  ;;  %v1625_v12 = vld [vmem:[#allocation2 + $0x48] sm:$0x80]  ;;  %v1639_v52 = vld [vmem:[#allocation2 + $0xf0] sm:$0x80] }
  0xc0   : > { %v1338_v9 = vsel %vm13357_vm3, %v1333_v1, %v1337_v61  ;;  %v1678_v1 = vshrl.u32 %v1625_v12, 16  ;;  %v1668_v61 = vrot.slane %v1666_v38, 7  ;;  %v1643_v12 = vld [vmem:[#allocation2 + $0x120] sm:$0x80] }
  0xc1   : > { %v1664_v35 = vsel %vm13358_vm2, %v1656_v5, %v10657_v55 }
  0xc2   : > { %v1676_v3 = vsel %vm13358_vm2, %v1668_v61, %v10663_v58 }
  0xc3   : > { %9271 = vmatmul.mubr.msk.bf16.gmra.mrb[12].mxu0 %vm280_vm1, %v1278_v4  ;;  %v1179_v4 = vld [vmem:[#allocation2 + $0x160] sm:$0x1] }
  0xc4   : > { %9274 = vmatprep.mubr.msk.bf16.mxu0 %vm280_vm1, %v1290_v25  ;;  %v1347_v25 = vshll.u32 %v1177_v10, 16  ;;  %v1359_v6 = vshll.u32 %v1179_v4, 16  ;;  %v1680_v10 = vrot.slane %v1678_v1, 7  ;;  %v1627_v4 = vld [vmem:[#allocation2 + $0x60] sm:$0x80] }
  0xc5   : > { %v1690_v7 = vshrl.u32 %v1627_v4, 16  ;;  %v1649_v4 = vld [vmem:[#allocation2 + $0x168] sm:$0x80] }
  0xc6   : > { %v1349_v34 = vrot.slane %v1347_v25, 1  ;;  %v1361_v59 = vrot.slane %v1359_v6, 1  ;;  %v2126_v25 = vsel %vm773_vm0, %v10849_v43, 0  ;;  %v1633_v43 = vld [vmem:[#allocation2 + $0xa8] sm:$0x80] }
  0xc7   : > { %v1692_v6 = vrot.slane %v1690_v7, 7  ;;  %v1726_v56 = vshrl.u32 %v1633_v43, 16  ;;  %v1822_v7 = vshrl.u32 %v1649_v4, 16 }
  0xc8   : > { %v1362_v57 = vsel %vm13357_vm3, %v1357_v47, %v1361_v59 }
  0xc9   : > { %v1728_v59 = vrot.slane %v1726_v56, 7 }
  0xcb   : > { %9275 = vmatmul.mubr.msk.bf16.gmra.mrb[16].mxu0 %vm280_vm1, %v1302_v53  ;;  %v1350_v53 = vsel %vm13357_vm3, %v1345_v51, %v1349_v34  ;;  %v1714_v51 = vshrl.u32 %v1631_v46, 16 }
  0xcc   : > { %9278 = vmatprep.mubr.msk.bf16.mxu0 %vm280_vm1, %v1314_v40  ;;  %v13401_v40 = vshrl.u32 %v10647_v49, 16 }
  0xcd   : > { %v1716_v47 = vrot.slane %v1714_v51, 7 }
  0xce   : > { %v1369_v63 = vor.u32 %v1368_v44, %v13401_v40  ;;  %v1738_v44 = vshrl.u32 %v1635_v42, 16  ;;  %v1641_v40 = vld [vmem:[#allocation2 + $0x108] sm:$0x80] }
  0xcf   : > { %v1774_v5 = vshrl.u32 %v1641_v40, 16  ;;  %v2328_v40 = vld [vmem:[#allocation2 + $0x70] sm:$0x1] }
  0xd0   : > { %v1374_v16 = vsel %vm13357_vm3, %v1369_v63, %v1373_v19  ;;  %v1762_v19 = vshrl.u32 %v1639_v52, 16 }
  0xd1   : > { %v1776_v41 = vrot.slane %v1774_v5, 7 }
  0xd3   : > { %9279 = vmatmul.mubr.msk.bf16.gmra.mrb[20].mxu0 %vm280_vm1, %v1326_v23  ;;  %v1629_v23 = vld [vmem:[#allocation2 + $0x78] sm:$0x80] }
  0xd4   : > { %9282 = vmatprep.mubr.msk.bf16.mxu0 %vm280_vm1, %v1338_v9  ;;  %v1688_v9 = vsel %vm13358_vm2, %v1680_v10, %v10686_v11  ;;  %v1702_v55 = vshrl.u32 %v1629_v23, 16  ;;  %v1700_v11 = vsel %vm13358_vm2, %v1692_v6, %v10692_v14  ;;  %v1736_v14 = vsel %vm13358_vm2, %v1728_v59, %v10732_v8  ;;  %v1647_v10 = vld [vmem:[#allocation2 + $0x150] sm:$0x80]  ;;  %v1651_v6 = vld [vmem:[#allocation2 + $0x180] sm:$0x80] }
  0xd5   : > { %v1764_v8 = vrot.slane %v1762_v19, 7  ;;  %v2330_v19 = vld [vmem:[#allocation2 + $0x88] sm:$0x1] }
  0xd6   : > { %v1704_v58 = vrot.slane %v1702_v55, 7  ;;  %v1824_v55 = vrot.slane %v1822_v7, 7  ;;  %v2332_v7 = vld [vmem:[#allocation2 + $0xa0] sm:$0x1] }
  0xd7   : > { %v1772_v38 = vsel %vm13358_vm2, %v1764_v8, %v10760_v0 }
  0xd8   : > { %v1712_v34 = vsel %vm13358_vm2, %v1704_v58, %v10710_v45  ;;  %v1740_v45 = vrot.slane %v1738_v44, 7  ;;  %v1832_v43 = vsel %vm13358_vm2, %v1824_v55, %v10820_v54  ;;  %v2596_v54 = vsel %vm773_vm0, %v10941_v37, 0  ;;  %v11047_v44 = vld [vmem:[#allocation2 + $0x80] sm:$0xff]  ;;  %v2334_v55 = vld [vmem:[#allocation2 + $0xb8] sm:$0x1] }
  0xda   : > { %v1748_v63 = vsel %vm13358_vm2, %v1740_v45, %v10738_v18  ;;  %v1784_v18 = vsel %vm13358_vm2, %v1776_v41, %v10776_v2 }
  0xdb   : > { %9283 = vmatmul.mubr.msk.bf16.gmra.mrb[24].mxu0 %vm280_vm1, %v1350_v53  ;;  %v1724_v53 = vsel %vm13358_vm2, %v1716_v47, %v10716_v50 }
  0xdc   : > { %9286 = vmatprep.mubr.msk.bf16.mxu0 %vm280_vm1, %v1362_v57  ;;  %v1752_v57 = vrot.slane %v1750_v24, 7 }
  0xde   : > { %v1760_v50 = vsel %vm13358_vm2, %v1752_v57, %v10754_v60 }
  0xe3   : > { %9287 = vmatmul.mubr.msk.bf16.gmra.mrb[28].mxu0 %vm280_vm1, %v1374_v16  ;;  %v1645_v16 = vld [vmem:[#allocation2 + $0x138] sm:$0x80] }
  0xe4   : > { %9292 = vmatprep.mubr.msk.bf16.mxu0 %vm280_vm1, %v1664_v35  ;;  %v1786_v35 = vshrl.u32 %v1643_v12, 16  ;;  %v1798_v1 = vshrl.u32 %v1645_v16, 16  ;;  %v2397_v12 = vshll.u32 %v2328_v40, 16  ;;  %v11132_v40 = vld [vmem:[#allocation2 + $0xf8] sm:$0xff] }
  0xe6   : > { %v1788_v60 = vrot.slane %v1786_v35, 7  ;;  %v1800_v61 = vrot.slane %v1798_v1, 7  ;;  %v11073_v1 = vld [vmem:[#allocation2 + $0x98] sm:$0xff]  ;;  %v2399_v4 = vrot.slane %v2397_v12, 1 }
  0xe8   : > { %v1796_v23 = vsel %vm13358_vm2, %v1788_v60, %v10782_v13  ;;  %v1808_v0 = vsel %vm13358_vm2, %v1800_v61, %v10799_v62  ;;  %v1834_v13 = vshrl.u32 %v1651_v6, 16  ;;  %v11075_v60 = vld [vmem:[#allocation2 + $0xb0] sm:$0xff]  ;;  %v11080_v61 = vld [vmem:[%s13325_s1 + $0xe] sm:$0x3] }
  0xeb   : > { %9293 = vmatmul.mubr.msk.bf16.vlgmr.msra.gmra.mrb[0].mxu0 %vm280_vm1, %v1676_v3  ;;  %v1810_v3 = vshrl.u32 %v1647_v10, 16 }
  0xec   : > { %9325 = vmatpush3.bf16.msra.mxu0 %v2126_v25  ;;  %9296 = vmatprep.mubr.msk.bf16.mxu0 %vm280_vm1, %v1688_v9  ;;  %v10975_v25 = vld [vmem:[#allocation2 + $0x188] sm:$0xff] }
  0xed   : > { %10317 = vmatprep.subr.msk.bf16.mxu0 %vm773_vm0, %v10941_v37  ;;  %v1812_v2 = vrot.slane %v1810_v3, 7  ;;  %v1838_v9 = vshrl.u32 %v10975_v25, 16  ;;  %v1841_v62 = vshll.u32 %v10975_v25, 16  ;;  %v2326_v37 = vld [vmem:[#allocation2 + $0x58] sm:$0x1] }
  0xef   : > { %v1820_v58 = vsel %vm13358_vm2, %v1812_v2, %v10806_v20  ;;  %v1840_v46 = vrot.slane %v1838_v9, 7  ;;  %v2428_v2 = vshll.u32 %v11075_v60, 16 }
  0xf1   : > { %v10991_v51 = vor.u32 %v1841_v62, %v1840_v46  ;;  %v2421_v46 = vshll.u32 %v2332_v7, 16  ;;  %v2462_v7 = vshrl.u32 %v11132_v40, 16 }
  0xf3   : > { %9297 = vmatmul.mubr.msk.bf16.gmra.mrb[4].mxu0 %vm280_vm1, %v1700_v11  ;;  %v1836_v11 = vrot.slane %v1834_v13, 7 }
  0xf4   : > { %9300 = vmatprep.mubr.msk.bf16.mxu0 %vm280_vm1, %v1712_v34  ;;  %v8658_v34 = vld [vmem:[%s13325_s1 + $0xc] sm:$0x3] }
  0xf5   : > { %v1844_v20 = vsel %vm13358_vm2, %v1836_v11, %v10991_v51  ;;  %v3067_v5 = vsel %vm773_vm0, %v8658_v34, 0  ;;  %v2426_v11 = vshrl.u32 %v11075_v60, 16 }
  0xfb   : > { %9301 = vmatmul.mubr.msk.bf16.gmra.mrb[8].mxu0 %vm280_vm1, %v1724_v53  ;;  %v11045_v53 = vld [vmem:[#allocation2 + $0x68] sm:$0xff] }
  0xfc   : > { %9304 = vmatprep.mubr.msk.bf16.mxu0 %vm280_vm1, %v1736_v14  ;;  %v2392_v45 = vshll.u32 %v11045_v53, 16  ;;  %v2390_v8 = vshrl.u32 %v11045_v53, 16 }
  0xfe   : > { %v2394_v41 = vrot.slane %v2392_v45, 1 }
 0x100   : > { %v11086_v10 = vor.u32 %v2394_v41, %v2390_v8  ;;  %v13353_v41 = vshll.u32 %v11132_v40, 16 }
 0x102   : > { %v2400_v6 = vsel %vm13357_vm3, %v11086_v10, %v2399_v4  ;;  %v2342_v4 = vld [vmem:[#allocation2 + $0x118] sm:$0x1] }
 0x103   : > { %9305 = vmatmul.mubr.msk.bf16.gmra.mrb[12].mxu0 %vm280_vm1, %v1748_v63  ;;  %v2404_v63 = vshll.u32 %v11047_v44, 16 }
 0x104   : > { %9308 = vmatprep.mubr.msk.bf16.mxu0 %vm280_vm1, %v1760_v50 }
 0x105   : > { %v2406_v35 = vrot.slane %v2404_v63, 1 }
 0x10b   : > { %9309 = vmatmul.mubr.msk.bf16.gmra.mrb[16].mxu0 %vm280_vm1, %v1772_v38  ;;  %v2402_v38 = vshrl.u32 %v11047_v44, 16 }
 0x10c   : > { %9312 = vmatprep.mubr.msk.bf16.mxu0 %vm280_vm1, %v1784_v18  ;;  %v2409_v18 = vshll.u32 %v2330_v19, 16  ;;  %v11134_v19 = vld [vmem:[#allocation2 + $0x110] sm:$0xff] }
 0x10d   : > { %v11091_v3 = vor.u32 %v2406_v35, %v2402_v38  ;;  %v2340_v35 = vld [vmem:[#allocation2 + $0x100] sm:$0x1] }
 0x113   : > { %9313 = vmatmul.mubr.msk.bf16.gmra.mrb[20].mxu0 %vm280_vm1, %v1796_v23  ;;  %v2416_v23 = vshll.u32 %v11073_v1, 16 }
 0x114   : > { %9316 = vmatprep.mubr.msk.bf16.mxu0 %vm280_vm1, %v1808_v0  ;;  %v2411_v0 = vrot.slane %v2409_v18, 1  ;;  %v13348_v18 = vshll.u32 %v11134_v19, 16 }
 0x115   : > { %v2418_v13 = vrot.slane %v2416_v23, 1 }
 0x11b   : > { %9317 = vmatmul.mubr.msk.bf16.gmra.mrb[24].mxu0 %vm280_vm1, %v1820_v58  ;;  %v2414_v58 = vshrl.u32 %v11073_v1, 16 }
 0x11c   : > { %9320 = vmatprep.mubr.msk.bf16.mxu0 %vm280_vm1, %v1832_v43  ;;  %v2412_v43 = vsel %vm13357_vm3, %v11091_v3, %v2411_v0 }
 0x123   : > { %9321 = vmatmul.mubr.msk.bf16.gmra.mrb[28].mxu0 %vm280_vm1, %v1844_v20  ;;  %v2430_v20 = vrot.slane %v2428_v2, 1 }
 0x124   : > { %9326 = vmatprep.mubr.msk.bf16.mxu0 %vm280_vm1, %v10562_v15  ;;  %v2321_v15 = vld [vmem:[#allocation2 + $0x20] sm:$0xff] }
 0x12b   : > { %9327 = vmatmul.mubr.msk.bf16.vlgmr.msra.gmra.mrb[0].mxu0 %vm280_vm1, %v10568_v17  ;;  %v2356_v17 = vshll.u32 %v2321_v15, 16 }
 0x12c   : > { %9359 = vmatpush3.bf16.msra.mxu0 %v2596_v54  ;;  %9330 = vmatprep.mubr.msk.bf16.mxu0 %vm280_vm1, %v10581_v21  ;;  %v2322_v21 = vld [vmem:[#allocation2 + $0x28] sm:$0x1]  ;;  %v2433_v54 = vshll.u32 %v2334_v55, 16  ;;  %v2466_v55 = vrot.slane %v13353_v41, 1  ;;  %v2792_v41 = vld [vmem:[#allocation2 + $0x30] sm:$0x80] }
 0x12d   : > { %10318 = vmatprep.subr.msk.bf16.mxu0 %vm773_vm0, %v8658_v34  ;;  %v11106_v34 = vld [vmem:[#allocation2 + $0xc8] sm:$0xff] }
 0x133   : > { %9331 = vmatmul.mubr.msk.bf16.gmra.mrb[4].mxu0 %vm280_vm1, %v10583_v22  ;;  %v11028_v22 = vld [vmem:[#allocation2 + $0x38] sm:$0xff] }
 0x134   : > { %9334 = vmatprep.mubr.msk.bf16.mxu0 %vm280_vm1, %v10596_v26  ;;  %v2354_v26 = vshrl.u32 %v2321_v15, 16  ;;  %v2366_v56 = vshrl.u32 %v11028_v22, 16  ;;  %v11108_v15 = vld [vmem:[#allocation2 + $0xe0] sm:$0xff] }
 0x13b   : > { %9335 = vmatmul.mubr.msk.bf16.gmra.mrb[8].mxu0 %vm280_vm1, %v10598_v27  ;;  %v2358_v27 = vrot.slane %v2356_v17, 1  ;;  %v11114_v17 = vor.u32 %v2418_v13, %v2414_v58 }
 0x13c   : > { %9338 = vmatprep.mubr.msk.bf16.mxu0 %vm280_vm1, %v10604_v28  ;;  %v2361_v28 = vshll.u32 %v2322_v21, 16  ;;  %v2423_v21 = vrot.slane %v2421_v46, 1  ;;  %v13351_v46 = vshrl.u32 %v11134_v19, 16 }
 0x143   : > { %9339 = vmatmul.mubr.msk.bf16.gmra.mrb[12].mxu0 %vm280_vm1, %v10606_v29  ;;  %v11030_v29 = vld [vmem:[#allocation2 + $0x50] sm:$0xff] }
 0x144   : > { %9342 = vmatprep.mubr.msk.bf16.mxu0 %vm280_vm1, %v10612_v30  ;;  %v2368_v30 = vshll.u32 %v11028_v22, 16 }
 0x146   : > { %v2370_v47 = vrot.slane %v2368_v30, 1 }
 0x148   : > { %v11053_v14 = vor.u32 %v2370_v47, %v2366_v56  ;;  %v2438_v47 = vshrl.u32 %v11106_v34, 16 }
 0x14b   : > { %9343 = vmatmul.mubr.msk.bf16.gmra.mrb[16].mxu0 %vm280_vm1, %v10614_v31  ;;  %v2324_v31 = vld [vmem:[#allocation2 + $0x40] sm:$0x1] }
 0x14c   : > { %9346 = vmatprep.mubr.msk.bf16.mxu0 %vm280_vm1, %v10620_v32  ;;  %v2359_v32 = vor.u32 %v2358_v27, %v2354_v26  ;;  %v2373_v59 = vshll.u32 %v2324_v31, 16  ;;  %v2440_v26 = vshll.u32 %v11106_v34, 16  ;;  %v11119_v27 = vor.u32 %v2430_v20, %v2426_v11  ;;  %v2336_v31 = vld [vmem:[#allocation2 + $0xd0] sm:$0x1] }
 0x14d   : > { %v2481_v20 = vshll.u32 %v2342_v4, 16 }
 0x14e   : > { %v2375_v24 = vrot.slane %v2373_v59, 1  ;;  %v2442_v59 = vrot.slane %v2440_v26, 1 }
 0x150   : > { %v2376_v50 = vsel %vm13357_vm3, %v11053_v14, %v2375_v24 }
 0x153   : > { %9347 = vmatmul.mubr.msk.bf16.gmra.mrb[20].mxu0 %vm280_vm1, %v10622_v33  ;;  %v2363_v33 = vrot.slane %v2361_v28, 1  ;;  %v2435_v28 = vrot.slane %v2433_v54, 1  ;;  %v11158_v54 = vld [vmem:[#allocation2 + $0x128] sm:$0xff] }
 0x154   : > { %9350 = vmatprep.mubr.msk.bf16.mxu0 %vm280_vm1, %v10629_v36  ;;  %v2380_v36 = vshll.u32 %v11030_v29, 16 }
 0x155   : > { %v2364_v42 = vsel %vm13357_vm3, %v2359_v32, %v2363_v33  ;;  %v2452_v32 = vshll.u32 %v11108_v15, 16  ;;  %v2338_v33 = vld [vmem:[#allocation2 + $0xe8] sm:$0x1] }
 0x156   : > { %v2382_v48 = vrot.slane %v2380_v36, 1 }
 0x157   : > { %v2454_v24 = vrot.slane %v2452_v32, 1 }
 0x15b   : > { %9351 = vmatmul.mubr.msk.bf16.gmra.mrb[24].mxu0 %vm280_vm1, %v10634_v39  ;;  %v2378_v39 = vshrl.u32 %v11030_v29, 16 }
 0x15c   : > { %9354 = vmatprep.mubr.msk.bf16.mxu0 %vm280_vm1, %v10647_v49  ;;  %v2385_v49 = vshll.u32 %v2326_v37, 16  ;;  %v2424_v37 = vsel %vm13357_vm3, %v11114_v17, %v2423_v21  ;;  %v11160_v21 = vld [vmem:[#allocation2 + $0x140] sm:$0xff] }
 0x15d   : > { %v11059_v57 = vor.u32 %v2382_v48, %v2378_v39  ;;  %v2436_v48 = vsel %vm13357_vm3, %v11119_v27, %v2435_v28  ;;  %v11166_v28 = vor.u32 %v2466_v55, %v2462_v7 }
 0x15e   : > { %v2387_v52 = vrot.slane %v2385_v49, 1  ;;  %v2450_v49 = vshrl.u32 %v11108_v15, 16 }
 0x160   : > { %v2388_v16 = vsel %vm13357_vm3, %v11059_v57, %v2387_v52  ;;  %v2457_v52 = vshll.u32 %v2338_v33, 16  ;;  %v11145_v12 = vor.u32 %v2454_v24, %v2450_v49  ;;  %v13347_v33 = vshll.u32 %v11158_v54, 16  ;;  %v2346_v24 = vld [vmem:[#allocation2 + $0x148] sm:$0x1] }
 0x163   : > { %9355 = vmatmul.mubr.msk.bf16.gmra.mrb[28].mxu0 %vm280_vm1, %v10975_v25 }
 0x164   : > { %9360 = vmatprep.mubr.msk.bf16.mxu0 %vm280_vm1, %v2364_v42  ;;  %v2445_v42 = vshll.u32 %v2336_v31, 16 }
 0x16b   : > { %9361 = vmatmul.mubr.msk.bf16.vlgmr.msra.gmra.mrb[0].mxu0 %vm280_vm1, %v2376_v50  ;;  %v11140_v50 = vor.u32 %v2442_v59, %v2438_v47  ;;  %v2483_v59 = vrot.slane %v2481_v20, 1 }
 0x16c   : > { %9393 = vmatpush3.bf16.msra.mxu0 %v3067_v5  ;;  %9364 = vmatprep.mubr.msk.bf16.mxu0 %vm280_vm1, %v2388_v16  ;;  %v2447_v5 = vrot.slane %v2445_v42, 1  ;;  %v2459_v16 = vrot.slane %v2457_v52, 1  ;;  %v2344_v42 = vld [vmem:[#allocation2 + $0x130] sm:$0x1] }
 0x16d   : > { %10319 = vmatprep.subr.msk.bf16.mxu0 %vm773_vm0, %v11080_v61 }
 0x16e   : > { %v2448_v0 = vsel %vm13357_vm3, %v11140_v50, %v2447_v5  ;;  %v2460_v13 = vsel %vm13357_vm3, %v11145_v12, %v2459_v16  ;;  %v13349_v5 = vshrl.u32 %v11158_v54, 16  ;;  %v2490_v16 = vrot.slane %v13347_v33, 1 }
 0x170   : > { %v11192_v20 = vor.u32 %v2490_v16, %v13349_v5 }
 0x173   : > { %9365 = vmatmul.mubr.msk.bf16.gmra.mrb[4].mxu0 %vm280_vm1, %v2400_v6  ;;  %v2469_v6 = vshll.u32 %v2340_v35, 16  ;;  %v2493_v35 = vshll.u32 %v2344_v42, 16 }
 0x174   : > { %9368 = vmatprep.mubr.msk.bf16.mxu0 %vm280_vm1, %v2412_v43  ;;  %v2478_v43 = vrot.slane %v13348_v18, 1  ;;  %v2350_v18 = vld [vmem:[#allocation2 + $0x178] sm:$0x1] }
 0x175   : > { %v2471_v31 = vrot.slane %v2469_v6, 1  ;;  %v2505_v6 = vshll.u32 %v2346_v24, 16 }
 0x177   : > { %v2472_v52 = vsel %vm13357_vm3, %v11166_v28, %v2471_v31  ;;  %v2495_v31 = vrot.slane %v2493_v35, 1  ;;  %v2507_v24 = vrot.slane %v2505_v6, 1 }
 0x17b   : > { %9369 = vmatmul.mubr.msk.bf16.gmra.mrb[8].mxu0 %vm280_vm1, %v2424_v37  ;;  %v11171_v37 = vor.u32 %v2478_v43, %v13351_v46  ;;  %v11186_v43 = vld [vmem:[#allocation2 + $0x170] sm:$0xff] }
 0x17c   : > { %9372 = vmatprep.mubr.msk.bf16.mxu0 %vm280_vm1, %v2436_v48  ;;  %v13346_v48 = vshll.u32 %v11160_v21, 16  ;;  %v13354_v33 = vshll.u32 %v11186_v43, 16 }
 0x17d   : > { %v2484_v4 = vsel %vm13357_vm3, %v11171_v37, %v2483_v59 }
 0x17e   : > { %v2502_v55 = vrot.slane %v13346_v48, 1  ;;  %v2348_v48 = vld [vmem:[#allocation2 + $0x160] sm:$0x1]  ;;  %v2526_v6 = vrot.slane %v13354_v33, 1 }
 0x17f   : > { %v2517_v35 = vshll.u32 %v2348_v48, 16 }
 0x181   : > { %v2519_v46 = vrot.slane %v2517_v35, 1  ;;  %v2831_v35 = vrot.slane %v2366_v56, 7  ;;  %v2843_v56 = vrot.slane %v2378_v39, 7  ;;  %v2800_v39 = vld [vmem:[#allocation2 + $0x90] sm:$0x80] }
 0x183   : > { %9373 = vmatmul.mubr.msk.bf16.gmra.mrb[12].mxu0 %vm280_vm1, %v2448_v0  ;;  %v13350_v0 = vshrl.u32 %v11160_v21, 16 }
 0x184   : > { %9376 = vmatprep.mubr.msk.bf16.mxu0 %vm280_vm1, %v2460_v13  ;;  %v11184_v13 = vld [vmem:[#allocation2 + $0x158] sm:$0xff] }
 0x185   : > { %v13352_v59 = vshll.u32 %v11184_v13, 16  ;;  %v11197_v42 = vor.u32 %v2502_v55, %v13350_v0  ;;  %v13355_v55 = vshrl.u32 %v11186_v43, 16  ;;  %v2529_v0 = vshll.u32 %v2350_v18, 16 }
 0x186   : > { %v2538_v18 = vrot.slane %v1841_v62, 1  ;;  %v2834_v62 = vor.u32 %v2831_v35, %v2368_v30  ;;  %v2846_v30 = vor.u32 %v2843_v56, %v2380_v36  ;;  %v2879_v36 = vrot.slane %v2414_v58, 7  ;;  %v2804_v58 = vld [vmem:[#allocation2 + $0xc0] sm:$0x80] }
 0x187   : > { %v2514_v16 = vrot.slane %v13352_v59, 1  ;;  %v2508_v5 = vsel %vm13357_vm3, %v11197_v42, %v2507_v24  ;;  %v11218_v48 = vor.u32 %v2526_v6, %v13355_v55  ;;  %v2531_v24 = vrot.slane %v2529_v0, 1  ;;  %v2352_v59 = vld [vmem:[#allocation2 + $0x190] sm:$0x1]  ;;  %v2796_v55 = vld [vmem:[#allocation2 + $0x60] sm:$0x80] }
 0x188   : > { %v2539_v0 = vor.u32 %v2538_v18, %v1838_v9  ;;  %v2891_v56 = vrot.slane %v2426_v11, 7  ;;  %v2808_v11 = vld [vmem:[#allocation2 + $0xf0] sm:$0x80] }
 0x18b   : > { %9377 = vmatmul.mubr.msk.bf16.gmra.mrb[16].mxu0 %vm280_vm1, %v2472_v52  ;;  %v2496_v52 = vsel %vm13357_vm3, %v11192_v20, %v2495_v31 }
 0x18c   : > { %9380 = vmatprep.mubr.msk.bf16.mxu0 %vm280_vm1, %v2484_v4  ;;  %v13356_v4 = vshrl.u32 %v11184_v13, 16 }
 0x18e   : > { %v11214_v31 = vor.u32 %v2514_v16, %v13356_v4  ;;  %v2825_v16 = vshrl.u32 %v2792_v41, 16  ;;  %v2849_v4 = vshrl.u32 %v2796_v55, 16 }
 0x190   : > { %v2520_v33 = vsel %vm13357_vm3, %v11214_v31, %v2519_v46  ;;  %v2827_v46 = vrot.slane %v2825_v16, 7  ;;  %v2851_v18 = vrot.slane %v2849_v4, 7  ;;  %v2798_v16 = vld [vmem:[#allocation2 + $0x78] sm:$0x80] }
 0x191   : > { %v2861_v55 = vshrl.u32 %v2798_v16, 16 }
 0x193   : > { %9381 = vmatmul.mubr.msk.bf16.gmra.mrb[20].mxu0 %vm280_vm1, %v2496_v52  ;;  %v2541_v52 = vshll.u32 %v2352_v59, 16  ;;  %v2794_v59 = vld [vmem:[#allocation2 + $0x48] sm:$0x80] }
 0x194   : > { %9384 = vmatprep.mubr.msk.bf16.mxu0 %vm280_vm1, %v2508_v5  ;;  %v2532_v5 = vsel %vm13357_vm3, %v11218_v48, %v2531_v24  ;;  %v2837_v41 = vshrl.u32 %v2794_v59, 16  ;;  %v2802_v59 = vld [vmem:[#allocation2 + $0xa8] sm:$0x80] }
 0x195   : > { %v2543_v6 = vrot.slane %v2541_v52, 1 }
 0x196   : > { %v2839_v9 = vrot.slane %v2837_v41, 7  ;;  %v2885_v41 = vshrl.u32 %v2802_v59, 16 }
 0x197   : > { %v2544_v24 = vsel %vm13357_vm3, %v2539_v0, %v2543_v6  ;;  %v3297_v0 = vsel %vm773_vm0, %v11080_v61, 0 }
 0x198   : > { %v2847_v35 = vsel %vm13358_vm2, %v2839_v9, %v2846_v30  ;;  %v2894_v9 = vor.u32 %v2891_v56, %v2428_v2 }
 0x19b   : > { %9385 = vmatmul.mubr.msk.bf16.gmra.mrb[24].mxu0 %vm280_vm1, %v2520_v33  ;;  %v2835_v33 = vsel %vm13358_vm2, %v2827_v46, %v2834_v62  ;;  %v2873_v46 = vshrl.u32 %v2800_v39, 16  ;;  %v2882_v62 = vor.u32 %v2879_v36, %v2416_v23  ;;  %v2887_v23 = vrot.slane %v2885_v41, 7  ;;  %v2810_v36 = vld [vmem:[#allocation2 + $0x108] sm:$0x80] }
 0x19c   : > { %9388 = vmatprep.mubr.msk.bf16.mxu0 %vm280_vm1, %v2532_v5  ;;  %v2855_v5 = vrot.slane %v2390_v8, 7  ;;  %v2867_v8 = vrot.slane %v2402_v38, 7  ;;  %v2863_v38 = vrot.slane %v2861_v55, 7  ;;  %v2921_v55 = vshrl.u32 %v2808_v11, 16 }
 0x19d   : > { %v2875_v4 = vrot.slane %v2873_v46, 7  ;;  %v2895_v16 = vsel %vm13358_vm2, %v2887_v23, %v2894_v9  ;;  %v13405_v41 = vshll.u32 %v11134_v19, 16  ;;  %v2814_v23 = vld [vmem:[#allocation2 + $0x138] sm:$0x80]  ;;  %v2816_v9 = vld [vmem:[#allocation2 + $0x150] sm:$0x80] }
 0x19e   : > { %v2858_v52 = vor.u32 %v2855_v5, %v2392_v45  ;;  %v11257_v45 = vld [vmem:[%s13325_s1 + $0x10] sm:$0x3]  ;;  %v2870_v61 = vor.u32 %v2867_v8, %v2404_v63  ;;  %v2897_v5 = vshrl.u32 %v2804_v58, 16  ;;  %v2903_v63 = vrot.slane %v2438_v47, 7 }
 0x19f   : > { %v2915_v47 = vrot.slane %v2450_v49, 7  ;;  %v2927_v8 = vrot.slane %v2462_v7, 7  ;;  %v2812_v49 = vld [vmem:[#allocation2 + $0x120] sm:$0x80]  ;;  %v13404_v58 = vshrl.u32 %v11158_v54, 16 }
 0x1a0   : > { %v2859_v6 = vsel %vm13358_vm2, %v2851_v18, %v2858_v52  ;;  %v2899_v30 = vrot.slane %v2897_v5, 7  ;;  %v2906_v18 = vor.u32 %v2903_v63, %v2440_v26  ;;  %v2806_v52 = vld [vmem:[#allocation2 + $0xd8] sm:$0x80]  ;;  %v2945_v59 = vshrl.u32 %v2812_v49, 16 }
 0x1a1   : > { %v2909_v39 = vshrl.u32 %v2806_v52, 16  ;;  %v2918_v26 = vor.u32 %v2915_v47, %v2452_v32  ;;  %v13406_v5 = vshll.u32 %v11158_v54, 16  ;;  %v13407_v52 = vshrl.u32 %v11160_v21, 16 }
 0x1a2   : > { %v13408_v47 = vshrl.u32 %v11184_v13, 16 }
 0x1a3   : > { %9389 = vmatmul.mubr.msk.bf16.gmra.mrb[28].mxu0 %vm280_vm1, %v2544_v24  ;;  %v2871_v24 = vsel %vm13358_vm2, %v2863_v38, %v2870_v61  ;;  %v2911_v2 = vrot.slane %v2909_v39, 7  ;;  %v2933_v61 = vshrl.u32 %v2810_v36, 16  ;;  %v2963_v11 = vrot.slane %v13407_v52, 7  ;;  %v2820_v36 = vld [vmem:[#allocation2 + $0x180] sm:$0x80] }
 0x1a4   : > { %9394 = vmatprep.mubr.msk.bf16.mxu0 %vm280_vm1, %v2835_v33  ;;  %v2883_v33 = vsel %vm13358_vm2, %v2875_v4, %v2882_v62  ;;  %v13403_v4 = vshrl.u32 %v11134_v19, 16  ;;  %v2969_v39 = vshrl.u32 %v2816_v9, 16 }
 0x1a5   : > { %v2919_v38 = vsel %vm13358_vm2, %v2911_v2, %v2918_v26  ;;  %v2935_v32 = vrot.slane %v2933_v61, 7  ;;  %v13411_v61 = vshrl.u32 %v11186_v43, 16 }
 0x1a6   : > { %v2939_v7 = vrot.slane %v13403_v4, 7  ;;  %v2971_v26 = vrot.slane %v2969_v39, 7  ;;  %v3503_v39 = vld [vmem:[#allocation2 + $0xb8] sm:$0x1] }
 0x1a7   : > { %v2987_v4 = vrot.slane %v13411_v61, 7  ;;  %v3513_v61 = vld [vmem:[#allocation2 + $0x130] sm:$0x1] }
 0x1a8   : > { %v2942_v56 = vor.u32 %v2939_v7, %v13405_v41 }
 0x1ab   : > { %9395 = vmatmul.mubr.msk.bf16.vlgmr.msra.gmra.mrb[0].mxu0 %vm280_vm1, %v2847_v35  ;;  %v2907_v35 = vsel %vm13358_vm2, %v2899_v30, %v2906_v18  ;;  %v2943_v30 = vsel %vm13358_vm2, %v2935_v32, %v2942_v56  ;;  %v2957_v18 = vshrl.u32 %v2814_v23, 16 }
 0x1ac   : > { %9427 = vmatpush3.bf16.msra.mxu0 %v3297_v0  ;;  %9398 = vmatprep.mubr.msk.bf16.mxu0 %vm280_vm1, %v2859_v6  ;;  %v2923_v0 = vrot.slane %v2921_v55, 7  ;;  %v13402_v6 = vshll.u32 %v11132_v40, 16 }
 0x1ad   : > { %10320 = vmatprep.subr.msk.bf16.mxu0 %vm773_vm0, %v11257_v45  ;;  %v2959_v55 = vrot.slane %v2957_v18, 7 }
 0x1ae   : > { %v2930_v46 = vor.u32 %v2927_v8, %v13402_v6  ;;  %v13409_v8 = vshll.u32 %v11160_v21, 16 }
 0x1b0   : > { %v2931_v62 = vsel %vm13358_vm2, %v2923_v0, %v2930_v46  ;;  %v2966_v2 = vor.u32 %v2963_v11, %v13409_v8  ;;  %v13410_v0 = vshll.u32 %v11184_v13, 16  ;;  %v2818_v46 = vld [vmem:[#allocation2 + $0x168] sm:$0x80] }
 0x1b2   : > { %v2967_v49 = vsel %vm13358_vm2, %v2959_v55, %v2966_v2  ;;  %v3592_v55 = vshll.u32 %v3503_v39, 16 }
 0x1b3   : > { %9399 = vmatmul.mubr.msk.bf16.gmra.mrb[4].mxu0 %vm280_vm1, %v2871_v24  ;;  %v2951_v24 = vrot.slane %v13404_v58, 7 }
 0x1b4   : > { %9402 = vmatprep.mubr.msk.bf16.mxu0 %vm280_vm1, %v2883_v33  ;;  %v2947_v33 = vrot.slane %v2945_v59, 7  ;;  %v11319_v59 = vld [vmem:[#allocation2 + $0x1a0] sm:$0xff] }
 0x1b5   : > { %v2954_v63 = vor.u32 %v2951_v24, %v13406_v5  ;;  %v13412_v24 = vshll.u32 %v11186_v43, 16  ;;  %v3009_v41 = vshrl.u32 %v11319_v59, 16  ;;  %v3012_v9 = vshll.u32 %v11319_v59, 16 }
 0x1b7   : > { %v2990_v32 = vor.u32 %v2987_v4, %v13412_v24  ;;  %v3011_v23 = vrot.slane %v3009_v41, 7  ;;  %v3515_v24 = vld [vmem:[#allocation2 + $0x148] sm:$0x1] }
 0x1b9   : > { %v3014_v52 = vor.u32 %v3012_v9, %v3011_v23 }
 0x1bb   : > { %9403 = vmatmul.mubr.msk.bf16.gmra.mrb[8].mxu0 %vm280_vm1, %v2895_v16  ;;  %v2955_v16 = vsel %vm13358_vm2, %v2947_v33, %v2954_v63  ;;  %v2822_v33 = vld [vmem:[#allocation2 + $0x198] sm:$0x80] }
 0x1bc   : > { %9406 = vmatprep.mubr.msk.bf16.mxu0 %vm280_vm1, %v2907_v35  ;;  %v2975_v35 = vrot.slane %v13408_v47, 7  ;;  %v3005_v63 = vshrl.u32 %v2822_v33, 16  ;;  %v3505_v47 = vld [vmem:[#allocation2 + $0xd0] sm:$0x1]  ;;  %v3664_v33 = vshll.u32 %v3515_v24, 16 }
 0x1bd   : > { %v3604_v8 = vshll.u32 %v3505_v47, 16 }
 0x1be   : > { %v2978_v6 = vor.u32 %v2975_v35, %v13410_v0  ;;  %v3007_v18 = vrot.slane %v3005_v63, 7  ;;  %v3509_v0 = vld [vmem:[#allocation2 + $0x100] sm:$0x1]  ;;  %v3520_v63 = vld [vmem:[#allocation2 + $0x188] sm:$0xff] }
 0x1bf   : > { %v3606_v2 = vrot.slane %v3604_v8, 1 }
 0x1c0   : > { %v2979_v7 = vsel %vm13358_vm2, %v2971_v26, %v2978_v6  ;;  %v3015_v11 = vsel %vm13358_vm2, %v3007_v18, %v3014_v52  ;;  %v3507_v26 = vld [vmem:[#allocation2 + $0xe8] sm:$0x1]  ;;  %v3695_v18 = vshll.u32 %v3520_v63, 16  ;;  %v3521_v52 = vld [vmem:[#allocation2 + $0x190] sm:$0x1] }
 0x1c3   : > { %9407 = vmatmul.mubr.msk.bf16.gmra.mrb[12].mxu0 %vm280_vm1, %v2919_v38  ;;  %v2981_v38 = vshrl.u32 %v2818_v46, 16  ;;  %v3616_v46 = vshll.u32 %v3507_v26, 16 }
 0x1c4   : > { %9410 = vmatprep.mubr.msk.bf16.mxu0 %vm280_vm1, %v2931_v62  ;;  %v2993_v62 = vshrl.u32 %v2820_v36, 16  ;;  %v3628_v36 = vshll.u32 %v3509_v0, 16 }
 0x1c5   : > { %v2983_v58 = vrot.slane %v2981_v38, 7  ;;  %v3511_v38 = vld [vmem:[#allocation2 + $0x118] sm:$0x1] }
 0x1c6   : > { %v2995_v56 = vrot.slane %v2993_v62, 7  ;;  %v3652_v62 = vshll.u32 %v3513_v61, 16 }
 0x1c7   : > { %v2991_v5 = vsel %vm13358_vm2, %v2983_v58, %v2990_v32  ;;  %v3517_v32 = vld [vmem:[#allocation2 + $0x160] sm:$0x1] }
 0x1c8   : > { %v3654_v58 = vrot.slane %v3652_v62, 1 }
 0x1cb   : > { %9411 = vmatmul.mubr.msk.bf16.gmra.mrb[16].mxu0 %vm280_vm1, %v2943_v30  ;;  %v3003_v30 = vsel %vm13358_vm2, %v2995_v56, %v10991_v51  ;;  %v3493_v51 = vld [vmem:[#allocation2 + $0x40] sm:$0x1] }
 0x1cc   : > { %9414 = vmatprep.mubr.msk.bf16.mxu0 %vm280_vm1, %v2955_v16  ;;  %v3767_v16 = vsel %vm773_vm0, %v11257_v45, 0 }
 0x1d3   : > { %9415 = vmatmul.mubr.msk.bf16.gmra.mrb[20].mxu0 %vm280_vm1, %v2967_v49  ;;  %v3630_v49 = vrot.slane %v3628_v36, 1 }
 0x1d4   : > { %9418 = vmatprep.mubr.msk.bf16.mxu0 %vm280_vm1, %v2979_v7  ;;  %v3640_v7 = vshll.u32 %v3511_v38, 16 }
 0x1db   : > { %9419 = vmatmul.mubr.msk.bf16.gmra.mrb[24].mxu0 %vm280_vm1, %v2991_v5  ;;  %v3676_v5 = vshll.u32 %v3517_v32, 16 }
 0x1dc   : > { %9422 = vmatprep.mubr.msk.bf16.mxu0 %vm280_vm1, %v3003_v30  ;;  %v3519_v30 = vld [vmem:[#allocation2 + $0x178] sm:$0x1] }
 0x1dd   : > { %v3678_v23 = vrot.slane %v3676_v5, 1 }
 0x1e3   : > { %9423 = vmatmul.mubr.msk.bf16.gmra.mrb[28].mxu0 %vm280_vm1, %v3015_v11 }
 0x1e4   : > { %9428 = vmatprep.mubr.msk.bf16.mxu0 %vm280_vm1, %v11028_v22  ;;  %v3532_v22 = vshll.u32 %v3493_v51, 16  ;;  %v3693_v51 = vshrl.u32 %v3520_v63, 16 }
 0x1eb   : > { %9429 = vmatmul.mubr.msk.bf16.vlgmr.msra.gmra.mrb[0].mxu0 %vm280_vm1, %v11030_v29  ;;  %v3534_v29 = vrot.slane %v3532_v22, 1  ;;  %v3700_v22 = vshll.u32 %v3521_v52, 16 }
 0x1ec   : > { %9461 = vmatpush3.bf16.msra.mxu0 %v3767_v16  ;;  %9432 = vmatprep.mubr.msk.bf16.mxu0 %vm280_vm1, %v11045_v53  ;;  %v3495_v53 = vld [vmem:[#allocation2 + $0x58] sm:$0x1]  ;;  %v3688_v16 = vshll.u32 %v3519_v30, 16 }
 0x1f3   : > { %9433 = vmatmul.mubr.msk.bf16.gmra.mrb[4].mxu0 %vm280_vm1, %v11047_v44  ;;  %v3497_v44 = vld [vmem:[#allocation2 + $0x70] sm:$0x1] }
 0x1f4   : > { %9436 = vmatprep.mubr.msk.bf16.mxu0 %vm280_vm1, %v11073_v1  ;;  %v3544_v1 = vshll.u32 %v3495_v53, 16 }
 0x1fb   : > { %9437 = vmatmul.mubr.msk.bf16.gmra.mrb[8].mxu0 %vm280_vm1, %v11075_v60  ;;  %v3535_v60 = vsel %vm13357_vm3, %v11053_v14, %v3534_v29  ;;  %v3690_v29 = vrot.slane %v3688_v16, 1 }
 0x1fc   : > { %9440 = vmatprep.mubr.msk.bf16.mxu0 %vm280_vm1, %v11106_v34  ;;  %v3556_v34 = vshll.u32 %v3497_v44, 16  ;;  %v3702_v44 = vrot.slane %v3700_v22, 1 }
 0x203   : > { %9441 = vmatmul.mubr.msk.bf16.gmra.mrb[12].mxu0 %vm280_vm1, %v11108_v15  ;;  %v3546_v15 = vrot.slane %v3544_v1, 1  ;;  %v3523_v1 = vld [vmem:[#allocation2 + $0x1a8] sm:$0x1] }
 0x204   : > { %9444 = vmatprep.mubr.msk.bf16.mxu0 %vm280_vm1, %v11132_v40  ;;  %v3558_v40 = vrot.slane %v3556_v34, 1  ;;  %v3712_v34 = vshll.u32 %v3523_v1, 16 }
 0x20b   : > { %9445 = vmatmul.mubr.msk.bf16.gmra.mrb[16].mxu0 %vm280_vm1, %v11134_v19  ;;  %v3499_v19 = vld [vmem:[#allocation2 + $0x88] sm:$0x1] }
 0x20c   : > { %9448 = vmatprep.mubr.msk.bf16.mxu0 %vm280_vm1, %v11158_v54  ;;  %v3501_v54 = vld [vmem:[#allocation2 + $0xa0] sm:$0x1] }
 0x213   : > { %9449 = vmatmul.mubr.msk.bf16.gmra.mrb[20].mxu0 %vm280_vm1, %v11160_v21  ;;  %v3568_v21 = vshll.u32 %v3499_v19, 16 }
 0x214   : > { %9452 = vmatprep.mubr.msk.bf16.mxu0 %vm280_vm1, %v11184_v13  ;;  %v3559_v13 = vsel %vm13357_vm3, %v11086_v10, %v3558_v40  ;;  %v3594_v10 = vrot.slane %v3592_v55, 1  ;;  %v3714_v40 = vrot.slane %v3712_v34, 1 }
 0x215   : > { %v3570_v14 = vrot.slane %v3568_v21, 1 }
 0x216   : > { %v3595_v6 = vsel %vm13357_vm3, %v11119_v27, %v3594_v10  ;;  %v3631_v27 = vsel %vm13357_vm3, %v11166_v28, %v3630_v49  ;;  %v3666_v28 = vrot.slane %v3664_v33, 1 }
 0x217   : > { %v3571_v35 = vsel %vm13357_vm3, %v11091_v3, %v3570_v14  ;;  %v3607_v3 = vsel %vm13357_vm3, %v11140_v50, %v3606_v2  ;;  %v3642_v50 = vrot.slane %v3640_v7, 1 }
 0x218   : > { %v3667_v11 = vsel %vm13357_vm3, %v11197_v42, %v3666_v28  ;;  %v3709_v42 = vrot.slane %v3012_v9, 1 }
 0x219   : > { %v3643_v56 = vsel %vm13357_vm3, %v11171_v37, %v3642_v50  ;;  %v3679_v37 = vsel %vm13357_vm3, %v11214_v31, %v3678_v23 }
 0x21b   : > { %9453 = vmatmul.mubr.msk.bf16.gmra.mrb[24].mxu0 %vm280_vm1, %v11186_v43  ;;  %v3580_v43 = vshll.u32 %v3501_v54, 16 }
 0x21c   : > { %9456 = vmatprep.mubr.msk.bf16.mxu0 %vm280_vm1, %v10975_v25  ;;  %v3547_v25 = vsel %vm13357_vm3, %v11059_v57, %v3546_v15  ;;  %v3710_v15 = vor.u32 %v3709_v42, %v3009_v41 }
 0x21d   : > { %v3582_v45 = vrot.slane %v3580_v43, 1 }
 0x21e   : > { %v3715_v19 = vsel %vm13357_vm3, %v3710_v15, %v3714_v40 }
 0x21f   : > { %v3583_v57 = vsel %vm13357_vm3, %v11114_v17, %v3582_v45  ;;  %v3618_v17 = vrot.slane %v3616_v46, 1 }
 0x221   : > { %v3619_v4 = vsel %vm13357_vm3, %v11145_v12, %v3618_v17  ;;  %v3655_v12 = vsel %vm13357_vm3, %v11192_v20, %v3654_v58  ;;  %v3697_v20 = vrot.slane %v3695_v18, 1 }
 0x223   : > { %9457 = vmatmul.mubr.msk.bf16.gmra.mrb[28].mxu0 %vm280_vm1, %v11319_v59  ;;  %v3698_v53 = vor.u32 %v3697_v20, %v3693_v51 }
 0x224   : > { %9462 = vmatprep.mubr.msk.bf16.mxu0 %vm280_vm1, %v3535_v60  ;;  %v3691_v60 = vsel %vm13357_vm3, %v11218_v48, %v3690_v29  ;;  %v13413_v48 = vmov 0  }
 0x225   : > { %v3703_v31 = vsel %vm13357_vm3, %v3698_v53, %v3702_v44  ;;  %325 = vst.msk [vmem:[#allocation3] sm:$0xff] %vm13359_vm4, %v13413_v48  ;;  %326 = vst.msk [vmem:[#allocation3 + $0x8] sm:$0xff] %vm13359_vm4, %v13413_v48 }
 0x226   : > { %327 = vst.msk [vmem:[#allocation3 + $0x10] sm:$0xff] %vm13359_vm4, %v13413_v48  ;;  %329 = vst.msk [vmem:[#allocation3 + $0x198] sm:$0xff] %vm13359_vm4, %v13413_v48 }
 0x227   : > { %330 = vst.msk [vmem:[#allocation3 + $0x1a0] sm:$0xff] %vm13359_vm4, %v13413_v48  ;;  %331 = vst.msk [vmem:[#allocation3 + $0x1a8] sm:$0xff] %vm13359_vm4, %v13413_v48 }
 0x228   : > { %333 = vst.msk [vmem:[#allocation3 + $0x18] sm:$0xff] %vm13359_vm4, %v13413_v48  ;;  %334 = vst.msk [vmem:[#allocation3 + $0x30] sm:$0xff] %vm13359_vm4, %v13413_v48 }
 0x229   : > { %335 = vst.msk [vmem:[#allocation3 + $0x48] sm:$0xff] %vm13359_vm4, %v13413_v48  ;;  %336 = vst.msk [vmem:[#allocation3 + $0x60] sm:$0xff] %vm13359_vm4, %v13413_v48 }
 0x22a   : > { %337 = vst.msk [vmem:[#allocation3 + $0x78] sm:$0xff] %vm13359_vm4, %v13413_v48  ;;  %338 = vst.msk [vmem:[#allocation3 + $0x90] sm:$0xff] %vm13359_vm4, %v13413_v48 }
 0x22b   : > { %9463 = vmatmul.mubr.msk.bf16.vlgmr.msra.gmra.mrb[0].mxu0 %vm280_vm1, %v3547_v25  ;;  %339 = vst.msk [vmem:[#allocation3 + $0xa8] sm:$0xff] %vm13359_vm4, %v13413_v48  ;;  %340 = vst.msk [vmem:[#allocation3 + $0xc0] sm:$0xff] %vm13359_vm4, %v13413_v48 }
 0x22c   : > { %9466 = vmatprep.mubr.msk.bf16.mxu0 %vm280_vm1, %v3559_v13  ;;  %341 = vst.msk [vmem:[#allocation3 + $0xd8] sm:$0xff] %vm13359_vm4, %v13413_v48  ;;  %342 = vst.msk [vmem:[#allocation3 + $0xf0] sm:$0xff] %vm13359_vm4, %v13413_v48 }
 0x22d   : > { %343 = vst.msk [vmem:[#allocation3 + $0x108] sm:$0xff] %vm13359_vm4, %v13413_v48  ;;  %344 = vst.msk [vmem:[#allocation3 + $0x120] sm:$0xff] %vm13359_vm4, %v13413_v48 }
 0x22e   : > { %345 = vst.msk [vmem:[#allocation3 + $0x138] sm:$0xff] %vm13359_vm4, %v13413_v48  ;;  %346 = vst.msk [vmem:[#allocation3 + $0x150] sm:$0xff] %vm13359_vm4, %v13413_v48 }
 0x22f   : > { %347 = vst.msk [vmem:[#allocation3 + $0x168] sm:$0xff] %vm13359_vm4, %v13413_v48  ;;  %348 = vst.msk [vmem:[#allocation3 + $0x180] sm:$0xff] %vm13359_vm4, %v13413_v48 }
 0x230   : > { %351 = vst.msk [vmem:[#allocation3 + $0x28] sm:$0xff] %vm13359_vm4, %v13413_v48  ;;  %352 = vst.msk [vmem:[#allocation3 + $0x40] sm:$0xff] %vm13359_vm4, %v13413_v48 }
 0x231   : > { %353 = vst.msk [vmem:[#allocation3 + $0x58] sm:$0xff] %vm13359_vm4, %v13413_v48  ;;  %354 = vst.msk [vmem:[#allocation3 + $0x70] sm:$0xff] %vm13359_vm4, %v13413_v48 }
 0x232   : > { %355 = vst.msk [vmem:[#allocation3 + $0x88] sm:$0xff] %vm13359_vm4, %v13413_v48  ;;  %356 = vst.msk [vmem:[#allocation3 + $0xa0] sm:$0xff] %vm13359_vm4, %v13413_v48 }
 0x233   : > { %9467 = vmatmul.mubr.msk.bf16.gmra.mrb[4].mxu0 %vm280_vm1, %v3571_v35  ;;  %357 = vst.msk [vmem:[#allocation3 + $0xb8] sm:$0xff] %vm13359_vm4, %v13413_v48  ;;  %358 = vst.msk [vmem:[#allocation3 + $0xd0] sm:$0xff] %vm13359_vm4, %v13413_v48 }
 0x234   : > { %9470 = vmatprep.mubr.msk.bf16.mxu0 %vm280_vm1, %v3583_v57  ;;  %359 = vst.msk [vmem:[#allocation3 + $0xe8] sm:$0xff] %vm13359_vm4, %v13413_v48  ;;  %360 = vst.msk [vmem:[#allocation3 + $0x100] sm:$0xff] %vm13359_vm4, %v13413_v48 }
 0x235   : > { %361 = vst.msk [vmem:[#allocation3 + $0x118] sm:$0xff] %vm13359_vm4, %v13413_v48  ;;  %362 = vst.msk [vmem:[#allocation3 + $0x130] sm:$0xff] %vm13359_vm4, %v13413_v48 }
 0x236   : > { %363 = vst.msk [vmem:[#allocation3 + $0x148] sm:$0xff] %vm13359_vm4, %v13413_v48  ;;  %364 = vst.msk [vmem:[#allocation3 + $0x160] sm:$0xff] %vm13359_vm4, %v13413_v48 }
 0x237   : > { %365 = vst.msk [vmem:[#allocation3 + $0x178] sm:$0xff] %vm13359_vm4, %v13413_v48  ;;  %366 = vst.msk [vmem:[#allocation3 + $0x190] sm:$0xff] %vm13359_vm4, %v13413_v48 }
 0x238   : > { %332 = vst.msk [vmem:[#allocation3] sm:$0xff] %vm13359_vm4, %v13413_v48  ;;  %349 = vst.msk [vmem:[#allocation3 + $0x198] sm:$0xff] %vm13359_vm4, %v13413_v48 }
 0x239   : > { %350 = vst.msk [vmem:[#allocation3 + $0x10] sm:$0xff] %vm13359_vm4, %v13413_v48  ;;  %367 = vst.msk [vmem:[#allocation3 + $0x1a8] sm:$0xff] %vm13359_vm4, %v13413_v48 }
 0x23b   : > { %9471 = vmatmul.mubr.msk.bf16.gmra.mrb[8].mxu0 %vm280_vm1, %v3595_v6 }
 0x23c   : > { %9474 = vmatprep.mubr.msk.bf16.mxu0 %vm280_vm1, %v3607_v3 }
 0x243   : > { %9475 = vmatmul.mubr.msk.bf16.gmra.mrb[12].mxu0 %vm280_vm1, %v3619_v4 }
 0x244   : > { %9478 = vmatprep.mubr.msk.bf16.mxu0 %vm280_vm1, %v3631_v27 }
 0x24b   : > { %9479 = vmatmul.mubr.msk.bf16.gmra.mrb[16].mxu0 %vm280_vm1, %v3643_v56 }
 0x24c   : > { %9482 = vmatprep.mubr.msk.bf16.mxu0 %vm280_vm1, %v3655_v12 }
 0x253   : > { %9483 = vmatmul.mubr.msk.bf16.gmra.mrb[20].mxu0 %vm280_vm1, %v3667_v11 }
 0x254   : > { %9486 = vmatprep.mubr.msk.bf16.mxu0 %vm280_vm1, %v3679_v37 }
 0x25b   : > { %9487 = vmatmul.mubr.msk.bf16.gmra.mrb[24].mxu0 %vm280_vm1, %v3691_v60 }
 0x25c   : > { %9490 = vmatprep.mubr.msk.bf16.mxu0 %vm280_vm1, %v3703_v31 }
 0x263   : > { %9491 = vmatmul.mubr.msk.bf16.gmra.mrb[28].mxu0 %vm280_vm1, %v3715_v19 }
 0x2fe   : > { %v11506_v59 = vpop.f32.mrb[0].mxu0 }
 0x2ff   : > { %v11508_v41 = vpop.f32.mrb[1].mxu0  ;;  %v3966_v9 = vmul.f32 %v11506_v59, %v11506_v59 }
 0x300   : > { %v11512_v54 = vpop.f32.mrb[2].mxu0  ;;  %v3964_v25 = vmul.f32 %v11508_v41, %v11508_v41 }
 0x301   : > { %4032 = vrot.lane.b32.xlu1 %v3966_v9, %s10374_s28  ;;  %v11517_v21 = vpop.f32.mrb[3].mxu0  ;;  %v3967_v13 = vmul.f32 %v11512_v54, %v11512_v54 }
 0x302   : > { %4028 = vrot.lane.b32.xlu0 %v3964_v25, %s10374_s28  ;;  %v3965_v43 = vmul.f32 %v11517_v21, %v11517_v21 }
 0x305   : > { %4034 = vrot.lane.b32.xlu1 %v3967_v13, %s10374_s28 }
 0x306   : > { %4030 = vrot.lane.b32.xlu0 %v3965_v43, %s10374_s28  ;;  %v11526_v14 = vpop.f32.mrb[4].mxu0 }
 0x307   : > { %v11528_v45 = vpop.f32.mrb[5].mxu0  ;;  %v3970_v57 = vmul.f32 %v11526_v14, %v11526_v14 }
 0x308   : > { %v3968_v39 = vmul.f32 %v11528_v45, %v11528_v45  ;;  %v11532_v47 = vpop.f32.mrb[6].mxu0 }
 0x309   : > { %v11534_v35 = vpop.f32.mrb[7].mxu0  ;;  %v3971_v8 = vmul.f32 %v11532_v47, %v11532_v47 }
 0x30a   : > { %v3969_v55 = vmul.f32 %v11534_v35, %v11534_v35  ;;  %4036 = vrot.lane.b32.xlu0 %v3968_v39, %s10374_s28 }
 0x30c   : > { %4038 = vrot.lane.b32.xlu1 %v3969_v55, %s10374_s28 }
 0x30e   : > { %4040 = vrot.lane.b32.xlu0 %v3970_v57, %s10374_s28  ;;  %v11545_v10 = vpop.f32.mrb[8].mxu0 }
 0x30f   : > { %v11547_v2 = vpop.f32.mrb[9].mxu0  ;;  %v3974_v3 = vmul.f32 %v11545_v10, %v11545_v10 }
 0x310   : > { %v3972_v26 = vmul.f32 %v11547_v2, %v11547_v2  ;;  %4042 = vrot.lane.b32.xlu1 %v3971_v8, %s10374_s28  ;;  %v11552_v0 = vpop.f32.mrb[10].mxu0 }
 0x311   : > { %v11554_v6 = vpop.f32.mrb[11].mxu0  ;;  %v3975_v36 = vmul.f32 %v11552_v0, %v11552_v0 }
 0x312   : > { %v3973_v46 = vmul.f32 %v11554_v6, %v11554_v6  ;;  %4044 = vrot.lane.b32.xlu0 %v3972_v26, %s10374_s28 }
 0x314   : > { %4046 = vrot.lane.b32.xlu1 %v3973_v46, %s10374_s28 }
 0x316   : > { %4048 = vrot.lane.b32.xlu0 %v3974_v3, %s10374_s28  ;;  %v11565_v17 = vpop.f32.mrb[12].mxu0 }
 0x317   : > { %v11567_v49 = vpop.f32.mrb[13].mxu0  ;;  %v3978_v27 = vmul.f32 %v11565_v17, %v11565_v17 }
 0x318   : > { %v3976_v38 = vmul.f32 %v11567_v49, %v11567_v49  ;;  %4050 = vrot.lane.b32.xlu1 %v3975_v36, %s10374_s28  ;;  %v11572_v61 = vpop.f32.mrb[14].mxu0 }
 0x319   : > { %v11574_v4 = vpop.f32.mrb[15].mxu0  ;;  %v3979_v62 = vmul.f32 %v11572_v61, %v11572_v61 }
 0x31a   : > { %v3977_v7 = vmul.f32 %v11574_v4, %v11574_v4  ;;  %4052 = vrot.lane.b32.xlu0 %v3976_v38, %s10374_s28 }
 0x31c   : > { %4054 = vrot.lane.b32.xlu1 %v3977_v7, %s10374_s28 }
 0x31e   : > { %4056 = vrot.lane.b32.xlu0 %v3978_v27, %s10374_s28  ;;  %v11585_v50 = vpop.f32.mrb[16].mxu0 }
 0x31f   : > { %v11587_v58 = vpop.f32.mrb[17].mxu0  ;;  %v3982_v12 = vmul.f32 %v11585_v50, %v11585_v50 }
 0x320   : > { %v3980_v24 = vmul.f32 %v11587_v58, %v11587_v58  ;;  %4058 = vrot.lane.b32.xlu1 %v3979_v62, %s10374_s28  ;;  %v11592_v32 = vpop.f32.mrb[18].mxu0 }
 0x321   : > { %v11594_v56 = vpop.f32.mrb[19].mxu0  ;;  %v3983_v5 = vmul.f32 %v11592_v32, %v11592_v32 }
 0x322   : > { %v3981_v33 = vmul.f32 %v11594_v56, %v11594_v56  ;;  %4060 = vrot.lane.b32.xlu0 %v3980_v24, %s10374_s28 }
 0x324   : > { %4062 = vrot.lane.b32.xlu1 %v3981_v33, %s10374_s28 }
 0x326   : > { %4064 = vrot.lane.b32.xlu0 %v3982_v12, %s10374_s28  ;;  %v11605_v63 = vpop.f32.mrb[20].mxu0 }
 0x327   : > { %v11607_v28 = vpop.f32.mrb[21].mxu0  ;;  %v3986_v11 = vmul.f32 %v11605_v63, %v11605_v63 }
 0x328   : > { %v3984_v23 = vmul.f32 %v11607_v28, %v11607_v28  ;;  %4066 = vrot.lane.b32.xlu1 %v3983_v5, %s10374_s28  ;;  %v11612_v30 = vpop.f32.mrb[22].mxu0 }
 0x329   : > { %v11614_v18 = vpop.f32.mrb[23].mxu0  ;;  %v3987_v16 = vmul.f32 %v11612_v30, %v11612_v30 }
 0x32a   : > { %v3985_v52 = vmul.f32 %v11614_v18, %v11614_v18  ;;  %4068 = vrot.lane.b32.xlu0 %v3984_v23, %s10374_s28 }
 0x32c   : > { %4070 = vrot.lane.b32.xlu1 %v3985_v52, %s10374_s28 }
 0x32e   : > { %4072 = vrot.lane.b32.xlu0 %v3986_v11, %s10374_s28  ;;  %v11625_v37 = vpop.f32.mrb[24].mxu0 }
 0x32f   : > { %v11627_v51 = vpop.f32.mrb[25].mxu0  ;;  %v3990_v44 = vmul.f32 %v11625_v37, %v11625_v37 }
 0x330   : > { %v3988_v20 = vmul.f32 %v11627_v51, %v11627_v51  ;;  %4074 = vrot.lane.b32.xlu1 %v3987_v16, %s10374_s28  ;;  %v11632_v22 = vpop.f32.mrb[26].mxu0 }
 0x331   : > { %v11634_v29 = vpop.f32.mrb[27].mxu0  ;;  %v3991_v1 = vmul.f32 %v11632_v22, %v11632_v22 }
 0x332   : > { %v3989_v53 = vmul.f32 %v11634_v29, %v11634_v29  ;;  %4076 = vrot.lane.b32.xlu0 %v3988_v20, %s10374_s28 }
 0x334   : > { %4078 = vrot.lane.b32.xlu1 %v3989_v53, %s10374_s28 }
 0x336   : > { %4080 = vrot.lane.b32.xlu0 %v3990_v44, %s10374_s28  ;;  %v11645_v60 = vpop.f32.mrb[28].mxu0 }
 0x337   : > { %v11647_v42 = vpop.f32.mrb[29].mxu0  ;;  %v3994_v19 = vmul.f32 %v11645_v60, %v11645_v60 }
 0x338   : > { %v3992_v34 = vmul.f32 %v11647_v42, %v11647_v42  ;;  %4082 = vrot.lane.b32.xlu1 %v3991_v1, %s10374_s28  ;;  %v11652_v31 = vpop.f32.mrb[30].mxu0 }
 0x339   : > { %v11654_v15 = vpop.f32.mrb[31].mxu0  ;;  %v3995_v48 = vmul.f32 %v11652_v31, %v11652_v31 }
 0x33a   : > { %v3993_v40 = vmul.f32 %v11654_v15, %v11654_v15  ;;  %4084 = vrot.lane.b32.xlu0 %v3992_v34, %s10374_s28 }
 0x33c   : > { %4086 = vrot.lane.b32.xlu1 %v3993_v40, %s10374_s28 }
 0x33e   : > { %4088 = vrot.lane.b32.xlu0 %v3994_v19, %s10374_s28 }
 0x340   : > { %4090 = vrot.lane.b32.xlu1 %v3995_v48, %s10374_s28 }
 0x373   : > { %v4033_v9 = vpop.permute.xlu1 %4032 }
 0x374   : > { %v4029_v25 = vpop.permute.xlu0 %4028  ;;  %v4126_v55 = vsel %vm13359_vm4, %v11506_v59, %v4033_v9 }
 0x375   : > { %v4124_v13 = vsel %vm13359_vm4, %v11508_v41, %v4029_v25  ;;  %v4160_v36 = vsel %vm4156_vm5, %v4126_v55, 0.0 }
 0x376   : > { %v4157_v8 = vsel %vm4156_vm5, %v4124_v13, 0.0 }
 0x377   : > { %v4035_v43 = vpop.permute.xlu1 %4034 }
 0x378   : > { %v4031_v39 = vpop.permute.xlu0 %4030  ;;  %v4127_v46 = vsel %vm13359_vm4, %v11512_v54, %v4035_v43 }
 0x379   : > { %v4125_v57 = vsel %vm13359_vm4, %v11517_v21, %v4031_v39  ;;  %v4162_v62 = vsel %vm4156_vm5, %v4127_v46, 0.0 }
 0x37a   : > { %v4158_v26 = vsel %vm4156_vm5, %v4125_v57, 0.0 }
 0x37b   : > { %v4159_v3 = vadd.f32 %v4158_v26, %v4157_v8 }
 0x37c   : > { %v4037_v38 = vpop.permute.xlu0 %4036 }
 0x37d   : > { %v4161_v7 = vadd.f32 %v4160_v36, %v4159_v3  ;;  %v4128_v27 = vsel %vm13359_vm4, %v11528_v45, %v4037_v38 }
 0x37e   : > { %v4039_v24 = vpop.permute.xlu1 %4038  ;;  %v4164_v5 = vsel %vm4156_vm5, %v4128_v27, 0.0 }
 0x37f   : > { %v4163_v33 = vadd.f32 %v4162_v62, %v4161_v7  ;;  %v4129_v12 = vsel %vm13359_vm4, %v11534_v35, %v4039_v24 }
 0x380   : > { %v4041_v23 = vpop.permute.xlu0 %4040  ;;  %v4166_v16 = vsel %vm4156_vm5, %v4129_v12, 0.0 }
 0x381   : > { %v4165_v52 = vadd.f32 %v4164_v5, %v4163_v33  ;;  %v4130_v11 = vsel %vm13359_vm4, %v11526_v14, %v4041_v23 }
 0x382   : > { %v4043_v20 = vpop.permute.xlu1 %4042  ;;  %v4168_v1 = vsel %vm4156_vm5, %v4130_v11, 0.0 }
 0x383   : > { %v4167_v53 = vadd.f32 %v4166_v16, %v4165_v52  ;;  %v4131_v44 = vsel %vm13359_vm4, %v11532_v47, %v4043_v20 }
 0x384   : > { %v4045_v34 = vpop.permute.xlu0 %4044  ;;  %v4170_v48 = vsel %vm4156_vm5, %v4131_v44, 0.0 }
 0x385   : > { %v4169_v40 = vadd.f32 %v4168_v1, %v4167_v53  ;;  %v4132_v19 = vsel %vm13359_vm4, %v11547_v2, %v4045_v34 }
 0x386   : > { %v4047_v9 = vpop.permute.xlu1 %4046  ;;  %v4172_v43 = vsel %vm4156_vm5, %v4132_v19, 0.0 }
 0x387   : > { %v4171_v25 = vadd.f32 %v4170_v48, %v4169_v40  ;;  %v4133_v13 = vsel %vm13359_vm4, %v11554_v6, %v4047_v9 }
 0x388   : > { %v4049_v39 = vpop.permute.xlu0 %4048  ;;  %v4174_v8 = vsel %vm4156_vm5, %v4133_v13, 0.0 }
 0x389   : > { %v4173_v55 = vadd.f32 %v4172_v43, %v4171_v25  ;;  %v4134_v57 = vsel %vm13359_vm4, %v11545_v10, %v4049_v39 }
 0x38a   : > { %v4051_v26 = vpop.permute.xlu1 %4050  ;;  %v4176_v36 = vsel %vm4156_vm5, %v4134_v57, 0.0 }
 0x38b   : > { %v4175_v46 = vadd.f32 %v4174_v8, %v4173_v55  ;;  %v4135_v3 = vsel %vm13359_vm4, %v11552_v0, %v4051_v26 }
 0x38c   : > { %v4053_v38 = vpop.permute.xlu0 %4052  ;;  %v4178_v62 = vsel %vm4156_vm5, %v4135_v3, 0.0 }
 0x38d   : > { %v4177_v7 = vadd.f32 %v4176_v36, %v4175_v46  ;;  %v4136_v27 = vsel %vm13359_vm4, %v11567_v49, %v4053_v38 }
 0x38e   : > { %v4055_v24 = vpop.permute.xlu1 %4054  ;;  %v4180_v5 = vsel %vm4156_vm5, %v4136_v27, 0.0 }
 0x38f   : > { %v4179_v33 = vadd.f32 %v4178_v62, %v4177_v7  ;;  %v4137_v12 = vsel %vm13359_vm4, %v11574_v4, %v4055_v24 }
 0x390   : > { %v4057_v23 = vpop.permute.xlu0 %4056  ;;  %v4182_v16 = vsel %vm4156_vm5, %v4137_v12, 0.0 }
 0x391   : > { %v4181_v52 = vadd.f32 %v4180_v5, %v4179_v33  ;;  %v4138_v11 = vsel %vm13359_vm4, %v11565_v17, %v4057_v23 }
 0x392   : > { %v4059_v20 = vpop.permute.xlu1 %4058  ;;  %v4184_v1 = vsel %vm4156_vm5, %v4138_v11, 0.0 }
 0x393   : > { %v4183_v53 = vadd.f32 %v4182_v16, %v4181_v52  ;;  %v4139_v44 = vsel %vm13359_vm4, %v11572_v61, %v4059_v20 }
 0x394   : > { %v4061_v34 = vpop.permute.xlu0 %4060  ;;  %v4186_v48 = vsel %vm4156_vm5, %v4139_v44, 0.0 }
 0x395   : > { %v4185_v40 = vadd.f32 %v4184_v1, %v4183_v53  ;;  %v4140_v19 = vsel %vm13359_vm4, %v11587_v58, %v4061_v34 }
 0x396   : > { %v4063_v9 = vpop.permute.xlu1 %4062  ;;  %v4188_v43 = vsel %vm4156_vm5, %v4140_v19, 0.0 }
 0x397   : > { %v4187_v25 = vadd.f32 %v4186_v48, %v4185_v40  ;;  %v4141_v13 = vsel %vm13359_vm4, %v11594_v56, %v4063_v9 }
 0x398   : > { %v4065_v39 = vpop.permute.xlu0 %4064  ;;  %v4190_v8 = vsel %vm4156_vm5, %v4141_v13, 0.0 }
 0x399   : > { %v4189_v55 = vadd.f32 %v4188_v43, %v4187_v25  ;;  %v4142_v57 = vsel %vm13359_vm4, %v11585_v50, %v4065_v39 }
 0x39a   : > { %v4067_v26 = vpop.permute.xlu1 %4066  ;;  %v4192_v36 = vsel %vm4156_vm5, %v4142_v57, 0.0 }
 0x39b   : > { %v4191_v46 = vadd.f32 %v4190_v8, %v4189_v55  ;;  %v4143_v3 = vsel %vm13359_vm4, %v11592_v32, %v4067_v26 }
 0x39c   : > { %v4069_v38 = vpop.permute.xlu0 %4068  ;;  %v4194_v62 = vsel %vm4156_vm5, %v4143_v3, 0.0 }
 0x39d   : > { %v4193_v7 = vadd.f32 %v4192_v36, %v4191_v46  ;;  %v4144_v27 = vsel %vm13359_vm4, %v11607_v28, %v4069_v38 }
 0x39e   : > { %v4071_v24 = vpop.permute.xlu1 %4070  ;;  %v4196_v5 = vsel %vm4156_vm5, %v4144_v27, 0.0 }
 0x39f   : > { %v4195_v33 = vadd.f32 %v4194_v62, %v4193_v7  ;;  %v4145_v12 = vsel %vm13359_vm4, %v11614_v18, %v4071_v24 }
 0x3a0   : > { %v4073_v23 = vpop.permute.xlu0 %4072  ;;  %v4198_v16 = vsel %vm4156_vm5, %v4145_v12, 0.0 }
 0x3a1   : > { %v4197_v52 = vadd.f32 %v4196_v5, %v4195_v33  ;;  %v4146_v11 = vsel %vm13359_vm4, %v11605_v63, %v4073_v23 }
 0x3a2   : > { %v4075_v20 = vpop.permute.xlu1 %4074  ;;  %v4200_v1 = vsel %vm4156_vm5, %v4146_v11, 0.0 }
 0x3a3   : > { %v4199_v53 = vadd.f32 %v4198_v16, %v4197_v52  ;;  %v4147_v44 = vsel %vm13359_vm4, %v11612_v30, %v4075_v20 }
 0x3a4   : > { %v4077_v34 = vpop.permute.xlu0 %4076  ;;  %v4202_v48 = vsel %vm4156_vm5, %v4147_v44, 0.0 }
 0x3a5   : > { %v4201_v40 = vadd.f32 %v4200_v1, %v4199_v53  ;;  %v4148_v19 = vsel %vm13359_vm4, %v11627_v51, %v4077_v34 }
 0x3a6   : > { %v4079_v9 = vpop.permute.xlu1 %4078  ;;  %v4204_v43 = vsel %vm4156_vm5, %v4148_v19, 0.0 }
 0x3a7   : > { %v4203_v25 = vadd.f32 %v4202_v48, %v4201_v40  ;;  %v4149_v13 = vsel %vm13359_vm4, %v11634_v29, %v4079_v9 }
 0x3a8   : > { %v4081_v39 = vpop.permute.xlu0 %4080  ;;  %v4206_v8 = vsel %vm4156_vm5, %v4149_v13, 0.0 }
 0x3a9   : > { %v4205_v55 = vadd.f32 %v4204_v43, %v4203_v25  ;;  %v4150_v57 = vsel %vm13359_vm4, %v11625_v37, %v4081_v39 }
 0x3aa   : > { %v4083_v26 = vpop.permute.xlu1 %4082  ;;  %v4208_v36 = vsel %vm4156_vm5, %v4150_v57, 0.0 }
 0x3ab   : > { %v4207_v46 = vadd.f32 %v4206_v8, %v4205_v55  ;;  %v4151_v3 = vsel %vm13359_vm4, %v11632_v22, %v4083_v26 }
 0x3ac   : > { %v4085_v38 = vpop.permute.xlu0 %4084  ;;  %v4210_v62 = vsel %vm4156_vm5, %v4151_v3, 0.0 }
 0x3ad   : > { %v4209_v7 = vadd.f32 %v4208_v36, %v4207_v46  ;;  %v4152_v27 = vsel %vm13359_vm4, %v11647_v42, %v4085_v38  ;;  %v10375_v36 = vmov 1966171168  }
 0x3ae   : > { %v4087_v24 = vpop.permute.xlu1 %4086  ;;  %v4212_v5 = vsel %vm4156_vm5, %v4152_v27, 0.0  ;;  %v4238_v38 = vunpack.c.l.s4 %v10375_v36 }
 0x3af   : > { %v4211_v33 = vadd.f32 %v4210_v62, %v4209_v7  ;;  %v4153_v12 = vsel %vm13359_vm4, %v11654_v15, %v4087_v24  ;;  %v4240_v7 = vlaneseq }
 0x3b0   : > { %v4089_v23 = vpop.permute.xlu0 %4088  ;;  %v4214_v16 = vsel %vm4156_vm5, %v4153_v12, 0.0  ;;  %v4239_v27 = vunpack.c.0.s8 %v4238_v38 }
 0x3b1   : > { %v4213_v52 = vadd.f32 %v4212_v5, %v4211_v33  ;;  %v4154_v11 = vsel %vm13359_vm4, %v11645_v60, %v4089_v23  ;;  %v4241_v62 = vshrl.u32 %v4240_v7, 7  ;;  %v10351_v23 = vld [vmem:[%s13328_s4 + $0x8] sm:$0xff]  }
 0x3b2   : > { %v4091_v20 = vpop.permute.xlu1 %4090  ;;  %v4216_v1 = vsel %vm4156_vm5, %v4154_v11, 0.0  ;;  %v11775_v11 = vld [vmem:[%s13328_s4] sm:$0xff]   ;;  %9494 = vmatprep.subr.bf16.mxu1 %v10351_v23 }
 0x3b3   : > { %v4215_v53 = vadd.f32 %v4214_v16, %v4213_v52  ;;  %v4155_v44 = vsel %vm13359_vm4, %v11652_v31, %v4091_v20  ;;  %v11763_v24 = vsub.s32 %v4239_v27, %v4241_v62  ;;  %v11770_v52 = vld [vmem:[#allocation3 + $0x8] sm:$0xff]  ;;  %9495 = vmatpush3.bf16.msra.mxu1 %v10351_v23  ;;  %v3962_v16 = vld [vmem:[%s13326_s2] sm:$0x1] }
 0x3b4   : > { %v4218_v40 = vsel %vm4156_vm5, %v4155_v44, 0.0  ;;  %9496 = vmatprep.mubr.msk.bf16.mxu1 %vm13359_vm4, %v11770_v52  ;;  %9528 = vmatprep.subr.bf16.mxu1 %v11775_v11  ;;  %v11783_v44 = vsub.s32 0, %v4241_v62 }
 0x3b5   : > { %v4217_v34 = vadd.f32 %v4216_v1, %v4215_v53 }
 0x3b6   : > { %13414 = vst [vmem:[#allocation4_spill] sm:$0xff] %v11783_v44 }
 0x3b7   : > { %v4219_v19 = vadd.f32 %v4218_v40, %v4217_v34  ;;  %v3963_v34 = vld [vmem:[%s13327_s3] sm:$0x1] }
 0x3b9   : > { %v4220_v48 = vrot.slane %v4219_v19, 4 }
 0x3bb   : > { %v4221_v9 = vadd.f32 %v4220_v48, %v4219_v19 }
 0x3bd   : > { %v4222_v25 = vrot.slane %v4221_v9, 2 }
 0x3bf   : > { %v4223_v13 = vadd.f32 %v4222_v25, %v4221_v9 }
 0x3c1   : > { %v4224_v43 = vrot.slane %v4223_v13, 1 }
 0x3c3   : > { %v4225_v39 = vadd.f32 %v4224_v43, %v4223_v13 }
 0x3c5   : > { %v4226_v55 = vmul.f32 0.00390625, %v4225_v39 }
 0x3c7   : > { %v4227_v57 = vmul.f32 %v4226_v55, %v4226_v55 }
 0x3c9   : > { %4229 = vrot.lane.b32.xlu0 %v4227_v57, %s10374_s28 }
 0x43b   : > { %v4230_v8 = vpop.permute.xlu0 %4229 }
 0x43c   : > { %v4232_v26 = vsub.f32 %v4226_v55, %v4230_v8 }
 0x43e   : > { %v4233_v46 = vmax.f32 %v4232_v26, 0.0 }
 0x440   : > { %v4234_v3 = vadd.f32 1e-05, %v4233_v46 }
 0x442   : > { %10360 = vrsqrt.f32 %v4234_v3 }
 0x44c   : > { %v10361_v33 = vpop.eup %10360 }
 0x44d   : > { %v4243_v12 = vrot.slane %v10361_v33, %v11763_v24 }
 0x44f   : > { %v4250_v5 = vrot.slane %v4243_v12, %v11763_v24 }
 0x451   : > { %4251 = vrot.lane.b32.xlu1 %v4250_v5, %s10376_s29 }
 0x4c3   : > { %v4252_v20 = vpop.permute.xlu1 %4251 }
 0x4c4   : > { %v4254_v53 = vmul.f32 %v4252_v20, %v3962_v16 }
 0x4c6   : > { %v4255_v1 = vmul.f32 %v4254_v53, %v4226_v55  ;;  %v4261_v40 = vrot.slane %v4254_v53, %v11783_v44 }
 0x4c8   : > { %v4256_v19 = vsub.f32 %v3963_v34, %v4255_v1  ;;  %v4263_v48 = vmul.f32 %v4261_v40, %v11508_v41  ;;  %v4264_v9 = vmul.f32 %v4261_v40, %v11517_v21  ;;  %v4265_v25 = vmul.f32 %v11506_v59, %v4261_v40 }
 0x4c9   : > { %v4266_v13 = vmul.f32 %v11512_v54, %v4261_v40  ;;  %v4267_v43 = vmul.f32 %v4261_v40, %v11528_v45  ;;  %v4268_v55 = vmul.f32 %v4261_v40, %v11534_v35  ;;  %v4269_v57 = vmul.f32 %v11526_v14, %v4261_v40 }
 0x4ca   : > { %v11795_v39 = vrot.slane %v4256_v19, %v11783_v44  ;;  %v4270_v8 = vmul.f32 %v11532_v47, %v4261_v40  ;;  %v4271_v26 = vmul.f32 %v4261_v40, %v11547_v2  ;;  %v4272_v41 = vmul.f32 %v4261_v40, %v11554_v6 }
 0x4cb   : > { %v4273_v21 = vmul.f32 %v11545_v10, %v4261_v40  ;;  %v4274_v59 = vmul.f32 %v11552_v0, %v4261_v40  ;;  %v4275_v54 = vmul.f32 %v4261_v40, %v11567_v49  ;;  %v4276_v45 = vmul.f32 %v4261_v40, %v11574_v4 }
 0x4cc   : > { %v4277_v46 = vmul.f32 %v11565_v17, %v4261_v40  ;;  %v4278_v35 = vmul.f32 %v11572_v61, %v4261_v40  ;;  %v4279_v14 = vmul.f32 %v4261_v40, %v11587_v58  ;;  %v4280_v47 = vmul.f32 %v4261_v40, %v11594_v56 }
 0x4cd   : > { %v4281_v2 = vmul.f32 %v11585_v50, %v4261_v40  ;;  %v4282_v6 = vmul.f32 %v11592_v32, %v4261_v40  ;;  %v4283_v10 = vmul.f32 %v4261_v40, %v11607_v28  ;;  %v4284_v0 = vmul.f32 %v4261_v40, %v11614_v18 }
 0x4ce   : > { %v4285_v49 = vmul.f32 %v11605_v63, %v4261_v40  ;;  %v4286_v4 = vmul.f32 %v11612_v30, %v4261_v40  ;;  %v4287_v17 = vmul.f32 %v4261_v40, %v11627_v51  ;;  %v4288_v61 = vmul.f32 %v4261_v40, %v11634_v29 }
 0x4cf   : > { %v4289_v58 = vmul.f32 %v11625_v37, %v4261_v40  ;;  %v4290_v56 = vmul.f32 %v11632_v22, %v4261_v40  ;;  %v4291_v50 = vmul.f32 %v4261_v40, %v11647_v42  ;;  %v4292_v32 = vmul.f32 %v4261_v40, %v11654_v15 }
 0x4d0   : > { %v4293_v28 = vmul.f32 %v11645_v60, %v4261_v40  ;;  %v4294_v18 = vmul.f32 %v11652_v31, %v4261_v40  ;;  %v4301_v63 = vadd.f32 %v11795_v39, %v4263_v48  ;;  %v11826_v30 = vadd.f32 %v11795_v39, %v4264_v9 }
 0x4d1   : > { %v11829_v51 = vadd.f32 %v11795_v39, %v4265_v25  ;;  %v11832_v37 = vadd.f32 %v11795_v39, %v4266_v13  ;;  %v11835_v22 = vadd.f32 %v11795_v39, %v4267_v43  ;;  %v11838_v29 = vadd.f32 %v11795_v39, %v4268_v55 }
 0x4d2   : > { %v11841_v60 = vadd.f32 %v11795_v39, %v4269_v57  ;;  %v11844_v42 = vadd.f32 %v11795_v39, %v4270_v8  ;;  %v11847_v31 = vadd.f32 %v11795_v39, %v4271_v26  ;;  %v11850_v15 = vadd.f32 %v11795_v39, %v4272_v41 }
 0x4d3   : > { %v11853_v3 = vadd.f32 %v11795_v39, %v4273_v21  ;;  %v11856_v36 = vadd.f32 %v11795_v39, %v4274_v59  ;;  %v11859_v38 = vadd.f32 %v11795_v39, %v4275_v54  ;;  %v11862_v7 = vadd.f32 %v11795_v39, %v4276_v45 }
 0x4d4   : > { %v11865_v27 = vadd.f32 %v11795_v39, %v4277_v46  ;;  %v11868_v62 = vadd.f32 %v11795_v39, %v4278_v35  ;;  %v11871_v33 = vadd.f32 %v11795_v39, %v4279_v14  ;;  %v11874_v12 = vadd.f32 %v11795_v39, %v4280_v47 }
 0x4d5   : > { %v11877_v5 = vadd.f32 %v11795_v39, %v4281_v2  ;;  %v11880_v23 = vadd.f32 %v11795_v39, %v4282_v6  ;;  %v11883_v16 = vadd.f32 %v11795_v39, %v4283_v10  ;;  %v11886_v20 = vadd.f32 %v11795_v39, %v4284_v0 }
 0x4d6   : > { %v11889_v53 = vadd.f32 %v11795_v39, %v4285_v49  ;;  %v11892_v1 = vadd.f32 %v11795_v39, %v4286_v4  ;;  %v11895_v34 = vadd.f32 %v11795_v39, %v4287_v17  ;;  %v11898_v40 = vadd.f32 %v11795_v39, %v4288_v61 }
 0x4d7   : > { %v11901_v19 = vadd.f32 %v11795_v39, %v4289_v58  ;;  %v11904_v48 = vadd.f32 %v11795_v39, %v4290_v56  ;;  %v11907_v9 = vadd.f32 %v11795_v39, %v4291_v50  ;;  %v11910_v25 = vadd.f32 %v11795_v39, %v4292_v32 }
 0x4d8   : > { %v11913_v13 = vadd.f32 %v11795_v39, %v4293_v28  ;;  %vm4333_vm6 = vcmp.ge.f32.partialorder %v4301_v63, 0.0  ;;  %vm4334_vm7 = vcmp.ge.f32.partialorder %v11826_v30, 0.0  ;;  %vm4335_vm8 = vcmp.ge.f32.partialorder %v11829_v51, 0.0 }
 0x4d9   : > { %vm4336_vm9 = vcmp.ge.f32.partialorder %v11832_v37, 0.0  ;;  %vm4337_vm10 = vcmp.ge.f32.partialorder %v11835_v22, 0.0  ;;  %vm4338_vm11 = vcmp.ge.f32.partialorder %v11838_v29, 0.0  ;;  %vm4339_vm12 = vcmp.ge.f32.partialorder %v11841_v60, 0.0 }
 0x4da   : > { %vm4340_vm13 = vcmp.ge.f32.partialorder %v11844_v42, 0.0  ;;  %vm4341_vm14 = vcmp.ge.f32.partialorder %v11847_v31, 0.0  ;;  %v4365_v43 = vmul.f32 0.01, %v4301_v63  ;;  %v4366_v55 = vmul.f32 0.01, %v11826_v30 }
 0x4db   : > { %v11929_v57 = vadd.f32 %v11795_v39, %v4294_v18  ;;  %vm4347_vm2 = vcmp.ge.f32.partialorder %v11865_v27, 0.0  ;;  %v4367_v8 = vmul.f32 0.01, %v11829_v51  ;;  %v4368_v26 = vmul.f32 0.01, %v11832_v37 }
 0x4dc   : > { %v4369_v41 = vmul.f32 0.01, %v11835_v22  ;;  %vm4352_vm0 = vcmp.ge.f32.partialorder %v11880_v23, 0.0  ;;  %vm4353_vm3 = vcmp.ge.f32.partialorder %v11883_v16, 0.0  ;;  %v4370_v39 = vmul.f32 0.01, %v11838_v29 }
 0x4dd   : > { %v4371_v21 = vmul.f32 0.01, %v11841_v60  ;;  %v4372_v59 = vmul.f32 0.01, %v11844_v42  ;;  %v11946_v54 = vsel %vm4333_vm6, %v4301_v63, %v4365_v43  ;;  %vm4357_vm1 = vcmp.ge.f32.partialorder %v11895_v34, 0.0 }
 0x4de   : > { %v4373_v45 = vmul.f32 0.01, %v11847_v31  ;;  %v4374_v46 = vmul.f32 0.01, %v11850_v15  ;;  %v4375_v35 = vmul.f32 0.01, %v11853_v3  ;;  %v11958_v14 = vsel %vm4334_vm7, %v11826_v30, %v4366_v55 }
 0x4df   : > { %vm4360_vm4 = vcmp.ge.f32.partialorder %v11904_v48, 0.0  ;;  %vm4361_vm5 = vcmp.ge.f32.partialorder %v11907_v9, 0.0  ;;  %v4376_v47 = vmul.f32 0.01, %v11856_v36  ;;  %v4377_v2 = vmul.f32 0.01, %v11859_v38 }
 0x4e0   : > { %v4378_v6 = vmul.f32 0.01, %v11862_v7  ;;  %v11970_v10 = vsel %vm4335_vm8, %v11829_v51, %v4367_v8  ;;  %vm4362_vm7 = vcmp.ge.f32.partialorder %v11910_v25, 0.0  ;;  %vm4363_vm6 = vcmp.ge.f32.partialorder %v11913_v13, 0.0 }
 0x4e1   : > { %vm4364_vm15 = vcmp.ge.f32.partialorder %v11929_v57, 0.0  ;;  %v4379_v0 = vmul.f32 0.01, %v11865_v27  ;;  %v4380_v49 = vmul.f32 0.01, %v11868_v62  ;;  %v4400_v17 = vsel %vm4336_vm9, %v11832_v37, %v4368_v26 }
 0x4e2   : > { %v4381_v4 = vmul.f32 0.01, %v11871_v33  ;;  %v4382_v61 = vmul.f32 0.01, %v11874_v12  ;;  %v4383_v58 = vmul.f32 0.01, %v11877_v5  ;;  %v4401_v50 = vsel %vm4337_vm10, %v11835_v22, %v4369_v41 }
 0x4e3   : > { %v4384_v56 = vmul.f32 0.01, %v11880_v23  ;;  %v4385_v32 = vmul.f32 0.01, %v11883_v16  ;;  %v4386_v28 = vmul.f32 0.01, %v11886_v20  ;;  %v4402_v63 = vsel %vm4338_vm11, %v11838_v29, %v4370_v39 }
 0x4e4   : > { %v4387_v18 = vmul.f32 0.01, %v11889_v53  ;;  %v4388_v30 = vmul.f32 0.01, %v11892_v1  ;;  %v4389_v51 = vmul.f32 0.01, %v11895_v34  ;;  %v4403_v22 = vsel %vm4339_vm12, %v11841_v60, %v4371_v21 }
 0x4e5   : > { %v4390_v37 = vmul.f32 0.01, %v11898_v40  ;;  %v4391_v43 = vmul.f32 0.01, %v11901_v19  ;;  %v4392_v55 = vmul.f32 0.01, %v11904_v48  ;;  %v4404_v29 = vsel %vm4340_vm13, %v11844_v42, %v4372_v59 }
 0x4e6   : > { %v4393_v8 = vmul.f32 0.01, %v11907_v9  ;;  %v4394_v26 = vmul.f32 0.01, %v11910_v25  ;;  %v4395_v41 = vmul.f32 0.01, %v11913_v13  ;;  %v4405_v60 = vsel %vm4341_vm14, %v11847_v31, %v4373_v45 }
 0x4e7   : > { %v4396_v39 = vmul.f32 0.01, %v11929_v57  ;;  %vm13415_vm8 = vcmp.ge.f32.partialorder %v11850_v15, 0.0  ;;  %vm13416_vm9 = vcmp.ge.f32.partialorder %v11853_v3, 0.0  ;;  %vm13417_vm10 = vcmp.ge.f32.partialorder %v11856_v36, 0.0 }
 0x4e8   : > { %v4406_v21 = vsel %vm13415_vm8, %v11850_v15, %v4374_v46  ;;  %v4407_v44 = vsel %vm13416_vm9, %v11853_v3, %v4375_v35  ;;  %v4408_v42 = vsel %vm13417_vm10, %v11856_v36, %v4376_v47  ;;  %vm13418_vm11 = vcmp.ge.f32.partialorder %v11859_v38, 0.0 }
 0x4e9   : > { %v4409_v59 = vsel %vm13418_vm11, %v11859_v38, %v4377_v2  ;;  %vm13419_vm12 = vcmp.ge.f32.partialorder %v11862_v7, 0.0  ;;  %v4411_v15 = vsel %vm4347_vm2, %v11865_v27, %v4379_v0  ;;  %vm13420_vm13 = vcmp.ge.f32.partialorder %v11868_v62, 0.0 }
 0x4ea   : > { %v4410_v31 = vsel %vm13419_vm12, %v11862_v7, %v4378_v6  ;;  %v4412_v3 = vsel %vm13420_vm13, %v11868_v62, %v4380_v49  ;;  %vm13421_vm14 = vcmp.ge.f32.partialorder %v11871_v33, 0.0  ;;  %vm13422_vm8 = vcmp.ge.f32.partialorder %v11874_v12, 0.0 }
 0x4eb   : > { %v4413_v36 = vsel %vm13421_vm14, %v11871_v33, %v4381_v4  ;;  %v4414_v38 = vsel %vm13422_vm8, %v11874_v12, %v4382_v61  ;;  %vm13423_vm9 = vcmp.ge.f32.partialorder %v11877_v5, 0.0  ;;  %v4416_v27 = vsel %vm4352_vm0, %v11880_v23, %v4384_v56 }
 0x4ec   : > { %v4415_v7 = vsel %vm13423_vm9, %v11877_v5, %v4383_v58  ;;  %v4417_v62 = vsel %vm4353_vm3, %v11883_v16, %v4385_v32  ;;  %vm13424_vm2 = vcmp.ge.f32.partialorder %v11886_v20, 0.0  ;;  %vm13425_vm10 = vcmp.ge.f32.partialorder %v11889_v53, 0.0 }
 0x4ed   : > { %v4418_v33 = vsel %vm13424_vm2, %v11886_v20, %v4386_v28  ;;  %v4419_v12 = vsel %vm13425_vm10, %v11889_v53, %v4387_v18  ;;  %vm13426_vm11 = vcmp.ge.f32.partialorder %v11892_v1, 0.0  ;;  %v4421_v23 = vsel %vm4357_vm1, %v11895_v34, %v4389_v51 }
 0x4ee   : > { %v4420_v5 = vsel %vm13426_vm11, %v11892_v1, %v4388_v30  ;;  %vm13427_vm0 = vcmp.ge.f32.partialorder %v11898_v40, 0.0  ;;  %vm13428_vm3 = vcmp.ge.f32.partialorder %v11901_v19, 0.0  ;;  %v4424_v53 = vsel %vm4360_vm4, %v11904_v48, %v4392_v55 }
 0x4ef   : > { %v4422_v16 = vsel %vm13427_vm0, %v11898_v40, %v4390_v37  ;;  %v4423_v20 = vsel %vm13428_vm3, %v11901_v19, %v4391_v43  ;;  %v4425_v1 = vsel %vm4361_vm5, %v11907_v9, %v4393_v8  ;;  %v4426_v34 = vsel %vm4362_vm7, %v11910_v25, %v4394_v26  ;;  %v4462_v37 = vld [vmem:[#allocation3] sm:$0x80] }
 0x4f0   : > { %v4427_v40 = vsel %vm4363_vm6, %v11913_v13, %v4395_v41  ;;  %v4428_v19 = vsel %vm4364_vm15, %v11929_v57, %v4396_v39  ;;  %v4429_v45 = vpack.c.bf16 %v11958_v14, %v11946_v54  ;;  %v4430_v48 = vpack.c.bf16 %v4400_v17, %v11970_v10  ;;  %v12102_v14 = vld [vmem:[%s13328_s4 + $0x10] sm:$0xff]  }
 0x4f1   : > { %v4431_v46 = vpack.c.bf16 %v4402_v63, %v4401_v50  ;;  %v4432_v35 = vpack.c.bf16 %v4404_v29, %v4403_v22  ;;  %v4433_v9 = vpack.c.bf16 %v4406_v21, %v4405_v60  ;;  %v4434_v47 = vpack.c.bf16 %v4408_v42, %v4407_v44 }
 0x4f2   : > { %v4435_v2 = vpack.c.bf16 %v4410_v31, %v4409_v59  ;;  %v4436_v6 = vpack.c.bf16 %v4412_v3, %v4411_v15  ;;  %v4437_v25 = vpack.c.bf16 %v4414_v38, %v4413_v36  ;;  %vm13429_vm4 = vcmask 130048   ;;  %v4464_v15 = vld [vmem:[#allocation3 + $0x18] sm:$0x80]  ;;  %v4466_v3 = vld [vmem:[#allocation3 + $0x30] sm:$0x80] }
 0x4f3   : > { %4446 = vst.msk [vmem:[#allocation3 + $0x20] sm:$0xff] %vm13429_vm4, %v4429_v45  ;;  %v4438_v0 = vpack.c.bf16 %v4416_v27, %v4415_v7  ;;  %v4439_v13 = vpack.c.bf16 %v4418_v33, %v4417_v62  ;;  %v4440_v49 = vpack.c.bf16 %v4420_v5, %v4419_v12  ;;  %v4441_v4 = vpack.c.bf16 %v4422_v16, %v4421_v23  ;;  %vm13430_vm1 = vmmov %vm13429_vm4  ;;  %v4470_v45 = vld [vmem:[#allocation3 + $0x60] sm:$0x80] }
 0x4f4   : > { %4447 = vst.msk [vmem:[#allocation3 + $0x38] sm:$0xff] %vm13430_vm1, %v4430_v48  ;;  %vm13431_vm15 = vmmov %vm13430_vm1  ;;  %v4442_v57 = vpack.c.bf16 %v4424_v53, %v4423_v20  ;;  %v4443_v54 = vpack.c.bf16 %v4426_v34, %v4425_v1  ;;  %v4444_v44 = vpack.c.bf16 %v4428_v19, %v4427_v40  ;;  %v4499_v51 = vshrl.u32 %v11770_v52, 16  ;;  %v4468_v19 = vld [vmem:[#allocation3 + $0x48] sm:$0x80] }
 0x4f5   : > { %4448 = vst.msk [vmem:[#allocation3 + $0x50] sm:$0xff] %vm13431_vm15, %v4431_v46  ;;  %vm13432_vm5 = vmmov %vm13430_vm1  ;;  %v4502_v55 = vshll.u32 %v11770_v52, 16  ;;  %v4495_v8 = vshrl.u32 %v4462_v37, 16  ;;  %v4507_v62 = vshrl.u32 %v4464_v15, 16  ;;  %v4519_v12 = vshrl.u32 %v4466_v3, 16  ;;  %v12205_v48 = vld [vmem:[%s13328_s4 + $0x18] sm:$0xff]  }
 0x4f6   : > { %4449 = vst.msk [vmem:[#allocation3 + $0x68] sm:$0xff] %vm13432_vm5, %v4432_v35  ;;  %vm13433_vm6 = vmmov %vm13430_vm1  ;;  %v4501_v43 = vrot.slane %v4499_v51, 7  ;;  %v4474_v37 = vld [vmem:[#allocation3 + $0x90] sm:$0x80] }
 0x4f7   : > { %4450 = vst.msk [vmem:[#allocation3 + $0x80] sm:$0xff] %vm13433_vm6, %v4433_v9  ;;  %vm13434_vm7 = vmmov %vm13430_vm1  ;;  %v4497_v60 = vrot.slane %v4495_v8, 7  ;;  %v4509_v53 = vrot.slane %v4507_v62, 7  ;;  %v4521_v40 = vrot.slane %v4519_v12, 7  ;;  %v4531_v9 = vshrl.u32 %v4468_v19, 16 }
 0x4f8   : > { %4451 = vst.msk [vmem:[#allocation3 + $0x98] sm:$0xff] %vm13434_vm7, %v4434_v47  ;;  %vm13435_vm12 = vmmov %vm13430_vm1  ;;  %v4504_v39 = vor.u32 %v4502_v55, %v4501_v43  ;;  %v4567_v15 = vshrl.u32 %v4474_v37, 16  ;;  %v4476_v19 = vld [vmem:[#allocation3 + $0xa8] sm:$0x80] }
 0x4f9   : > { %4452 = vst.msk [vmem:[#allocation3 + $0xb0] sm:$0xff] %vm13435_vm12, %v4435_v2  ;;  %vm13436_vm13 = vmmov %vm13430_vm1 }
 0x4fa   : > { %4453 = vst.msk [vmem:[#allocation3 + $0xc8] sm:$0xff] %vm13436_vm13, %v4436_v6  ;;  %vm13437_vm14 = vmmov %vm13430_vm1  ;;  %v12104_v10 = vld [vmem:[#allocation3 + $0x20] sm:$0xff]  ;;  %v4543_v6 = vshrl.u32 %v4470_v45, 16 }
 0x4fb   : > { %4454 = vst.msk [vmem:[#allocation3 + $0xe0] sm:$0xff] %vm13437_vm14, %v4437_v25  ;;  %vm13438_vm8 = vmmov %vm13430_vm1  ;;  %v12108_v17 = vld [vmem:[#allocation3 + $0x38] sm:$0xff]  ;;  %v4511_v21 = vshrl.u32 %v12104_v10, 16  ;;  %v4514_v5 = vshll.u32 %v12104_v10, 16  ;;  %v4478_v45 = vld [vmem:[#allocation3 + $0xc0] sm:$0x80] }
 0x4fc   : > { %4455 = vst.msk [vmem:[#allocation3 + $0xf8] sm:$0xff] %vm13438_vm8, %v4438_v0  ;;  %vm13439_vm9 = vmmov %vm13430_vm1  ;;  %v12114_v61 = vld [vmem:[#allocation3 + $0x50] sm:$0xff]  ;;  %v4523_v31 = vshrl.u32 %v12108_v17, 16  ;;  %v4526_v23 = vshll.u32 %v12108_v17, 16 }
 0x4fd   : > { %4456 = vst.msk [vmem:[#allocation3 + $0x110] sm:$0xff] %vm13439_vm9, %v4439_v13  ;;  %vm13440_vm2 = vmmov %vm13430_vm1  ;;  %v12118_v58 = vld [vmem:[#allocation3 + $0x68] sm:$0xff]  ;;  %v4513_v7 = vrot.slane %v4511_v21, 7  ;;  %v4535_v20 = vshrl.u32 %v12114_v61, 16  ;;  %v4538_v25 = vshll.u32 %v12114_v61, 16 }
 0x4fe   : > { %4457 = vst.msk [vmem:[#allocation3 + $0x128] sm:$0xff] %vm13440_vm2, %v4440_v49  ;;  %vm13441_vm10 = vmmov %vm13430_vm1  ;;  %v12122_v56 = vld [vmem:[#allocation3 + $0x80] sm:$0xff]  ;;  %v4525_v33 = vrot.slane %v4523_v31, 7  ;;  %v4547_v34 = vshrl.u32 %v12118_v58, 16  ;;  %v4550_v0 = vshll.u32 %v12118_v58, 16  ;;  %v5166_v52 = vrot.slane %v4526_v23, 1 }
 0x4ff   : > { %4458 = vst.msk [vmem:[#allocation3 + $0x140] sm:$0xff] %vm13441_vm10, %v4441_v4  ;;  %vm13442_vm11 = vmmov %vm13430_vm1  ;;  %v12194_v16 = vor.u32 %v4514_v5, %v4513_v7  ;;  %v4537_v46 = vrot.slane %v4535_v20, 7  ;;  %v4559_v49 = vshrl.u32 %v12122_v56, 16  ;;  %v4533_v4 = vrot.slane %v4531_v9, 7 }
 0x500   : > { %4459 = vst.msk [vmem:[#allocation3 + $0x158] sm:$0xff] %vm13442_vm11, %v4442_v57  ;;  %vm13443_vm0 = vmmov %vm13430_vm1  ;;  %v12130_v50 = vld [vmem:[#allocation3 + $0xb0] sm:$0xff]  ;;  %v12199_v1 = vor.u32 %v4526_v23, %v4525_v33  ;;  %v4549_v47 = vrot.slane %v4547_v34, 7  ;;  %v4562_v3 = vshll.u32 %v12122_v56, 16  ;;  %v4579_v9 = vshrl.u32 %v4476_v19, 16 }
 0x501   : > { %4460 = vst.msk [vmem:[#allocation3 + $0x170] sm:$0xff] %vm13443_vm0, %v4443_v54  ;;  %vm13444_vm3 = vmmov %vm13443_vm0  ;;  %v12134_v32 = vld [vmem:[#allocation3 + $0xc8] sm:$0xff]  ;;  %v12223_v13 = vor.u32 %v4538_v25, %v4537_v46  ;;  %v4561_v43 = vrot.slane %v4559_v49, 7  ;;  %v13375_v62 = vshrl.u32 %v12130_v50, 16 }
 0x502   : > { %4461 = vst.msk [vmem:[#allocation3 + $0x188] sm:$0xff] %vm13444_vm3, %v4444_v44  ;;  %vm13445_vm4 = vmmov %vm13443_vm0  ;;  %v12138_v28 = vld [vmem:[#allocation3 + $0xe0] sm:$0xff]  ;;  %v12228_v57 = vor.u32 %v4550_v0, %v4549_v47  ;;  %v4545_v44 = vrot.slane %v4543_v6, 7  ;;  %v4591_v6 = vshrl.u32 %v4478_v45, 16 }
 0x503   : > { %9497 = vmatmul.mubr.msk.bf16.vlgmr.msra.gmra.mrb[0].mxu1 %vm13445_vm4, %v12104_v10  ;;  %vm13446_vm1 = vmmov %vm13443_vm0  ;;  %v12142_v18 = vld [vmem:[#allocation3 + $0xf8] sm:$0xff]  ;;  %v12245_v7 = vor.u32 %v4562_v3, %v4561_v43  ;;  %v4585_v46 = vrot.slane %v13375_v62, 7  ;;  %v13365_v37 = vshrl.u32 %v12138_v28, 16  ;;  %v4581_v43 = vrot.slane %v4579_v9, 7 }
 0x504   : > { %9529 = vmatpush3.bf16.msra.mxu1 %v11775_v11  ;;  %9500 = vmatprep.mubr.msk.bf16.mxu1 %vm13446_vm1, %v12108_v17  ;;  %vm13447_vm15 = vmmov %vm13443_vm0  ;;  %v12126_v11 = vld [vmem:[#allocation3 + $0x98] sm:$0xff]  ;;  %v12146_v63 = vld [vmem:[#allocation3 + $0x110] sm:$0xff]  ;;  %v13369_v9 = vshll.u32 %v12138_v28, 16 }
 0x505   : > { %9562 = vmatprep.subr.bf16.mxu1 %v12102_v14  ;;  %vm13448_vm5 = vmmov %vm13443_vm0  ;;  %v12150_v30 = vld [vmem:[#allocation3 + $0x128] sm:$0xff]  ;;  %v4571_v54 = vshrl.u32 %v12126_v11, 16 }
 0x506   : > { %vm13449_vm6 = vmmov %vm13443_vm0  ;;  %v12160_v29 = vld [vmem:[#allocation3 + $0x140] sm:$0xff] }
 0x507   : > { %vm13450_vm7 = vmmov %vm13443_vm0  ;;  %v12165_v41 = vld [vmem:[#allocation3 + $0x158] sm:$0xff] }
 0x508   : > { %vm13451_vm12 = vmmov %vm13443_vm0  ;;  %v12183_v27 = vld [vmem:[#allocation3 + $0x170] sm:$0xff] }
 0x509   : > { %vm13452_vm13 = vmmov %vm13443_vm0  ;;  %v12155_v22 = vld [vmem:[#allocation3 + $0x188] sm:$0xff] }
 0x50a   : > { %vm13453_vm14 = vmmov %vm13443_vm0  ;;  %v13362_v26 = vshll.u32 %v12155_v22, 16  ;;  %v13363_v42 = vshrl.u32 %v12155_v22, 16 }
 0x50b   : > { %9501 = vmatmul.mubr.msk.bf16.gmra.mrb[4].mxu1 %vm13447_vm15, %v12114_v61  ;;  %vm13454_vm8 = vmmov %vm13443_vm0 }
 0x50c   : > { %9504 = vmatprep.mubr.msk.bf16.mxu1 %vm13448_vm5, %v12118_v58  ;;  %vm13455_vm9 = vmmov %vm13443_vm0  ;;  %v6504_v59 = vrot.slane %v13362_v26, 1  ;;  %v4486_v26 = vld [vmem:[#allocation3 + $0x120] sm:$0x80] }
 0x50d   : > { %vm13456_vm2 = vmmov %vm13443_vm0 }
 0x50e   : > { %vm13457_vm10 = vmmov %vm13443_vm0  ;;  %v12178_v36 = vor.u32 %v6504_v59, %v13363_v42 }
 0x50f   : > { %vm13458_vm11 = vmmov %vm13443_vm0  ;;  %vm13459_vm0 = vsmask.f32 256 }
 0x510   : > { %v4505_v38 = vsel %vm13459_vm0, %v4497_v60, %v4504_v39  ;;  %vm13460_vm3 = vmmov %vm13446_vm1  ;;  %v4573_v60 = vrot.slane %v4571_v54, 7 }
 0x511   : > { %vm13461_vm4 = vmmov %vm13446_vm1 }
 0x512   : > { %vm13462_vm1 = vmmov %vm13459_vm0 }
 0x513   : > { %9505 = vmatmul.mubr.msk.bf16.gmra.mrb[8].mxu1 %vm13449_vm6, %v12122_v56  ;;  %v4517_v35 = vsel %vm13462_vm1, %v4509_v53, %v12194_v16  ;;  %vm13463_vm15 = vmmov %vm13456_vm2  ;;  %v13374_v53 = vshrl.u32 %v12134_v32, 16 }
 0x514   : > { %9508 = vmatprep.mubr.msk.bf16.mxu1 %vm13450_vm7, %v12126_v11  ;;  %vm13464_vm5 = vmmov %vm13459_vm0 }
 0x515   : > { %v4529_v2 = vsel %vm13464_vm5, %v4521_v40, %v12199_v1  ;;  %vm13465_vm6 = vmmov %vm13456_vm2  ;;  %v4569_v40 = vrot.slane %v4567_v15, 7  ;;  %v4597_v47 = vrot.slane %v13374_v53, 7  ;;  %v4482_v15 = vld [vmem:[#allocation3 + $0xf0] sm:$0x80]  ;;  %v5142_v53 = vrot.slane %v4502_v55, 1 }
 0x516   : > { %vm13466_vm7 = vmmov %vm13459_vm0 }
 0x517   : > { %v4541_v8 = vsel %vm13466_vm7, %v4533_v4, %v12223_v13  ;;  %v4586_v4 = vshll.u32 %v12130_v50, 16  ;;  %vm13479_vm5 = vmmov %vm13462_vm1  ;;  %v5143_v55 = vor.u32 %v5142_v53, %v4499_v51 }
 0x518   : > { %vm13481_vm7 = vmmov %vm13462_vm1 }
 0x51b   : > { %9509 = vmatmul.mubr.msk.bf16.gmra.mrb[12].mxu1 %vm13451_vm12, %v12130_v50  ;;  %vm13467_vm12 = vmmov %vm13456_vm2 }
 0x51c   : > { %9512 = vmatprep.mubr.msk.bf16.mxu1 %vm13452_vm13, %v12134_v32  ;;  %vm13468_vm13 = vmmov %vm13459_vm0 }
 0x51d   : > { %v4553_v59 = vsel %vm13468_vm13, %v4545_v44, %v12228_v57  ;;  %v4598_v44 = vshll.u32 %v12134_v32, 16  ;;  %vm13483_vm13 = vmmov %vm13462_vm1 }
 0x523   : > { %9513 = vmatmul.mubr.msk.bf16.gmra.mrb[16].mxu1 %vm13453_vm14, %v12138_v28  ;;  %vm13469_vm14 = vmmov %vm13456_vm2 }
 0x524   : > { %9516 = vmatprep.mubr.msk.bf16.mxu1 %vm13454_vm8, %v12142_v18  ;;  %vm13470_vm8 = vmmov %vm13459_vm0 }
 0x52b   : > { %9517 = vmatmul.mubr.msk.bf16.gmra.mrb[20].mxu1 %vm13455_vm9, %v12146_v63  ;;  %vm13471_vm9 = vmmov %vm13456_vm2 }
 0x52c   : > { %9520 = vmatprep.mubr.msk.bf16.mxu1 %vm13456_vm2, %v12150_v30  ;;  %vm13472_vm2 = vmmov %vm13459_vm0 }
 0x533   : > { %9521 = vmatmul.mubr.msk.bf16.gmra.mrb[24].mxu1 %vm13457_vm10, %v12160_v29  ;;  %vm13473_vm10 = vmmov %vm13460_vm3 }
 0x534   : > { %9524 = vmatprep.mubr.msk.bf16.mxu1 %vm13458_vm11, %v12165_v41  ;;  %vm13474_vm11 = vmmov %vm13459_vm0 }
 0x535   : > { %vm13475_vm0 = vmmov %vm13460_vm3 }
 0x53b   : > { %9525 = vmatmul.mubr.msk.bf16.gmra.mrb[28].mxu1 %vm13460_vm3, %v12183_v27  ;;  %vm13476_vm3 = vmmov %vm13462_vm1 }
 0x53c   : > { %9530 = vmatprep.mubr.msk.bf16.mxu1 %vm13461_vm4, %v4505_v38  ;;  %v4574_v38 = vshll.u32 %v12126_v11, 16  ;;  %vm13477_vm4 = vmmov %vm13475_vm0 }
 0x53e   : > { %v12250_v12 = vor.u32 %v4574_v38, %v4573_v60  ;;  %v4593_v60 = vrot.slane %v4591_v6, 7  ;;  %v13366_v6 = vshrl.u32 %v12146_v63, 16 }
 0x543   : > { %9531 = vmatmul.mubr.msk.bf16.vlgmr.msra.gmra.mrb[0].mxu1 %vm13463_vm15, %v4517_v35  ;;  %vm13478_vm15 = vmmov %vm13475_vm0 }
 0x544   : > { %9563 = vmatpush3.bf16.msra.mxu1 %v12102_v14  ;;  %9534 = vmatprep.mubr.msk.bf16.mxu1 %vm13465_vm6, %v4529_v2  ;;  %v4472_v14 = vld [vmem:[#allocation3 + $0x78] sm:$0x80]  ;;  %v4577_v2 = vsel %vm13472_vm2, %v4569_v40, %v12250_v12  ;;  %vm13480_vm6 = vmmov %vm13475_vm0 }
 0x545   : > { %9596 = vmatprep.subr.bf16.mxu1 %v12205_v48  ;;  %v4555_v39 = vshrl.u32 %v4472_v14, 16  ;;  %v12267_v14 = vor.u32 %v4586_v4, %v4585_v46  ;;  %vm13487_vm2 = vmmov %vm13462_vm1 }
 0x547   : > { %v4557_v33 = vrot.slane %v4555_v39, 7  ;;  %v13364_v39 = vshrl.u32 %v12142_v18, 16  ;;  %v4589_v40 = vsel %vm13474_vm11, %v4581_v43, %v12267_v14  ;;  %vm13489_vm11 = vsmask.f32 7424 }
 0x549   : > { %v4565_v35 = vsel %vm13470_vm8, %v4557_v33, %v12245_v7  ;;  %v4609_v33 = vrot.slane %v13365_v37, 7  ;;  %v4621_v45 = vrot.slane %v13364_v39, 7  ;;  %v13371_v37 = vshll.u32 %v12150_v30, 16  ;;  %vm13485_vm8 = vmmov %vm13462_vm1 }
 0x54b   : > { %9535 = vmatmul.mubr.msk.bf16.gmra.mrb[4].mxu1 %vm13467_vm12, %v4541_v8  ;;  %v12272_v8 = vor.u32 %v4598_v44, %v4597_v47  ;;  %v13368_v47 = vshll.u32 %v12142_v18, 16  ;;  %vm13482_vm12 = vmmov %vm13475_vm0 }
 0x54c   : > { %9538 = vmatprep.mubr.msk.bf16.mxu1 %vm13469_vm14, %v4553_v59  ;;  %v4480_v59 = vld [vmem:[#allocation3 + $0xd8] sm:$0x80]  ;;  %vm13484_vm14 = vmmov %vm13475_vm0 }
 0x54d   : > { %v4603_v19 = vshrl.u32 %v4480_v59, 16  ;;  %v4601_v46 = vsel %vm13476_vm3, %v4593_v60, %v12272_v8  ;;  %v12294_v59 = vor.u32 %v13368_v47, %v4621_v45  ;;  %v13367_v60 = vshrl.u32 %v12150_v30, 16  ;;  %v4490_v47 = vld [vmem:[#allocation3 + $0x150] sm:$0x80]  ;;  %vm13491_vm3 = vmmov %vm13477_vm4 }
 0x54e   : > { %v4639_v45 = vshrl.u32 %v4486_v26, 16 }
 0x54f   : > { %v4605_v43 = vrot.slane %v4603_v19, 7  ;;  %v4645_v39 = vrot.slane %v13367_v60, 7  ;;  %v4488_v60 = vld [vmem:[#allocation3 + $0x138] sm:$0x80] }
 0x550   : > { %v4641_v26 = vrot.slane %v4639_v45, 7  ;;  %v13376_v45 = vshll.u32 %v12160_v29, 16 }
 0x553   : > { %9539 = vmatmul.mubr.msk.bf16.gmra.mrb[8].mxu1 %vm13471_vm9, %v4565_v35  ;;  %v4615_v35 = vshrl.u32 %v4482_v15, 16  ;;  %vm13486_vm9 = vmmov %vm13475_vm0 }
 0x554   : > { %9542 = vmatprep.mubr.msk.bf16.mxu1 %vm13473_vm10, %v4577_v2  ;;  %v12289_v2 = vor.u32 %v13369_v9, %v4609_v33  ;;  %vm13488_vm10 = vmmov %vm13475_vm0 }
 0x555   : > { %v4617_v15 = vrot.slane %v4615_v35, 7  ;;  %v13370_v35 = vshll.u32 %v12146_v63, 16 }
 0x556   : > { %v4613_v42 = vsel %vm13462_vm1, %v4605_v43, %v12289_v2  ;;  %v13372_v43 = vshrl.u32 %v12160_v29, 16 }
 0x557   : > { %v4625_v19 = vsel %vm13479_vm5, %v4617_v15, %v12294_v59  ;;  %v13373_v15 = vshrl.u32 %v12165_v41, 16 }
 0x55b   : > { %9543 = vmatmul.mubr.msk.bf16.gmra.mrb[12].mxu1 %vm13475_vm0, %v4589_v40  ;;  %v4484_v40 = vld [vmem:[#allocation3 + $0x108] sm:$0x80]  ;;  %vm13490_vm0 = vmmov %vm13462_vm1 }
 0x55c   : > { %9546 = vmatprep.mubr.msk.bf16.mxu1 %vm13477_vm4, %v4601_v46  ;;  %v4633_v46 = vrot.slane %v13366_v6, 7  ;;  %v4627_v33 = vshrl.u32 %v4484_v40, 16  ;;  %vm13492_vm4 = vmmov %vm13491_vm3 }
 0x55d   : > { %vm13493_vm1 = vmmov %vm13489_vm11 }
 0x55e   : > { %v12311_v6 = vor.u32 %v13370_v35, %v4633_v46  ;;  %v4629_v40 = vrot.slane %v4627_v33, 7  ;;  %v4651_v46 = vshrl.u32 %v4488_v60, 16  ;;  %v4669_v35 = vrot.slane %v13373_v15, 7  ;;  %v5106_v15 = vld [vmem:[#allocation3 + $0x10] sm:$0x1]  ;;  %vm13495_vm5 = vmmov %vm13493_vm1 }
 0x55f   : > { %v4663_v33 = vshrl.u32 %v4490_v47, 16  ;;  %v13377_v60 = vshrl.u32 %v12183_v27, 16  ;;  %v4492_v47 = vld [vmem:[#allocation3 + $0x168] sm:$0x80] }
 0x560   : > { %v4637_v9 = vsel %vm13481_vm7, %v4629_v40, %v12311_v6  ;;  %v4653_v40 = vrot.slane %v4651_v46, 7  ;;  %vm13497_vm7 = vmmov %vm13493_vm1 }
 0x561   : > { %v4681_v62 = vrot.slane %v13377_v60, 7 }
 0x563   : > { %9547 = vmatmul.mubr.msk.bf16.gmra.mrb[16].mxu1 %vm13478_vm15, %v4613_v42  ;;  %v12316_v42 = vor.u32 %v13371_v37, %v4645_v39  ;;  %v13378_v37 = vshll.u32 %v12165_v41, 16  ;;  %vm13494_vm15 = vmmov %vm13491_vm3 }
 0x564   : > { %9550 = vmatprep.mubr.msk.bf16.mxu1 %vm13480_vm6, %v4625_v19  ;;  %v4657_v19 = vrot.slane %v13372_v43, 7  ;;  %vm13496_vm6 = vmmov %vm13491_vm3 }
 0x565   : > { %v4649_v39 = vsel %vm13483_vm13, %v4641_v26, %v12316_v42  ;;  %v4665_v26 = vrot.slane %v4663_v33, 7  ;;  %vm13499_vm13 = vmmov %vm13493_vm1 }
 0x566   : > { %v12333_v43 = vor.u32 %v13376_v45, %v4657_v19  ;;  %v4675_v45 = vshrl.u32 %v4492_v47, 16  ;;  %v5110_v47 = vld [vmem:[#allocation3 + $0x40] sm:$0x1] }
 0x567   : > { %v5169_v51 = vshll.u32 %v5110_v47, 16 }
 0x568   : > { %v4661_v19 = vsel %vm13485_vm8, %v4653_v40, %v12333_v43  ;;  %v4677_v60 = vrot.slane %v4675_v45, 7  ;;  %v5108_v40 = vld [vmem:[#allocation3 + $0x28] sm:$0x1]  ;;  %v5167_v45 = vor.u32 %v5166_v52, %v4523_v31  ;;  %v5190_v31 = vrot.slane %v4550_v0, 1  ;;  %v5118_v52 = vld [vmem:[#allocation3 + $0xa0] sm:$0x1]  ;;  %vm13501_vm8 = vmmov %vm13493_vm1 }
 0x569   : > { %v5202_v0 = vrot.slane %v4562_v3, 1  ;;  %v5120_v3 = vld [vmem:[#allocation3 + $0xb8] sm:$0x1] }
 0x56b   : > { %9551 = vmatmul.mubr.msk.bf16.gmra.mrb[20].mxu1 %vm13482_vm12, %v4637_v9  ;;  %v12338_v9 = vor.u32 %v13378_v37, %v4669_v35  ;;  %v4682_v35 = vshll.u32 %v12183_v27, 16  ;;  %v5154_v37 = vrot.slane %v4514_v5, 1  ;;  %v12373_v5 = vld [vmem:[%s13328_s4 + $0x20] sm:$0xff]   ;;  %vm13498_vm12 = vmmov %vm13491_vm3 }
 0x56c   : > { %9554 = vmatprep.mubr.msk.bf16.mxu1 %vm13484_vm14, %v4649_v39  ;;  %v5145_v39 = vshll.u32 %v5106_v15, 16  ;;  %vm13500_vm14 = vmmov %vm13491_vm3 }
 0x56d   : > { %v4673_v46 = vsel %vm13487_vm2, %v4665_v26, %v12338_v9  ;;  %v12355_v33 = vor.u32 %v4682_v35, %v4681_v62  ;;  %v5155_v62 = vor.u32 %v5154_v37, %v4511_v21  ;;  %vm13503_vm2 = vmmov %vm13493_vm1 }
 0x56e   : > { %v5147_v15 = vrot.slane %v5145_v39, 1  ;;  %v5112_v39 = vld [vmem:[#allocation3 + $0x58] sm:$0x1] }
 0x56f   : > { %v4685_v26 = vsel %vm13490_vm0, %v4677_v60, %v12355_v33  ;;  %v5171_v60 = vrot.slane %v5169_v51, 1  ;;  %vm13509_vm0 = vmmov %vm13491_vm3 }
 0x571   : > { %v5172_v21 = vsel %vm13495_vm5, %v5167_v45, %v5171_v60  ;;  %vm13517_vm5 = vmmov %vm13493_vm1 }
 0x573   : > { %9555 = vmatmul.mubr.msk.bf16.gmra.mrb[24].mxu1 %vm13486_vm9, %v4661_v19  ;;  %v5148_v19 = vsel %vm13489_vm11, %v5143_v55, %v5147_v15  ;;  %v5114_v55 = vld [vmem:[#allocation3 + $0x70] sm:$0x1]  ;;  %v5178_v15 = vrot.slane %v4538_v25, 1  ;;  %v5191_v25 = vor.u32 %v5190_v31, %v4547_v34  ;;  %v5203_v34 = vor.u32 %v5202_v0, %v4559_v49  ;;  %vm13502_vm9 = vmmov %vm13491_vm3 }
 0x574   : > { %9558 = vmatprep.mubr.msk.bf16.mxu1 %vm13488_vm10, %v4673_v46  ;;  %v5157_v46 = vshll.u32 %v5108_v40, 16  ;;  %v5181_v40 = vshll.u32 %v5112_v39, 16  ;;  %v5193_v37 = vshll.u32 %v5114_v55, 16  ;;  %v5122_v55 = vld [vmem:[#allocation3 + $0xd0] sm:$0x1]  ;;  %v5238_v49 = vrot.slane %v4598_v44, 1  ;;  %vm13504_vm10 = vmmov %vm13491_vm3 }
 0x575   : > { %v5179_v47 = vor.u32 %v5178_v15, %v4535_v20  ;;  %v5214_v20 = vrot.slane %v4574_v38, 1  ;;  %v5226_v15 = vrot.slane %v4586_v4, 1  ;;  %v5124_v4 = vld [vmem:[#allocation3 + $0xe8] sm:$0x1]  ;;  %vm13507_vm11 = vmmov %vm13493_vm1 }
 0x576   : > { %v5159_v53 = vrot.slane %v5157_v46, 1  ;;  %v5116_v46 = vld [vmem:[#allocation3 + $0x88] sm:$0x1]  ;;  %v5253_v0 = vshll.u32 %v5124_v4, 16  ;;  %v13521_v4 = vshrl.u32 %v12150_v30, 16 }
 0x577   : > { %v5215_v60 = vor.u32 %v5214_v20, %v4571_v54  ;;  %v13505_v54 = vshrl.u32 %v12130_v50, 16 }
 0x578   : > { %v5160_v23 = vsel %vm13493_vm1, %v5155_v62, %v5159_v53  ;;  %v5217_v53 = vshll.u32 %v5118_v52, 16  ;;  %v13508_v52 = vshll.u32 %v12138_v28, 16 }
 0x579   : > { %v5227_v31 = vor.u32 %v5226_v15, %v13505_v54  ;;  %v13518_v54 = vshll.u32 %v12150_v30, 16 }
 0x57a   : > { %v5219_v39 = vrot.slane %v5217_v53, 1  ;;  %v13513_v53 = vshrl.u32 %v12138_v28, 16 }
 0x57b   : > { %9559 = vmatmul.mubr.msk.bf16.gmra.mrb[28].mxu1 %vm13491_vm3, %v4685_v26  ;;  %v5195_v26 = vrot.slane %v5193_v37, 1  ;;  %vm13510_vm3 = vmmov %vm13493_vm1 }
 0x57c   : > { %9564 = vmatprep.mubr.msk.bf16.mxu1 %vm13492_vm4, %v5148_v19  ;;  %v5183_v19 = vrot.slane %v5181_v40, 1  ;;  %v5229_v40 = vshll.u32 %v5120_v3, 16  ;;  %v5220_v38 = vsel %vm13503_vm2, %v5215_v60, %v5219_v39  ;;  %vm13512_vm4 = vmmov %vm13509_vm0  ;;  %v13514_v60 = vshrl.u32 %v12142_v18, 16 }
 0x57d   : > { %v5196_v62 = vsel %vm13499_vm13, %v5191_v25, %v5195_v26  ;;  %v5126_v26 = vld [vmem:[#allocation3 + $0x100] sm:$0x1]  ;;  %vm13525_vm13 = vmmov %vm13493_vm1 }
 0x57e   : > { %v5184_v51 = vsel %vm13497_vm7, %v5179_v47, %v5183_v19  ;;  %v5231_v37 = vrot.slane %v5229_v40, 1  ;;  %v13506_v47 = vshrl.u32 %v12134_v32, 16  ;;  %v5265_v20 = vshll.u32 %v5126_v26, 16  ;;  %vm13522_vm7 = vmmov %vm13493_vm1 }
 0x57f   : > { %v13515_v40 = vshll.u32 %v12146_v63, 16  ;;  %vm13532_vm2 = vmmov %vm13493_vm1 }
 0x580   : > { %v5239_v19 = vor.u32 %v5238_v49, %v13506_v47  ;;  %v5267_v3 = vrot.slane %v5265_v20, 1  ;;  %v13520_v47 = vshrl.u32 %v12146_v63, 16 }
 0x583   : > { %9565 = vmatmul.mubr.msk.bf16.vlgmr.msra.gmra.mrb[0].mxu1 %vm13494_vm15, %v5160_v23  ;;  %vm13516_vm15 = vmmov %vm13509_vm0 }
 0x584   : > { %9597 = vmatpush3.bf16.msra.mxu1 %v12205_v48  ;;  %9568 = vmatprep.mubr.msk.bf16.mxu1 %vm13496_vm6, %v5172_v21  ;;  %v5205_v48 = vshll.u32 %v5116_v46, 16  ;;  %v5241_v21 = vshll.u32 %v5122_v55, 16  ;;  %v5232_v46 = vsel %vm13507_vm11, %v5227_v31, %v5231_v37  ;;  %v5128_v55 = vld [vmem:[#allocation3 + $0x118] sm:$0x1]  ;;  %v5286_v31 = vrot.slane %v13518_v54, 1  ;;  %vm13519_vm6 = vmmov %vm13509_vm0 }
 0x585   : > { %9630 = vmatprep.subr.bf16.mxu1 %v12373_v5  ;;  %v5277_v49 = vshll.u32 %v5128_v55, 16  ;;  %v13529_v55 = vshrl.u32 %v12165_v41, 16  ;;  %vm13535_vm11 = vmmov %vm13493_vm1 }
 0x586   : > { %v5207_v45 = vrot.slane %v5205_v48, 1  ;;  %v5243_v25 = vrot.slane %v5241_v21, 1  ;;  %v13511_v48 = vshll.u32 %v12142_v18, 16  ;;  %v5287_v26 = vor.u32 %v5286_v31, %v13521_v4 }
 0x588   : > { %v5208_v23 = vsel %vm13501_vm8, %v5203_v34, %v5207_v45  ;;  %v5244_v44 = vsel %vm13510_vm3, %v5239_v19, %v5243_v25  ;;  %v5255_v45 = vrot.slane %v5253_v0, 1  ;;  %v5279_v25 = vrot.slane %v5277_v49, 1  ;;  %vm13530_vm8 = vmmov %vm13493_vm1 }
 0x589   : > { %vm13536_vm3 = vsmask.f32 256 }
 0x58b   : > { %9569 = vmatmul.mubr.msk.bf16.gmra.mrb[4].mxu1 %vm13498_vm12, %v5184_v51  ;;  %v5250_v51 = vrot.slane %v13508_v52, 1  ;;  %v5132_v52 = vld [vmem:[#allocation3 + $0x148] sm:$0x1]  ;;  %vm13524_vm12 = vmmov %vm13509_vm0 }
 0x58c   : > { %9572 = vmatprep.mubr.msk.bf16.mxu1 %vm13500_vm14, %v5196_v62  ;;  %v5262_v62 = vrot.slane %v13511_v48, 1  ;;  %vm13527_vm14 = vmmov %vm13509_vm0 }
 0x58d   : > { %v5251_v34 = vor.u32 %v5250_v51, %v13513_v53  ;;  %v5134_v51 = vld [vmem:[#allocation3 + $0x160] sm:$0x1]  ;;  %v13526_v53 = vshll.u32 %v12165_v41, 16 }
 0x58e   : > { %v5263_v39 = vor.u32 %v5262_v62, %v13514_v60  ;;  %v5301_v62 = vshll.u32 %v5132_v52, 16  ;;  %v13528_v60 = vshrl.u32 %v12160_v29, 16 }
 0x58f   : > { %v5256_v15 = vsel %vm13493_vm1, %v5251_v34, %v5255_v45  ;;  %v5310_v34 = vrot.slane %v13526_v53, 1  ;;  %v5313_v45 = vshll.u32 %v5134_v51, 16  ;;  %v12465_v53 = vld [vmem:[%s13328_s4 + $0x28] sm:$0xff]   ;;  %vm13538_vm1 = vmmov %vm13536_vm3 }
 0x590   : > { %v5268_v21 = vsel %vm13517_vm5, %v5263_v39, %v5267_v3  ;;  %v5303_v3 = vrot.slane %v5301_v62, 1  ;;  %v5585_v62 = vld [vmem:[#allocation3 + $0x60] sm:$0x80]  ;;  %vm13540_vm5 = vmmov %vm13538_vm1 }
 0x593   : > { %9573 = vmatmul.mubr.msk.bf16.gmra.mrb[8].mxu1 %vm13502_vm9, %v5208_v23  ;;  %v5130_v23 = vld [vmem:[#allocation3 + $0x130] sm:$0x1]  ;;  %vm13531_vm9 = vmmov %vm13509_vm0 }
 0x594   : > { %9576 = vmatprep.mubr.msk.bf16.mxu1 %vm13504_vm10, %v5220_v38  ;;  %v5274_v38 = vrot.slane %v13515_v40, 1  ;;  %v5289_v37 = vshll.u32 %v5130_v23, 16  ;;  %v5311_v23 = vor.u32 %v5310_v34, %v13529_v55  ;;  %v5136_v40 = vld [vmem:[#allocation3 + $0x178] sm:$0x1]  ;;  %vm13533_vm10 = vmmov %vm13509_vm0  ;;  %v5589_v55 = vld [vmem:[#allocation3 + $0x90] sm:$0x80] }
 0x595   : > { %v5325_v54 = vshll.u32 %v5136_v40, 16 }
 0x596   : > { %v5275_v19 = vor.u32 %v5274_v38, %v13520_v47  ;;  %v5579_v38 = vld [vmem:[#allocation3 + $0x18] sm:$0x80]  ;;  %v13534_v47 = vshrl.u32 %v12183_v27, 16 }
 0x598   : > { %v5280_v0 = vsel %vm13522_vm7, %v5275_v19, %v5279_v25  ;;  %v5327_v25 = vrot.slane %v5325_v54, 1  ;;  %vm13542_vm7 = vmmov %vm13538_vm1 }
 0x59b   : > { %9577 = vmatmul.mubr.msk.bf16.gmra.mrb[12].mxu1 %vm13509_vm0, %v5232_v46  ;;  %v5291_v46 = vrot.slane %v5289_v37, 1  ;;  %v5612_v37 = vshrl.u32 %v5579_v38, 16 }
 0x59c   : > { %9580 = vmatprep.mubr.msk.bf16.mxu1 %vm13512_vm4, %v5244_v44  ;;  %v13523_v44 = vshll.u32 %v12160_v29, 16  ;;  %vm13537_vm4 = vmmov %vm13509_vm0 }
 0x59d   : > { %v5292_v20 = vsel %vm13525_vm13, %v5287_v26, %v5291_v46  ;;  %v5614_v4 = vrot.slane %v5612_v37, 7  ;;  %v5581_v26 = vld [vmem:[#allocation3 + $0x30] sm:$0x80]  ;;  %v5583_v46 = vld [vmem:[#allocation3 + $0x48] sm:$0x80]  ;;  %vm13544_vm13 = vmmov %vm13538_vm1 }
 0x59e   : > { %v5298_v48 = vrot.slane %v13523_v44, 1  ;;  %v5624_v51 = vshrl.u32 %v5581_v26, 16 }
 0x5a0   : > { %v5299_v39 = vor.u32 %v5298_v48, %v13528_v60  ;;  %v5626_v44 = vrot.slane %v5624_v51, 7  ;;  %v5601_v51 = vld [vmem:[#allocation3 + $0x120] sm:$0x80] }
 0x5a2   : > { %v5304_v49 = vsel %vm13530_vm8, %v5299_v39, %v5303_v3  ;;  %v5634_v34 = vsel %vm13538_vm1, %v5626_v44, %v12199_v1  ;;  %vm13546_vm8 = vmmov %vm13538_vm1  ;;  %v5744_v44 = vshrl.u32 %v5601_v51, 16 }
 0x5a3   : > { %9581 = vmatmul.mubr.msk.bf16.gmra.mrb[16].mxu1 %vm13516_vm15, %v5256_v15  ;;  %v5315_v15 = vrot.slane %v5313_v45, 1  ;;  %v5648_v45 = vshrl.u32 %v5585_v62, 16  ;;  %vm13539_vm15 = vmmov %vm13509_vm0 }
 0x5a4   : > { %9584 = vmatprep.mubr.msk.bf16.mxu1 %vm13519_vm6, %v5268_v21  ;;  %v5322_v21 = vrot.slane %v4682_v35, 1  ;;  %v5622_v35 = vsel %vm13536_vm3, %v5614_v4, %v12194_v16  ;;  %vm13541_vm6 = vmmov %vm13509_vm0 }
 0x5a5   : > { %v5316_v31 = vsel %vm13532_vm2, %v5311_v23, %v5315_v15  ;;  %v5650_v39 = vrot.slane %v5648_v45, 7  ;;  %v5591_v23 = vld [vmem:[#allocation3 + $0xa8] sm:$0x80]  ;;  %v5672_v15 = vshrl.u32 %v5589_v55, 16  ;;  %vm13548_vm2 = vmmov %vm13538_vm1 }
 0x5a6   : > { %v5323_v19 = vor.u32 %v5322_v21, %v13534_v47  ;;  %v5684_v40 = vshrl.u32 %v5591_v23, 16  ;;  %v5595_v21 = vld [vmem:[#allocation3 + $0xd8] sm:$0x80]  ;;  %vm13551_vm3 = vmmov %vm13538_vm1 }
 0x5a7   : > { %v5658_v1 = vsel %vm13542_vm7, %v5650_v39, %v12228_v57  ;;  %v5708_v37 = vshrl.u32 %v5595_v21, 16  ;;  %vm13556_vm7 = vmmov %vm13538_vm1  ;;  %v12567_v21 = vld [vmem:[#allocation3 + $0x68] sm:$0xff] }
 0x5a8   : > { %v5328_v52 = vsel %vm13535_vm11, %v5323_v19, %v5327_v25  ;;  %v5686_v38 = vrot.slane %v5684_v40, 7  ;;  %v5597_v19 = vld [vmem:[#allocation3 + $0xf0] sm:$0x80]  ;;  %v5599_v25 = vld [vmem:[#allocation3 + $0x108] sm:$0x80]  ;;  %vm13550_vm11 = vmmov %vm13538_vm1 }
 0x5a9   : > { %v5710_v47 = vrot.slane %v5708_v37, 7  ;;  %v5720_v26 = vshrl.u32 %v5597_v19, 16 }
 0x5aa   : > { %v5694_v57 = vsel %vm13548_vm2, %v5686_v38, %v12267_v14  ;;  %vm13563_vm2 = vmmov %vm13538_vm1 }
 0x5ab   : > { %9585 = vmatmul.mubr.msk.bf16.gmra.mrb[20].mxu1 %vm13524_vm12, %v5280_v0  ;;  %v5636_v0 = vshrl.u32 %v5583_v46, 16  ;;  %vm13543_vm12 = vmmov %vm13509_vm0  ;;  %v5732_v46 = vshrl.u32 %v5599_v25, 16  ;;  %v5722_v14 = vrot.slane %v5720_v26, 7  ;;  %v6294_v25 = vld [vmem:[#allocation3 + $0x70] sm:$0x1] }
 0x5ac   : > { %9588 = vmatprep.mubr.msk.bf16.mxu1 %vm13527_vm14, %v5292_v20  ;;  %v5587_v20 = vld [vmem:[#allocation3 + $0x78] sm:$0x80]  ;;  %vm13545_vm14 = vmmov %vm13509_vm0  ;;  %v6296_v26 = vld [vmem:[#allocation3 + $0x88] sm:$0x1] }
 0x5ad   : > { %v5638_v48 = vrot.slane %v5636_v0, 7  ;;  %v5660_v60 = vshrl.u32 %v5587_v20, 16  ;;  %v5730_v0 = vsel %vm13538_vm1, %v5722_v14, %v12294_v59  ;;  %v5605_v20 = vld [vmem:[#allocation3 + $0x150] sm:$0x80] }
 0x5af   : > { %v5646_v16 = vsel %vm13540_vm5, %v5638_v48, %v12223_v13  ;;  %v5662_v3 = vrot.slane %v5660_v60, 7  ;;  %vm13554_vm5 = vmmov %vm13538_vm1 }
 0x5b1   : > { %v5670_v13 = vsel %vm13544_vm13, %v5662_v3, %v12245_v7  ;;  %vm13558_vm13 = vmmov %vm13538_vm1  ;;  %v5609_v3 = vld [vmem:[#allocation3 + $0x180] sm:$0x80] }
 0x5b2   : > { %v5792_v23 = vshrl.u32 %v5609_v3, 16 }
 0x5b3   : > { %9589 = vmatmul.mubr.msk.bf16.gmra.mrb[24].mxu1 %vm13531_vm9, %v5304_v49  ;;  %v5593_v49 = vld [vmem:[#allocation3 + $0xc0] sm:$0x80]  ;;  %vm13547_vm9 = vmmov %vm13509_vm0 }
 0x5b4   : > { %9592 = vmatprep.mubr.msk.bf16.mxu1 %vm13533_vm10, %v5316_v31  ;;  %v5696_v31 = vshrl.u32 %v5593_v49, 16  ;;  %vm13549_vm10 = vmmov %vm13509_vm0 }
 0x5b6   : > { %v5698_v7 = vrot.slane %v5696_v31, 7  ;;  %v12571_v31 = vld [vmem:[#allocation3 + $0x80] sm:$0xff] }
 0x5b8   : > { %v5706_v4 = vsel %vm13550_vm11, %v5698_v7, %v12272_v8  ;;  %vm13566_vm11 = vmmov %vm13538_vm1  ;;  %v6358_v7 = vshll.u32 %v12567_v21, 16 }
 0x5ba   : > { %v6360_v14 = vrot.slane %v6358_v7, 1 }
 0x5bb   : > { %9593 = vmatmul.mubr.msk.bf16.gmra.mrb[28].mxu1 %vm13509_vm0, %v5328_v52  ;;  %v5734_v52 = vrot.slane %v5732_v46, 7 }
 0x5bc   : > { %9598 = vmatprep.mubr.msk.bf16.mxu1 %vm13537_vm4, %v5622_v35  ;;  %vm13552_vm4 = vmmov %vm13509_vm0  ;;  %v5603_v35 = vld [vmem:[#allocation3 + $0x138] sm:$0x80] }
 0x5bd   : > { %v5742_v8 = vsel %vm13554_vm5, %v5734_v52, %v12311_v6  ;;  %v5756_v48 = vshrl.u32 %v5603_v35, 16  ;;  %vm13571_vm5 = vmmov %vm13509_vm0  ;;  %v6363_v52 = vshll.u32 %v6294_v25, 16 }
 0x5bf   : > { %v5758_v62 = vrot.slane %v5756_v48, 7  ;;  %v12602_v48 = vld [vmem:[#allocation3 + $0xb0] sm:$0xff] }
 0x5c1   : > { %v5766_v59 = vsel %vm13558_vm13, %v5758_v62, %v12333_v43  ;;  %v5794_v43 = vrot.slane %v5792_v23, 7  ;;  %vm13575_vm13 = vmmov %vm13509_vm0 }
 0x5c3   : > { %9599 = vmatmul.mubr.msk.bf16.vlgmr.msra.gmra.mrb[0].mxu1 %vm13539_vm15, %v5634_v34  ;;  %vm13553_vm15 = vmmov %vm13509_vm0  ;;  %v5607_v34 = vld [vmem:[#allocation3 + $0x168] sm:$0x80] }
 0x5c4   : > { %9631 = vmatpush3.bf16.msra.mxu1 %v12373_v5  ;;  %9602 = vmatprep.mubr.msk.bf16.mxu1 %vm13541_vm6, %v5646_v16  ;;  %v5674_v5 = vrot.slane %v5672_v15, 7  ;;  %vm13555_vm6 = vmmov %vm13509_vm0  ;;  %v5768_v16 = vshrl.u32 %v5605_v20, 16  ;;  %v5780_v60 = vshrl.u32 %v5607_v34, 16  ;;  %v6365_v20 = vrot.slane %v6363_v52, 1 }
 0x5c5   : > { %9664 = vmatprep.subr.bf16.mxu1 %v12465_v53 }
 0x5c6   : > { %v5682_v54 = vsel %vm13546_vm8, %v5674_v5, %v12250_v12  ;;  %v5718_v12 = vsel %vm13551_vm3, %v5710_v47, %v12289_v2  ;;  %v5746_v2 = vrot.slane %v5744_v44, 7  ;;  %v5770_v6 = vrot.slane %v5768_v16, 7  ;;  %vm13560_vm8 = vmmov %vm13538_vm1  ;;  %v12598_v44 = vld [vmem:[#allocation3 + $0x98] sm:$0xff] }
 0x5c7   : > { %v5782_v39 = vrot.slane %v5780_v60, 7  ;;  %vm13567_vm3 = vmmov %vm13509_vm0  ;;  %v6382_v34 = vshll.u32 %v12598_v44, 16  ;;  %v6394_v60 = vshll.u32 %v12602_v48, 16 }
 0x5c8   : > { %v5754_v45 = vsel %vm13556_vm7, %v5746_v2, %v12316_v42  ;;  %v5778_v55 = vsel %vm13560_vm8, %v5770_v6, %v12338_v9  ;;  %v10357_v9 = vld [vmem:[%s13328_s4 + $0x30] sm:$0xff]   ;;  %vm13569_vm1 = vmmov %vm13509_vm0  ;;  %v6368_v2 = vshrl.u32 %v12571_v31, 16  ;;  %v6300_v6 = vld [vmem:[#allocation3 + $0xb8] sm:$0x1] }
 0x5c9   : > { %v5790_v42 = vsel %vm13563_vm2, %v5782_v39, %v12355_v33  ;;  %vm13573_vm7 = vmmov %vm13509_vm0  ;;  %v6292_v33 = vld [vmem:[#allocation3 + $0x58] sm:$0x1]  ;;  %v6384_v3 = vrot.slane %v6382_v34, 1 }
 0x5ca   : > { %vm13577_vm8 = vmmov %vm13509_vm0  ;;  %v6351_v49 = vshll.u32 %v6292_v33, 16 }
 0x5cb   : > { %9603 = vmatmul.mubr.msk.bf16.gmra.mrb[4].mxu1 %vm13543_vm12, %v5658_v1  ;;  %vm13557_vm12 = vmmov %vm13509_vm0  ;;  %v13561_v1 = vshrl.u32 %v12155_v22, 16 }
 0x5cc   : > { %9606 = vmatprep.mubr.msk.bf16.mxu1 %vm13545_vm14, %v5670_v13  ;;  %vm13559_vm14 = vmmov %vm13509_vm0  ;;  %v13565_v13 = vshll.u32 %v12155_v22, 16  ;;  %v6353_v19 = vrot.slane %v6351_v49, 1 }
 0x5cd   : > { %v5798_v15 = vrot.slane %v13561_v1, 7  ;;  %vm13579_vm2 = vmmov %vm13509_vm0  ;;  %v6396_v1 = vrot.slane %v6394_v60, 1 }
 0x5cf   : > { %v12515_v40 = vor.u32 %v13565_v13, %v5798_v15  ;;  %v6399_v15 = vshll.u32 %v6300_v6, 16  ;;  %v12629_v13 = vld [vmem:[#allocation3 + $0xe0] sm:$0xff] }
 0x5d1   : > { %v5802_v5 = vsel %vm13566_vm11, %v5794_v43, %v12515_v40  ;;  %vm13581_vm11 = vmmov %vm13509_vm0  ;;  %v6380_v43 = vshrl.u32 %v12598_v44, 16 }
 0x5d3   : > { %9607 = vmatmul.mubr.msk.bf16.gmra.mrb[8].mxu1 %vm13547_vm9, %v5682_v54  ;;  %vm13562_vm9 = vmmov %vm13509_vm0 }
 0x5d4   : > { %9610 = vmatprep.mubr.msk.bf16.mxu1 %vm13549_vm10, %v5694_v57  ;;  %vm13564_vm10 = vmmov %vm13509_vm0 }
 0x5db   : > { %9611 = vmatmul.mubr.msk.bf16.gmra.mrb[12].mxu1 %vm13509_vm0, %v5706_v4  ;;  %v6370_v4 = vshll.u32 %v12571_v31, 16 }
 0x5dc   : > { %9614 = vmatprep.mubr.msk.bf16.mxu1 %vm13552_vm4, %v5718_v12  ;;  %vm13568_vm4 = vmmov %vm13509_vm0  ;;  %v12587_v12 = vld [vmem:[%s13328_s4 + $0x38] sm:$0xff]  }
 0x5dd   : > { %v6372_v35 = vrot.slane %v6370_v4, 1 }
 0x5e3   : > { %9615 = vmatmul.mubr.msk.bf16.gmra.mrb[16].mxu1 %vm13553_vm15, %v5730_v0  ;;  %vm13570_vm15 = vmmov %vm13509_vm0  ;;  %v6375_v0 = vshll.u32 %v6296_v26, 16 }
 0x5e4   : > { %9618 = vmatprep.mubr.msk.bf16.mxu1 %vm13555_vm6, %v5742_v8  ;;  %vm13572_vm6 = vmmov %vm13509_vm0  ;;  %v6356_v8 = vshrl.u32 %v12567_v21, 16 }
 0x5e5   : > { %v6377_v16 = vrot.slane %v6375_v0, 1  ;;  %v6308_v0 = vld [vmem:[#allocation3 + $0x118] sm:$0x1] }
 0x5e6   : > { %v12608_v62 = vor.u32 %v6360_v14, %v6356_v8 }
 0x5eb   : > { %9619 = vmatmul.mubr.msk.bf16.gmra.mrb[20].mxu1 %vm13557_vm12, %v5754_v45  ;;  %vm13574_vm12 = vmmov %vm13509_vm0  ;;  %v12613_v45 = vor.u32 %v6372_v35, %v6368_v2 }
 0x5ec   : > { %9622 = vmatprep.mubr.msk.bf16.mxu1 %vm13559_vm14, %v5766_v59  ;;  %vm13576_vm14 = vmmov %vm13509_vm0  ;;  %v6298_v59 = vld [vmem:[#allocation3 + $0xa0] sm:$0x1] }
 0x5f3   : > { %9623 = vmatmul.mubr.msk.bf16.gmra.mrb[24].mxu1 %vm13562_vm9, %v5778_v55  ;;  %vm13578_vm9 = vmmov %vm13509_vm0  ;;  %v6387_v55 = vshll.u32 %v6298_v59, 16 }
 0x5f4   : > { %9626 = vmatprep.mubr.msk.bf16.mxu1 %vm13564_vm10, %v5790_v42  ;;  %vm13580_vm10 = vmmov %vm13509_vm0  ;;  %v12625_v42 = vld [vmem:[#allocation3 + $0xc8] sm:$0xff] }
 0x5f5   : > { %v6404_v49 = vshrl.u32 %v12625_v42, 16 }
 0x5fb   : > { %9627 = vmatmul.mubr.msk.bf16.gmra.mrb[28].mxu1 %vm13509_vm0, %v5802_v5  ;;  %v6392_v5 = vshrl.u32 %v12602_v48, 16 }
 0x5fc   : > { %9632 = vmatprep.mubr.msk.bf16.mxu1 %vm13567_vm3, %v12104_v10  ;;  %v6287_v10 = vld [vmem:[#allocation3 + $0x20] sm:$0xff]  ;;  %vm13582_vm3 = vsmask.f32 7424 }
 0x603   : > { %9633 = vmatmul.mubr.msk.bf16.vlgmr.msra.gmra.mrb[0].mxu1 %vm13568_vm4, %v12108_v17  ;;  %v6322_v17 = vshll.u32 %v6287_v10, 16  ;;  %vm13583_vm4 = vmmov %vm13509_vm0 }
 0x604   : > { %9665 = vmatpush3.bf16.msra.mxu1 %v12465_v53  ;;  %9636 = vmatprep.mubr.msk.bf16.mxu1 %vm13569_vm1, %v12114_v61  ;;  %v6288_v61 = vld [vmem:[#allocation3 + $0x28] sm:$0x1]  ;;  %vm13584_vm1 = vmmov %vm13582_vm3 }
 0x605   : > { %9698 = vmatprep.subr.bf16.mxu1 %v10357_v9 }
 0x60b   : > { %9637 = vmatmul.mubr.msk.bf16.gmra.mrb[4].mxu1 %vm13570_vm15, %v12118_v58  ;;  %v6324_v58 = vrot.slane %v6322_v17, 1  ;;  %vm13585_vm15 = vmmov %vm13509_vm0  ;;  %v6406_v17 = vshll.u32 %v12625_v42, 16 }
 0x60c   : > { %9640 = vmatprep.mubr.msk.bf16.mxu1 %vm13571_vm5, %v12122_v56  ;;  %v6327_v56 = vshll.u32 %v6288_v61, 16  ;;  %vm13586_vm5 = vmmov %vm13584_vm1  ;;  %v12639_v61 = vor.u32 %v6396_v1, %v6392_v5  ;;  %v12681_v1 = vld [vmem:[#allocation3 + $0x140] sm:$0xff] }
 0x613   : > { %9641 = vmatmul.mubr.msk.bf16.gmra.mrb[8].mxu1 %vm13572_vm6, %v12126_v11  ;;  %v12552_v11 = vld [vmem:[#allocation3 + $0x38] sm:$0xff]  ;;  %vm13587_vm6 = vmmov %vm13509_vm0 }
 0x614   : > { %9644 = vmatprep.mubr.msk.bf16.mxu1 %vm13573_vm7, %v12130_v50  ;;  %v12556_v50 = vld [vmem:[#allocation3 + $0x50] sm:$0xff]  ;;  %v6332_v54 = vshrl.u32 %v12552_v11, 16  ;;  %vm13588_vm7 = vmmov %vm13584_vm1 }
 0x615   : > { %v6344_v57 = vshrl.u32 %v12556_v50, 16  ;;  %v6366_v39 = vsel %vm13588_vm7, %v12608_v62, %v6365_v20  ;;  %vm13602_vm7 = vmmov %vm13584_vm1 }
 0x61b   : > { %9645 = vmatmul.mubr.msk.bf16.gmra.mrb[12].mxu1 %vm13574_vm12, %v12134_v32  ;;  %v6320_v32 = vshrl.u32 %v6287_v10, 16  ;;  %vm13589_vm12 = vmmov %vm13509_vm0  ;;  %v6389_v10 = vrot.slane %v6387_v55, 1  ;;  %v12677_v55 = vld [vmem:[#allocation3 + $0x128] sm:$0xff] }
 0x61c   : > { %9648 = vmatprep.mubr.msk.bf16.mxu1 %vm13575_vm13, %v12138_v28  ;;  %v6334_v28 = vshll.u32 %v12552_v11, 16  ;;  %vm13590_vm13 = vmmov %vm13584_vm1 }
 0x61d   : > { %v6378_v23 = vsel %vm13590_vm13, %v12613_v45, %v6377_v16  ;;  %vm13604_vm13 = vmmov %vm13584_vm1 }
 0x623   : > { %9649 = vmatmul.mubr.msk.bf16.gmra.mrb[16].mxu1 %vm13576_vm14, %v12142_v18  ;;  %v6325_v18 = vor.u32 %v6324_v58, %v6320_v32  ;;  %vm13591_vm14 = vmmov %vm13509_vm0  ;;  %v6401_v58 = vrot.slane %v6399_v15, 1  ;;  %v6418_v32 = vshll.u32 %v12629_v13, 16 }
 0x624   : > { %9652 = vmatprep.mubr.msk.bf16.mxu1 %vm13577_vm8, %v12146_v63  ;;  %v6329_v63 = vrot.slane %v6327_v56, 1  ;;  %v6302_v56 = vld [vmem:[#allocation3 + $0xd0] sm:$0x1]  ;;  %vm13592_vm8 = vmmov %vm13584_vm1 }
 0x625   : > { %v6411_v33 = vshll.u32 %v6302_v56, 16  ;;  %v13380_v56 = vshll.u32 %v12677_v55, 16 }
 0x627   : > { %v6413_v26 = vrot.slane %v6411_v33, 1  ;;  %v13379_v33 = vshll.u32 %v12681_v1, 16 }
 0x62b   : > { %9653 = vmatmul.mubr.msk.bf16.gmra.mrb[20].mxu1 %vm13578_vm9, %v12150_v30  ;;  %v6290_v30 = vld [vmem:[#allocation3 + $0x40] sm:$0x1]  ;;  %vm13593_vm9 = vmmov %vm13509_vm0 }
 0x62c   : > { %9656 = vmatprep.mubr.msk.bf16.mxu1 %vm13579_vm2, %v12160_v29  ;;  %v6346_v29 = vshll.u32 %v12556_v50, 16  ;;  %v6339_v53 = vshll.u32 %v6290_v30, 16  ;;  %v6408_v30 = vrot.slane %v6406_v17, 1  ;;  %vm13594_vm2 = vmmov %vm13584_vm1 }
 0x62e   : > { %v6348_v38 = vrot.slane %v6346_v29, 1  ;;  %v12660_v25 = vor.u32 %v6408_v30, %v6404_v49  ;;  %v6310_v30 = vld [vmem:[#allocation3 + $0x130] sm:$0x1] }
 0x630   : > { %v12581_v47 = vor.u32 %v6348_v38, %v6344_v57  ;;  %v12651_v38 = vld [vmem:[#allocation3 + $0xf8] sm:$0xff] }
 0x632   : > { %v6354_v51 = vsel %vm13586_vm5, %v12581_v47, %v6353_v19  ;;  %v6416_v19 = vshrl.u32 %v12629_v13, 16  ;;  %vm13600_vm5 = vmmov %vm13584_vm1 }
 0x633   : > { %9657 = vmatmul.mubr.msk.bf16.gmra.mrb[24].mxu1 %vm13580_vm10, %v12165_v41  ;;  %v6336_v41 = vrot.slane %v6334_v28, 1  ;;  %vm13595_vm10 = vmmov %vm13509_vm0 }
 0x634   : > { %9660 = vmatprep.mubr.msk.bf16.mxu1 %vm13581_vm11, %v12183_v27  ;;  %v6330_v27 = vsel %vm13582_vm3, %v6325_v18, %v6329_v63  ;;  %v6304_v18 = vld [vmem:[#allocation3 + $0xe8] sm:$0x1]  ;;  %vm13596_vm11 = vmmov %vm13584_vm1 }
 0x635   : > { %v12576_v37 = vor.u32 %v6336_v41, %v6332_v54  ;;  %v6402_v41 = vsel %vm13594_vm2, %v12639_v61, %v6401_v58  ;;  %v6414_v20 = vsel %vm13596_vm11, %v12660_v25, %v6413_v26  ;;  %vm13597_vm3 = vmmov %vm13584_vm1  ;;  %v6459_v26 = vshll.u32 %v6310_v30, 16 }
 0x636   : > { %vm13608_vm2 = vmmov %vm13584_vm1 }
 0x637   : > { %vm13610_vm11 = vmmov %vm13584_vm1 }
 0x63b   : > { %9661 = vmatmul.mubr.msk.bf16.gmra.mrb[28].mxu1 %vm13509_vm0, %v12155_v22  ;;  %v6341_v22 = vrot.slane %v6339_v53, 1  ;;  %v6420_v53 = vrot.slane %v6418_v32, 1 }
 0x63c   : > { %9666 = vmatprep.mubr.msk.bf16.mxu1 %vm13583_vm4, %v6330_v27  ;;  %v6423_v27 = vshll.u32 %v6304_v18, 16  ;;  %vm13598_vm4 = vmmov %vm13509_vm0 }
 0x63d   : > { %v6342_v46 = vsel %vm13584_vm1, %v12576_v37, %v6341_v22  ;;  %v12655_v22 = vld [vmem:[#allocation3 + $0x110] sm:$0xff]  ;;  %v12665_v14 = vor.u32 %v6420_v53, %v6416_v19 }
 0x63e   : > { %v6425_v52 = vrot.slane %v6423_v27, 1  ;;  %v13382_v35 = vshll.u32 %v12655_v22, 16  ;;  %v13386_v15 = vshrl.u32 %v12655_v22, 16  ;;  %v6456_v27 = vrot.slane %v13380_v56, 1 }
 0x640   : > { %v6426_v6 = vsel %vm13597_vm3, %v12665_v14, %v6425_v52  ;;  %vm13611_vm3 = vsmask.f32 256 }
 0x643   : > { %9667 = vmatmul.mubr.msk.bf16.vlgmr.msra.gmra.mrb[0].mxu1 %vm13585_vm15, %v6342_v46  ;;  %v6430_v46 = vshll.u32 %v12651_v38, 16  ;;  %vm13599_vm15 = vmmov %vm13509_vm0 }
 0x644   : > { %9699 = vmatpush3.bf16.msra.mxu1 %v10357_v9  ;;  %9670 = vmatprep.mubr.msk.bf16.mxu1 %vm13587_vm6, %v6354_v51  ;;  %v12634_v9 = vor.u32 %v6384_v3, %v6380_v43  ;;  %v6306_v51 = vld [vmem:[#allocation3 + $0x100] sm:$0x1]  ;;  %v6447_v3 = vshll.u32 %v6308_v0, 16  ;;  %vm13601_vm6 = vmmov %vm13509_vm0 }
 0x645   : > { %9732 = vmatprep.subr.bf16.mxu1 %v12587_v12  ;;  %v6432_v16 = vrot.slane %v6430_v46, 1  ;;  %v6435_v59 = vshll.u32 %v6306_v51, 16  ;;  %v6468_v51 = vrot.slane %v13379_v33, 1 }
 0x646   : > { %v6390_v63 = vsel %vm13592_vm8, %v12634_v9, %v6389_v10  ;;  %vm13606_vm8 = vmmov %vm13584_vm1 }
 0x647   : > { %v6437_v58 = vrot.slane %v6435_v59, 1  ;;  %v12707_v59 = vld [vmem:[#allocation3 + $0x170] sm:$0xff] }
 0x64b   : > { %9671 = vmatmul.mubr.msk.bf16.gmra.mrb[4].mxu1 %vm13589_vm12, %v6366_v39  ;;  %v6444_v39 = vrot.slane %v13382_v35, 1  ;;  %vm13603_vm12 = vmmov %vm13509_vm0  ;;  %v13387_v35 = vshrl.u32 %v12707_v59, 16 }
 0x64c   : > { %9674 = vmatprep.mubr.msk.bf16.mxu1 %vm13591_vm14, %v6378_v23  ;;  %v6428_v23 = vshrl.u32 %v12651_v38, 16  ;;  %vm13605_vm14 = vmmov %vm13509_vm0 }
 0x64d   : > { %v12691_v18 = vor.u32 %v6444_v39, %v13386_v15 }
 0x64e   : > { %v12686_v10 = vor.u32 %v6432_v16, %v6428_v23  ;;  %v13384_v16 = vshrl.u32 %v12677_v55, 16 }
 0x650   : > { %v6438_v53 = vsel %vm13584_vm1, %v12686_v10, %v6437_v58  ;;  %v12712_v39 = vor.u32 %v6456_v27, %v13384_v16  ;;  %v6762_v16 = vld [vmem:[#allocation3 + $0x30] sm:$0x80]  ;;  %vm13613_vm1 = vmmov %vm13611_vm3 }
 0x651   : > { %v6795_v15 = vshrl.u32 %v6762_v16, 16 }
 0x653   : > { %9675 = vmatmul.mubr.msk.bf16.gmra.mrb[8].mxu1 %vm13593_vm9, %v6390_v63  ;;  %v6449_v63 = vrot.slane %v6447_v3, 1  ;;  %v6461_v3 = vrot.slane %v6459_v26, 1  ;;  %vm13607_vm9 = vmmov %vm13509_vm0 }
 0x654   : > { %9678 = vmatprep.mubr.msk.bf16.mxu1 %vm13595_vm10, %v6402_v41  ;;  %v6312_v41 = vld [vmem:[#allocation3 + $0x148] sm:$0x1]  ;;  %vm13609_vm10 = vmmov %vm13509_vm0 }
 0x655   : > { %v6450_v52 = vsel %vm13600_vm5, %v12691_v18, %v6449_v63  ;;  %v6471_v0 = vshll.u32 %v6312_v41, 16  ;;  %v6314_v41 = vld [vmem:[#allocation3 + $0x160] sm:$0x1]  ;;  %v6462_v33 = vsel %vm13602_vm7, %v12712_v39, %v6461_v3  ;;  %vm13615_vm5 = vmmov %vm13613_vm1 }
 0x656   : > { %v6483_v27 = vshll.u32 %v6314_v41, 16  ;;  %vm13617_vm7 = vmmov %vm13613_vm1 }
 0x657   : > { %v6473_v30 = vrot.slane %v6471_v0, 1 }
 0x658   : > { %v6485_v41 = vrot.slane %v6483_v27, 1 }
 0x65b   : > { %9679 = vmatmul.mubr.msk.bf16.gmra.mrb[12].mxu1 %vm13509_vm0, %v6414_v20  ;;  %v12703_v20 = vld [vmem:[#allocation3 + $0x158] sm:$0xff] }
 0x65c   : > { %9682 = vmatprep.mubr.msk.bf16.mxu1 %vm13598_vm4, %v6426_v6  ;;  %v13381_v6 = vshrl.u32 %v12681_v1, 16  ;;  %v13383_v58 = vshll.u32 %v12703_v20, 16  ;;  %vm13612_vm4 = vmmov %vm13509_vm0 }
 0x65e   : > { %v12717_v63 = vor.u32 %v6468_v51, %v13381_v6  ;;  %v6480_v56 = vrot.slane %v13383_v58, 1  ;;  %v13388_v6 = vshrl.u32 %v12703_v20, 16  ;;  %v6318_v58 = vld [vmem:[#allocation3 + $0x190] sm:$0x1] }
 0x660   : > { %v6474_v26 = vsel %vm13604_vm13, %v12717_v63, %v6473_v30  ;;  %v12734_v3 = vor.u32 %v6480_v56, %v13388_v6  ;;  %v6801_v56 = vrot.slane %v6332_v54, 7  ;;  %v6766_v6 = vld [vmem:[#allocation3 + $0x60] sm:$0x80]  ;;  %vm13619_vm13 = vmmov %vm13613_vm1 }
 0x661   : > { %v6819_v16 = vshrl.u32 %v6766_v6, 16 }
 0x663   : > { %9683 = vmatmul.mubr.msk.bf16.gmra.mrb[16].mxu1 %vm13599_vm15, %v6438_v53  ;;  %v13385_v53 = vshll.u32 %v12707_v59, 16  ;;  %vm13614_vm15 = vmmov %vm13509_vm0 }
 0x664   : > { %9686 = vmatprep.mubr.msk.bf16.mxu1 %vm13601_vm6, %v6450_v52  ;;  %v6316_v52 = vld [vmem:[#allocation3 + $0x178] sm:$0x1]  ;;  %vm13616_vm6 = vmmov %vm13509_vm0 }
 0x665   : > { %v6492_v51 = vrot.slane %v13385_v53, 1  ;;  %v6495_v0 = vshll.u32 %v6316_v52, 16  ;;  %v6486_v52 = vsel %vm13606_vm8, %v12734_v3, %v6485_v41  ;;  %vm13621_vm8 = vmmov %vm13613_vm1 }
 0x667   : > { %v6497_v30 = vrot.slane %v6495_v0, 1  ;;  %v6804_v0 = vor.u32 %v6801_v56, %v6334_v28  ;;  %v6837_v56 = vrot.slane %v6368_v2, 7 }
 0x66b   : > { %9687 = vmatmul.mubr.msk.bf16.gmra.mrb[20].mxu1 %vm13603_vm12, %v6462_v33  ;;  %v12738_v33 = vor.u32 %v6492_v51, %v13387_v35  ;;  %v6797_v51 = vrot.slane %v6795_v15, 7  ;;  %v6764_v35 = vld [vmem:[#allocation3 + $0x48] sm:$0x80]  ;;  %v6825_v15 = vrot.slane %v6356_v8, 7  ;;  %vm13618_vm12 = vmmov %vm13509_vm0 }
 0x66c   : > { %9690 = vmatprep.mubr.msk.bf16.mxu1 %vm13605_vm14, %v6474_v26  ;;  %v6507_v26 = vshll.u32 %v6318_v58, 16  ;;  %v6807_v41 = vshrl.u32 %v6764_v35, 16  ;;  %v6768_v35 = vld [vmem:[#allocation3 + $0x78] sm:$0x80]  ;;  %vm13620_vm14 = vmmov %vm13509_vm0 }
 0x66d   : > { %v6498_v53 = vsel %vm13608_vm2, %v12738_v33, %v6497_v30  ;;  %v6813_v30 = vrot.slane %v6344_v57, 7  ;;  %v6805_v54 = vsel %vm13611_vm3, %v6797_v51, %v6804_v0  ;;  %v6770_v57 = vld [vmem:[#allocation3 + $0x90] sm:$0x80]  ;;  %v6831_v8 = vshrl.u32 %v6768_v35, 16  ;;  %vm13623_vm2 = vmmov %vm13613_vm1 }
 0x66e   : > { %v6509_v27 = vrot.slane %v6507_v26, 1  ;;  %v6809_v28 = vrot.slane %v6807_v41, 7  ;;  %v12766_v26 = vld [vmem:[%s13328_s4 + $0x40] sm:$0xff]   ;;  %v6840_v0 = vor.u32 %v6837_v56, %v6370_v4  ;;  %v6772_v41 = vld [vmem:[#allocation3 + $0xa8] sm:$0x80]  ;;  %v6873_v4 = vrot.slane %v6404_v49, 7  ;;  %vm13627_vm3 = vmmov %vm13613_vm1 }
 0x66f   : > { %v6833_v51 = vrot.slane %v6831_v8, 7 }
 0x670   : > { %v6510_v58 = vsel %vm13610_vm11, %v12178_v36, %v6509_v27  ;;  %v6828_v36 = vor.u32 %v6825_v15, %v6358_v7  ;;  %v6843_v27 = vshrl.u32 %v6770_v57, 16  ;;  %v6849_v7 = vrot.slane %v6380_v43, 7  ;;  %vm13625_vm11 = vmmov %vm13613_vm1 }
 0x672   : > { %v6852_v2 = vor.u32 %v6849_v7, %v6382_v34  ;;  %v6780_v7 = vld [vmem:[#allocation3 + $0x108] sm:$0x80] }
 0x673   : > { %9691 = vmatmul.mubr.msk.bf16.gmra.mrb[24].mxu1 %vm13607_vm9, %v6486_v52  ;;  %v6821_v52 = vrot.slane %v6819_v16, 7  ;;  %v6855_v16 = vshrl.u32 %v6772_v41, 16  ;;  %vm13622_vm9 = vmmov %vm13509_vm0 }
 0x674   : > { %9694 = vmatprep.mubr.msk.bf16.mxu1 %vm13609_vm10, %v6498_v53  ;;  %v6816_v53 = vor.u32 %v6813_v30, %v6346_v29  ;;  %v6774_v30 = vld [vmem:[#allocation3 + $0xc0] sm:$0x80]  ;;  %vm13624_vm10 = vmmov %vm13509_vm0 }
 0x675   : > { %v6829_v29 = vsel %vm13615_vm5, %v6821_v52, %v6828_v36  ;;  %v6867_v15 = vshrl.u32 %v6774_v30, 16  ;;  %v6876_v52 = vor.u32 %v6873_v4, %v6406_v17  ;;  %v6776_v36 = vld [vmem:[#allocation3 + $0xd8] sm:$0x80]  ;;  %v13628_v30 = vshrl.u32 %v12677_v55, 16  ;;  %vm13634_vm5 = vmmov %vm13613_vm1 }
 0x676   : > { %v6817_v6 = vsel %vm13613_vm1, %v6809_v28, %v6816_v53  ;;  %v6857_v28 = vrot.slane %v6855_v16, 7  ;;  %v6879_v57 = vshrl.u32 %v6776_v36, 16  ;;  %v6784_v4 = vld [vmem:[#allocation3 + $0x138] sm:$0x80] }
 0x677   : > { %v6869_v53 = vrot.slane %v6867_v15, 7 }
 0x678   : > { %v6881_v56 = vrot.slane %v6879_v57, 7  ;;  %v13635_v57 = vshrl.u32 %v12703_v20, 16 }
 0x679   : > { %v6877_v49 = vsel %vm13623_vm2, %v6869_v53, %v6876_v52  ;;  %v6927_v53 = vshrl.u32 %v6784_v4, 16  ;;  %v13632_v52 = vshrl.u32 %v12681_v1, 16  ;;  %vm13647_vm2 = vmmov %vm13613_vm1 }
 0x67b   : > { %9695 = vmatmul.mubr.msk.bf16.gmra.mrb[28].mxu1 %vm13509_vm0, %v6510_v58  ;;  %v6845_v58 = vrot.slane %v6843_v27, 7  ;;  %v6933_v36 = vrot.slane %v13632_v52, 7 }
 0x67c   : > { %9700 = vmatprep.mubr.msk.bf16.mxu1 %vm13612_vm4, %v6805_v54  ;;  %v6841_v54 = vsel %vm13617_vm7, %v6833_v51, %v6840_v0  ;;  %v6903_v0 = vshrl.u32 %v6780_v7, 16  ;;  %vm13629_vm4 = vmmov %vm13509_vm0  ;;  %v6790_v7 = vld [vmem:[#allocation3 + $0x180] sm:$0x80] }
 0x67d   : > { %v6853_v43 = vsel %vm13619_vm13, %v6845_v58, %v6852_v2  ;;  %v13626_v58 = vshrl.u32 %v12655_v22, 16  ;;  %vm13639_vm7 = vmmov %vm13613_vm1 }
 0x67e   : > { %vm13642_vm13 = vmmov %vm13613_vm1 }
 0x67f   : > { %v6909_v2 = vrot.slane %v13626_v58, 7  ;;  %v13640_v58 = vshrl.u32 %v12707_v59, 16 }
 0x683   : > { %9701 = vmatmul.mubr.msk.bf16.vlgmr.msra.gmra.mrb[0].mxu1 %vm13614_vm15, %v6817_v6  ;;  %v6885_v6 = vrot.slane %v6416_v19, 7  ;;  %v6782_v19 = vld [vmem:[#allocation3 + $0x120] sm:$0x80]  ;;  %vm13633_vm15 = vmmov %vm13509_vm0 }
 0x684   : > { %9733 = vmatpush3.bf16.msra.mxu1 %v12587_v12  ;;  %9704 = vmatprep.mubr.msk.bf16.mxu1 %vm13616_vm6, %v6829_v29  ;;  %v6861_v12 = vrot.slane %v6392_v5, 7  ;;  %v6778_v5 = vld [vmem:[#allocation3 + $0xf0] sm:$0x80]  ;;  %v6915_v41 = vshrl.u32 %v6782_v19, 16  ;;  %vm13636_vm6 = vmmov %vm13509_vm0  ;;  %v12830_v19 = vld [vmem:[#allocation3 + $0x1a0] sm:$0xff] }
 0x685   : > { %9766 = vmatprep.subr.bf16.mxu1 %v12766_v26  ;;  %v6891_v8 = vshrl.u32 %v6778_v5, 16  ;;  %v6888_v17 = vor.u32 %v6885_v6, %v6418_v32  ;;  %v6921_v32 = vrot.slane %v13628_v30, 7  ;;  %v6945_v6 = vrot.slane %v13635_v57, 7  ;;  %v7481_v57 = vld [vmem:[#allocation3 + $0xb8] sm:$0x1] }
 0x686   : > { %v6864_v34 = vor.u32 %v6861_v12, %v6394_v60  ;;  %v6897_v60 = vrot.slane %v6428_v23, 7  ;;  %v6917_v12 = vrot.slane %v6915_v41, 7  ;;  %v6963_v41 = vshrl.u32 %v6790_v7, 16 }
 0x687   : > { %v6893_v29 = vrot.slane %v6891_v8, 7  ;;  %v6889_v51 = vsel %vm13625_vm11, %v6881_v56, %v6888_v17  ;;  %v13637_v8 = vshll.u32 %v12681_v1, 16  ;;  %v13638_v17 = vshll.u32 %v12703_v20, 16  ;;  %vm13649_vm11 = vmmov %vm13613_vm1 }
 0x688   : > { %v6865_v35 = vsel %vm13621_vm8, %v6857_v28, %v6864_v34  ;;  %v6900_v27 = vor.u32 %v6897_v60, %v6430_v46  ;;  %v13630_v46 = vshll.u32 %v12655_v22, 16  ;;  %v6786_v28 = vld [vmem:[#allocation3 + $0x150] sm:$0x80]  ;;  %v6979_v30 = vshrl.u32 %v12830_v19, 16  ;;  %vm13645_vm8 = vmmov %vm13613_vm1 }
 0x689   : > { %v6936_v60 = vor.u32 %v6933_v36, %v13637_v8  ;;  %v6982_v4 = vshll.u32 %v12830_v19, 16  ;;  %v7570_v8 = vshll.u32 %v7481_v57, 16 }
 0x68a   : > { %v6901_v23 = vsel %vm13627_vm3, %v6893_v29, %v6900_v27  ;;  %v6912_v16 = vor.u32 %v6909_v2, %v13630_v46  ;;  %v6948_v29 = vor.u32 %v6945_v6, %v13638_v17  ;;  %v6788_v27 = vld [vmem:[#allocation3 + $0x168] sm:$0x80]  ;;  %v6957_v2 = vrot.slane %v13640_v58, 7  ;;  %vm13650_vm3 = vmmov %vm13509_vm0  ;;  %v7483_v6 = vld [vmem:[#allocation3 + $0xd0] sm:$0x1] }
 0x68b   : > { %9705 = vmatmul.mubr.msk.bf16.gmra.mrb[4].mxu1 %vm13618_vm12, %v6841_v54  ;;  %v6905_v54 = vrot.slane %v6903_v0, 7  ;;  %v6951_v0 = vshrl.u32 %v6788_v27, 16  ;;  %vm13641_vm12 = vmmov %vm13509_vm0  ;;  %v13644_v46 = vshll.u32 %v12707_v59, 16  ;;  %v7485_v17 = vld [vmem:[#allocation3 + $0xe8] sm:$0x1] }
 0x68c   : > { %9708 = vmatprep.mubr.msk.bf16.mxu1 %vm13620_vm14, %v6853_v43  ;;  %v13631_v43 = vshll.u32 %v12677_v55, 16  ;;  %vm13643_vm14 = vmmov %vm13509_vm0  ;;  %v7594_v7 = vshll.u32 %v7485_v17, 16  ;;  %v7489_v58 = vld [vmem:[#allocation3 + $0x118] sm:$0x1] }
 0x68d   : > { %v6913_v34 = vsel %vm13613_vm1, %v6905_v54, %v6912_v16  ;;  %v6953_v54 = vrot.slane %v6951_v0, 7  ;;  %v6960_v16 = vor.u32 %v6957_v2, %v13644_v46  ;;  %vm13652_vm1 = vmmov %vm13509_vm0  ;;  %v7491_v2 = vld [vmem:[#allocation3 + $0x130] sm:$0x1]  ;;  %v7493_v46 = vld [vmem:[#allocation3 + $0x148] sm:$0x1] }
 0x68e   : > { %v6924_v15 = vor.u32 %v6921_v32, %v13631_v43  ;;  %v6792_v32 = vld [vmem:[#allocation3 + $0x198] sm:$0x80] }
 0x68f   : > { %v6975_v43 = vshrl.u32 %v6792_v32, 16  ;;  %v7630_v32 = vshll.u32 %v7491_v2, 16 }
 0x690   : > { %v6925_v5 = vsel %vm13634_vm5, %v6917_v12, %v6924_v15  ;;  %v6965_v12 = vrot.slane %v6963_v41, 7  ;;  %v6981_v15 = vrot.slane %v6979_v30, 7  ;;  %vm13654_vm5 = vmmov %vm13509_vm0  ;;  %v7618_v41 = vshll.u32 %v7489_v58, 16 }
 0x692   : > { %v6984_v52 = vor.u32 %v6982_v4, %v6981_v15 }
 0x693   : > { %9709 = vmatmul.mubr.msk.bf16.gmra.mrb[8].mxu1 %vm13622_vm9, %v6865_v35  ;;  %v6939_v35 = vshrl.u32 %v6786_v28, 16  ;;  %v6961_v28 = vsel %vm13645_vm8, %v6953_v54, %v6960_v16  ;;  %vm13646_vm9 = vmmov %vm13509_vm0  ;;  %v7632_v54 = vrot.slane %v7630_v32, 1  ;;  %v7495_v16 = vld [vmem:[#allocation3 + $0x160] sm:$0x1] }
 0x694   : > { %9712 = vmatprep.mubr.msk.bf16.mxu1 %vm13624_vm10, %v6877_v49  ;;  %v6929_v49 = vrot.slane %v6927_v53, 7  ;;  %vm13648_vm10 = vmmov %vm13509_vm0  ;;  %v6977_v53 = vrot.slane %v6975_v43, 7  ;;  %v7642_v43 = vshll.u32 %v7493_v46, 16  ;;  %v7654_v15 = vshll.u32 %v7495_v16, 16 }
 0x695   : > { %v6941_v56 = vrot.slane %v6939_v35, 7  ;;  %vm13660_vm8 = vmmov %vm13509_vm0 }
 0x696   : > { %v6985_v36 = vsel %vm13649_vm11, %v6977_v53, %v6984_v52  ;;  %vm13664_vm11 = vmmov %vm13509_vm0  ;;  %v7497_v53 = vld [vmem:[#allocation3 + $0x178] sm:$0x1] }
 0x69b   : > { %9713 = vmatmul.mubr.msk.bf16.gmra.mrb[12].mxu1 %vm13509_vm0, %v6889_v51  ;;  %v6937_v51 = vsel %vm13639_vm7, %v6929_v49, %v6936_v60  ;;  %vm13656_vm7 = vmmov %vm13509_vm0  ;;  %v7582_v60 = vshll.u32 %v7483_v6, 16 }
 0x69c   : > { %9716 = vmatprep.mubr.msk.bf16.mxu1 %vm13629_vm4, %v6901_v23  ;;  %v6949_v23 = vsel %vm13642_vm13, %v6941_v56, %v6948_v29  ;;  %vm13651_vm4 = vmmov %vm13509_vm0  ;;  %v7487_v29 = vld [vmem:[#allocation3 + $0x100] sm:$0x1] }
 0x69d   : > { %vm13658_vm13 = vmmov %vm13509_vm0  ;;  %v7584_v56 = vrot.slane %v7582_v60, 1 }
 0x6a3   : > { %9717 = vmatmul.mubr.msk.bf16.gmra.mrb[16].mxu1 %vm13633_vm15, %v6913_v34  ;;  %v6973_v34 = vsel %vm13647_vm2, %v6965_v12, %v12515_v40  ;;  %vm13653_vm15 = vmmov %vm13509_vm0  ;;  %v7471_v40 = vld [vmem:[#allocation3 + $0x40] sm:$0x1] }
 0x6a4   : > { %9720 = vmatprep.mubr.msk.bf16.mxu1 %vm13636_vm6, %v6925_v5  ;;  %vm13655_vm6 = vmmov %vm13509_vm0 }
 0x6a5   : > { %vm13662_vm2 = vmmov %vm13509_vm0 }
 0x6ab   : > { %9721 = vmatmul.mubr.msk.bf16.gmra.mrb[20].mxu1 %vm13641_vm12, %v6937_v51  ;;  %vm13657_vm12 = vmmov %vm13509_vm0  ;;  %v7606_v51 = vshll.u32 %v7487_v29, 16 }
 0x6ac   : > { %9724 = vmatprep.mubr.msk.bf16.mxu1 %vm13643_vm14, %v6949_v23  ;;  %vm13659_vm14 = vmmov %vm13509_vm0 }
 0x6ad   : > { %v7608_v0 = vrot.slane %v7606_v51, 1 }
 0x6b3   : > { %9725 = vmatmul.mubr.msk.bf16.gmra.mrb[24].mxu1 %vm13646_vm9, %v6961_v28  ;;  %vm13661_vm9 = vmmov %vm13509_vm0  ;;  %v7644_v28 = vrot.slane %v7642_v43, 1 }
 0x6b4   : > { %9728 = vmatprep.mubr.msk.bf16.mxu1 %vm13648_vm10, %v6973_v34  ;;  %vm13663_vm10 = vmmov %vm13509_vm0  ;;  %v7656_v34 = vrot.slane %v7654_v15, 1 }
 0x6bb   : > { %9729 = vmatmul.mubr.msk.bf16.gmra.mrb[28].mxu1 %vm13509_vm0, %v6985_v36  ;;  %v7499_v36 = vld [vmem:[#allocation3 + $0x190] sm:$0x1] }
 0x6bc   : > { %9734 = vmatprep.mubr.msk.bf16.mxu1 %vm13650_vm3, %v12552_v11  ;;  %v7510_v11 = vshll.u32 %v7471_v40, 16  ;;  %vm13665_vm3 = vsmask.f32 7424 }
 0x6c3   : > { %9735 = vmatmul.mubr.msk.bf16.vlgmr.msra.gmra.mrb[0].mxu1 %vm13651_vm4, %v12556_v50  ;;  %v10364_v50 = vld [vmem:[#allocation3 + $0x188] sm:$0xff]  ;;  %vm13666_vm4 = vmmov %vm13509_vm0 }
 0x6c4   : > { %9767 = vmatpush3.bf16.msra.mxu1 %v12766_v26  ;;  %9738 = vmatprep.mubr.msk.bf16.mxu1 %vm13652_vm1, %v12567_v21  ;;  %v7512_v21 = vrot.slane %v7510_v11, 1  ;;  %vm13667_vm1 = vmmov %vm13665_vm3  ;;  %v7666_v11 = vshll.u32 %v7497_v53, 16 }
 0x6cb   : > { %9739 = vmatmul.mubr.msk.bf16.gmra.mrb[4].mxu1 %vm13653_vm15, %v12571_v31  ;;  %v7473_v31 = vld [vmem:[#allocation3 + $0x58] sm:$0x1]  ;;  %vm13668_vm15 = vmmov %vm13509_vm0 }
 0x6cc   : > { %9742 = vmatprep.mubr.msk.bf16.mxu1 %vm13654_vm5, %v12598_v44  ;;  %v7475_v44 = vld [vmem:[#allocation3 + $0x70] sm:$0x1]  ;;  %vm13669_vm5 = vmmov %vm13667_vm1 }
 0x6d3   : > { %9743 = vmatmul.mubr.msk.bf16.gmra.mrb[8].mxu1 %vm13655_vm6, %v12602_v48  ;;  %v7522_v48 = vshll.u32 %v7473_v31, 16  ;;  %vm13670_vm6 = vmmov %vm13509_vm0  ;;  %v7501_v31 = vld [vmem:[#allocation3 + $0x1a8] sm:$0x1] }
 0x6d4   : > { %9746 = vmatprep.mubr.msk.bf16.mxu1 %vm13656_vm7, %v12625_v42  ;;  %v7513_v42 = vsel %vm13665_vm3, %v12576_v37, %v7512_v21  ;;  %vm13671_vm7 = vmmov %vm13667_vm1 }
 0x6d5   : > { %vm13680_vm3 = vmmov %vm13667_vm1 }
 0x6db   : > { %9747 = vmatmul.mubr.msk.bf16.gmra.mrb[12].mxu1 %vm13657_vm12, %v12629_v13  ;;  %v7534_v13 = vshll.u32 %v7475_v44, 16  ;;  %vm13672_vm12 = vmmov %vm13509_vm0  ;;  %v7668_v44 = vrot.slane %v7666_v11, 1 }
 0x6dc   : > { %9750 = vmatprep.mubr.msk.bf16.mxu1 %vm13658_vm13, %v12651_v38  ;;  %v7524_v38 = vrot.slane %v7522_v48, 1  ;;  %vm13673_vm13 = vmmov %vm13667_vm1 }
 0x6e3   : > { %9751 = vmatmul.mubr.msk.bf16.gmra.mrb[16].mxu1 %vm13659_vm14, %v12655_v22  ;;  %v7536_v22 = vrot.slane %v7534_v13, 1  ;;  %vm13674_vm14 = vmmov %vm13509_vm0  ;;  %v7687_v13 = vrot.slane %v6982_v4, 1 }
 0x6e4   : > { %9754 = vmatprep.mubr.msk.bf16.mxu1 %vm13660_vm8, %v12677_v55  ;;  %v7477_v55 = vld [vmem:[#allocation3 + $0x88] sm:$0x1]  ;;  %vm13675_vm8 = vmmov %vm13667_vm1 }
 0x6e5   : > { %v7537_v26 = vsel %vm13669_vm5, %v12608_v62, %v7536_v22  ;;  %v7572_v62 = vrot.slane %v7570_v8, 1  ;;  %vm13683_vm5 = vmmov %vm13667_vm1  ;;  %v7688_v22 = vor.u32 %v7687_v13, %v6979_v30 }
 0x6e7   : > { %v7573_v27 = vsel %vm13675_vm8, %v12639_v61, %v7572_v62  ;;  %v7609_v61 = vsel %vm13680_vm3, %v12686_v10, %v7608_v0  ;;  %v7498_v10 = vld [vmem:[#allocation3 + $0x188] sm:$0xff]  ;;  %vm13689_vm8 = vmmov %vm13667_vm1  ;;  %vm8106_vm3 = vcmask 64512  }
 0x6e8   : > { %v7673_v52 = vshll.u32 %v7498_v10, 16  ;;  %v7671_v21 = vshrl.u32 %v7498_v10, 16 }
 0x6eb   : > { %9755 = vmatmul.mubr.msk.bf16.gmra.mrb[20].mxu1 %vm13661_vm9, %v12681_v1  ;;  %v7479_v1 = vld [vmem:[#allocation3 + $0xa0] sm:$0x1]  ;;  %vm13676_vm9 = vmmov %vm13509_vm0 }
 0x6ec   : > { %9758 = vmatprep.mubr.msk.bf16.mxu1 %vm13662_vm2, %v12703_v20  ;;  %v7525_v20 = vsel %vm13667_vm1, %v12581_v47, %v7524_v38  ;;  %v7558_v5 = vshll.u32 %v7479_v1, 16  ;;  %vm13677_vm2 = vmmov %vm13667_vm1  ;;  %v7690_v38 = vshll.u32 %v7501_v31, 16 }
 0x6ee   : > { %v7560_v35 = vrot.slane %v7558_v5, 1 }
 0x6f0   : > { %v7561_v47 = vsel %vm13673_vm13, %v12634_v9, %v7560_v35  ;;  %v7596_v9 = vrot.slane %v7594_v7, 1  ;;  %vm13687_vm13 = vmmov %vm13667_vm1 }
 0x6f3   : > { %9759 = vmatmul.mubr.msk.bf16.gmra.mrb[24].mxu1 %vm13663_vm10, %v12707_v59  ;;  %v7546_v59 = vshll.u32 %v7477_v55, 16  ;;  %vm13678_vm10 = vmmov %vm13509_vm0  ;;  %v7692_v55 = vrot.slane %v7690_v38, 1 }
 0x6f4   : > { %9762 = vmatprep.mubr.msk.bf16.mxu1 %vm13664_vm11, %v10364_v50  ;;  %vm13679_vm11 = vmmov %vm13667_vm1  ;;  %v7675_v50 = vrot.slane %v7673_v52, 1 }
 0x6f5   : > { %v7548_v37 = vrot.slane %v7546_v59, 1  ;;  %v7597_v23 = vsel %vm13679_vm11, %v12665_v14, %v7596_v9  ;;  %v7633_v14 = vsel %vm13683_vm5, %v12712_v39, %v7632_v54  ;;  %v7678_v39 = vshll.u32 %v7499_v36, 16  ;;  %vm13693_vm11 = vmmov %vm13667_vm1 }
 0x6f6   : > { %v7676_v48 = vor.u32 %v7675_v50, %v7671_v21  ;;  %v7693_v1 = vsel %vm13693_vm11, %v7688_v22, %v7692_v55  ;;  %vm13697_vm5 = vmmov %vm13509_vm0 }
 0x6f7   : > { %v7549_v49 = vsel %vm13671_vm7, %v12613_v45, %v7548_v37  ;;  %v7585_v45 = vsel %vm13677_vm2, %v12660_v25, %v7584_v56  ;;  %v7620_v25 = vrot.slane %v7618_v41, 1  ;;  %vm13685_vm7 = vmmov %vm13667_vm1 }
 0x6f8   : > { %v7645_v40 = vsel %vm13685_vm7, %v12717_v63, %v7644_v28  ;;  %v7669_v63 = vsel %vm13689_vm8, %v12738_v33, %v7668_v44  ;;  %vm13691_vm2 = vmmov %vm13667_vm1 }
 0x6f9   : > { %v7621_v12 = vsel %vm13667_vm1, %v12691_v18, %v7620_v25  ;;  %v7657_v18 = vsel %vm13687_vm13, %v12734_v3, %v7656_v34  ;;  %vm13695_vm1 = vmmov %vm13509_vm0 }
 0x6fa   : > { %vm13699_vm7 = vmmov %vm13509_vm0 }
 0x6fb   : > { %9763 = vmatmul.mubr.msk.bf16.gmra.mrb[28].mxu1 %vm13509_vm0, %v12830_v19  ;;  %vm13701_vm13 = vmmov %vm13509_vm0 }
 0x6fc   : > { %9768 = vmatprep.mubr.msk.bf16.mxu1 %vm13666_vm4, %v7513_v42  ;;  %vm13681_vm4 = vmmov %vm13509_vm0  ;;  %v7680_v42 = vrot.slane %v7678_v39, 1 }
 0x6fd   : > { %vm13703_vm8 = vmmov %vm13509_vm0 }
 0x6fe   : > { %v7681_v3 = vsel %vm13691_vm2, %v7676_v48, %v7680_v42  ;;  %vm13705_vm2 = vmmov %vm13509_vm0 }
 0x6ff   : > { %vm13707_vm11 = vmmov %vm13509_vm0 }
 0x703   : > { %9769 = vmatmul.mubr.msk.bf16.vlgmr.msra.gmra.mrb[0].mxu1 %vm13668_vm15, %v7525_v20  ;;  %vm13682_vm15 = vmmov %vm13509_vm0 }
 0x704   : > { %9772 = vmatprep.mubr.msk.bf16.mxu1 %vm13670_vm6, %v7537_v26  ;;  %vm13684_vm6 = vmmov %vm13509_vm0 }
 0x70b   : > { %9773 = vmatmul.mubr.msk.bf16.gmra.mrb[4].mxu1 %vm13672_vm12, %v7549_v49  ;;  %vm13686_vm12 = vmmov %vm13509_vm0 }
 0x70c   : > { %9776 = vmatprep.mubr.msk.bf16.mxu1 %vm13674_vm14, %v7561_v47  ;;  %vm13688_vm14 = vmmov %vm13509_vm0 }
 0x713   : > { %9777 = vmatmul.mubr.msk.bf16.gmra.mrb[8].mxu1 %vm13676_vm9, %v7573_v27  ;;  %vm13690_vm9 = vmmov %vm13509_vm0 }
 0x714   : > { %9780 = vmatprep.mubr.msk.bf16.mxu1 %vm13678_vm10, %v7585_v45  ;;  %vm13692_vm10 = vmmov %vm13509_vm0 }
 0x71b   : > { %9781 = vmatmul.mubr.msk.bf16.gmra.mrb[12].mxu1 %vm13509_vm0, %v7597_v23 }
 0x71c   : > { %9784 = vmatprep.mubr.msk.bf16.mxu1 %vm13681_vm4, %v7609_v61  ;;  %vm13694_vm4 = vmmov %vm13509_vm0 }
 0x723   : > { %9785 = vmatmul.mubr.msk.bf16.gmra.mrb[16].mxu1 %vm13682_vm15, %v7621_v12  ;;  %vm13696_vm15 = vmmov %vm13509_vm0 }
 0x724   : > { %9788 = vmatprep.mubr.msk.bf16.mxu1 %vm13684_vm6, %v7633_v14  ;;  %vm13698_vm6 = vmmov %vm13509_vm0 }
 0x72b   : > { %9789 = vmatmul.mubr.msk.bf16.gmra.mrb[20].mxu1 %vm13686_vm12, %v7645_v40  ;;  %vm13700_vm12 = vmmov %vm13509_vm0 }
 0x72c   : > { %9792 = vmatprep.mubr.msk.bf16.mxu1 %vm13688_vm14, %v7657_v18  ;;  %vm13702_vm14 = vmmov %vm13509_vm0 }
 0x733   : > { %9793 = vmatmul.mubr.msk.bf16.gmra.mrb[24].mxu1 %vm13690_vm9, %v7669_v63  ;;  %vm13704_vm9 = vmmov %vm13509_vm0 }
 0x734   : > { %9796 = vmatprep.mubr.msk.bf16.mxu1 %vm13692_vm10, %v7681_v3  ;;  %vm13706_vm10 = vmmov %vm13509_vm0 }
 0x73b   : > { %9797 = vmatmul.mubr.msk.bf16.gmra.mrb[28].mxu1 %vm13509_vm0, %v7693_v1 }
 0x7d6   : > { %v12935_v20 = vpop.f32.mrb[0].mxu1 }
 0x7d7   : > { %v12937_v4 = vpop.f32.mrb[1].mxu1  ;;  %v7948_v30 = vmul.f32 %v12935_v20, %v12935_v20 }
 0x7d8   : > { %v7946_v33 = vmul.f32 %v12937_v4, %v12937_v4  ;;  %v12941_v59 = vpop.f32.mrb[2].mxu1 }
 0x7d9   : > { %v12943_v26 = vpop.f32.mrb[3].mxu1  ;;  %v7949_v5 = vmul.f32 %v12941_v59, %v12941_v59 }
 0x7da   : > { %v7947_v19 = vmul.f32 %v12943_v26, %v12943_v26  ;;  %8010 = vrot.lane.b32.xlu0 %v7946_v33, %s10377_s8 }
 0x7dc   : > { %8012 = vrot.lane.b32.xlu1 %v7947_v19, %s10377_s8 }
 0x7de   : > { %8014 = vrot.lane.b32.xlu0 %v7948_v30, %s10377_s8  ;;  %v12954_v37 = vpop.f32.mrb[4].mxu1 }
 0x7df   : > { %v12956_v35 = vpop.f32.mrb[5].mxu1  ;;  %v7952_v47 = vmul.f32 %v12954_v37, %v12954_v37 }
 0x7e0   : > { %v7950_v57 = vmul.f32 %v12956_v35, %v12956_v35  ;;  %8016 = vrot.lane.b32.xlu1 %v7949_v5, %s10377_s8  ;;  %v12961_v6 = vpop.f32.mrb[6].mxu1 }
 0x7e1   : > { %v12963_v49 = vpop.f32.mrb[7].mxu1  ;;  %v7953_v60 = vmul.f32 %v12961_v6, %v12961_v6 }
 0x7e2   : > { %v7951_v8 = vmul.f32 %v12963_v49, %v12963_v49  ;;  %8018 = vrot.lane.b32.xlu0 %v7950_v57, %s10377_s8 }
 0x7e4   : > { %8020 = vrot.lane.b32.xlu1 %v7951_v8, %s10377_s8 }
 0x7e6   : > { %8022 = vrot.lane.b32.xlu0 %v7952_v47, %s10377_s8  ;;  %v12974_v62 = vpop.f32.mrb[8].mxu1 }
 0x7e7   : > { %v12976_v56 = vpop.f32.mrb[9].mxu1  ;;  %v7956_v45 = vmul.f32 %v12974_v62, %v12974_v62 }
 0x7e8   : > { %v7954_v17 = vmul.f32 %v12976_v56, %v12976_v56  ;;  %8024 = vrot.lane.b32.xlu1 %v7953_v60, %s10377_s8  ;;  %v12981_v29 = vpop.f32.mrb[10].mxu1 }
 0x7e9   : > { %v12983_v27 = vpop.f32.mrb[11].mxu1  ;;  %v7957_v51 = vmul.f32 %v12981_v29, %v12981_v29 }
 0x7ea   : > { %v7955_v7 = vmul.f32 %v12983_v27, %v12983_v27  ;;  %8026 = vrot.lane.b32.xlu0 %v7954_v17, %s10377_s8 }
 0x7ec   : > { %8028 = vrot.lane.b32.xlu1 %v7955_v7, %s10377_s8 }
 0x7ee   : > { %8030 = vrot.lane.b32.xlu0 %v7956_v45, %s10377_s8  ;;  %v12994_v9 = vpop.f32.mrb[12].mxu1 }
 0x7ef   : > { %v12996_v0 = vpop.f32.mrb[13].mxu1  ;;  %v7960_v61 = vmul.f32 %v12994_v9, %v12994_v9 }
 0x7f0   : > { %v7958_v58 = vmul.f32 %v12996_v0, %v12996_v0  ;;  %8032 = vrot.lane.b32.xlu1 %v7957_v51, %s10377_s8  ;;  %v13001_v2 = vpop.f32.mrb[14].mxu1 }
 0x7f1   : > { %v13003_v23 = vpop.f32.mrb[15].mxu1  ;;  %v7961_v32 = vmul.f32 %v13001_v2, %v13001_v2 }
 0x7f2   : > { %v7959_v41 = vmul.f32 %v13003_v23, %v13003_v23  ;;  %8034 = vrot.lane.b32.xlu0 %v7958_v58, %s10377_s8 }
 0x7f4   : > { %8036 = vrot.lane.b32.xlu1 %v7959_v41, %s10377_s8 }
 0x7f6   : > { %8038 = vrot.lane.b32.xlu0 %v7960_v61, %s10377_s8  ;;  %v13014_v25 = vpop.f32.mrb[16].mxu1 }
 0x7f7   : > { %v13016_v54 = vpop.f32.mrb[17].mxu1  ;;  %v7964_v14 = vmul.f32 %v13014_v25, %v13014_v25 }
 0x7f8   : > { %v7962_v46 = vmul.f32 %v13016_v54, %v13016_v54  ;;  %8040 = vrot.lane.b32.xlu1 %v7961_v32, %s10377_s8  ;;  %v13021_v16 = vpop.f32.mrb[18].mxu1 }
 0x7f9   : > { %v13023_v12 = vpop.f32.mrb[19].mxu1  ;;  %v7965_v15 = vmul.f32 %v13021_v16, %v13021_v16 }
 0x7fa   : > { %v7963_v43 = vmul.f32 %v13023_v12, %v13023_v12  ;;  %8042 = vrot.lane.b32.xlu0 %v7962_v46, %s10377_s8 }
 0x7fc   : > { %8044 = vrot.lane.b32.xlu1 %v7963_v43, %s10377_s8 }
 0x7fe   : > { %8046 = vrot.lane.b32.xlu0 %v7964_v14, %s10377_s8  ;;  %v13034_v10 = vpop.f32.mrb[20].mxu1 }
 0x7ff   : > { %v13036_v28 = vpop.f32.mrb[21].mxu1  ;;  %v7968_v40 = vmul.f32 %v13034_v10, %v13034_v10 }
 0x800   : > { %v7966_v34 = vmul.f32 %v13036_v28, %v13036_v28  ;;  %8048 = vrot.lane.b32.xlu1 %v7965_v15, %s10377_s8  ;;  %v13041_v53 = vpop.f32.mrb[22].mxu1 }
 0x801   : > { %v13043_v52 = vpop.f32.mrb[23].mxu1  ;;  %v7969_v11 = vmul.f32 %v13041_v53, %v13041_v53 }
 0x802   : > { %v7967_v36 = vmul.f32 %v13043_v52, %v13043_v52  ;;  %8050 = vrot.lane.b32.xlu0 %v7966_v34, %s10377_s8 }
 0x804   : > { %8052 = vrot.lane.b32.xlu1 %v7967_v36, %s10377_s8 }
 0x806   : > { %8054 = vrot.lane.b32.xlu0 %v7968_v40, %s10377_s8  ;;  %v13054_v18 = vpop.f32.mrb[24].mxu1 }
 0x807   : > { %v13056_v50 = vpop.f32.mrb[25].mxu1  ;;  %v7972_v48 = vmul.f32 %v13054_v18, %v13054_v18 }
 0x808   : > { %v7970_v39 = vmul.f32 %v13056_v50, %v13056_v50  ;;  %8056 = vrot.lane.b32.xlu1 %v7969_v11, %s10377_s8  ;;  %v13061_v21 = vpop.f32.mrb[26].mxu1 }
 0x809   : > { %v13063_v31 = vpop.f32.mrb[27].mxu1  ;;  %v7973_v42 = vmul.f32 %v13061_v21, %v13061_v21 }
 0x80a   : > { %v7971_v44 = vmul.f32 %v13063_v31, %v13063_v31  ;;  %8058 = vrot.lane.b32.xlu0 %v7970_v39, %s10377_s8 }
 0x80c   : > { %8060 = vrot.lane.b32.xlu1 %v7971_v44, %s10377_s8 }
 0x80e   : > { %8062 = vrot.lane.b32.xlu0 %v7972_v48, %s10377_s8  ;;  %v13074_v13 = vpop.f32.mrb[28].mxu1 }
 0x80f   : > { %v13076_v38 = vpop.f32.mrb[29].mxu1  ;;  %v7976_v1 = vmul.f32 %v13074_v13, %v13074_v13 }
 0x810   : > { %v7974_v63 = vmul.f32 %v13076_v38, %v13076_v38  ;;  %8064 = vrot.lane.b32.xlu1 %v7973_v42, %s10377_s8  ;;  %v13081_v3 = vpop.f32.mrb[30].mxu1 }
 0x811   : > { %v13083_v22 = vpop.f32.mrb[31].mxu1  ;;  %v7977_v33 = vmul.f32 %v13081_v3, %v13081_v3 }
 0x812   : > { %v7975_v55 = vmul.f32 %v13083_v22, %v13083_v22  ;;  %8066 = vrot.lane.b32.xlu0 %v7974_v63, %s10377_s8 }
 0x814   : > { %8068 = vrot.lane.b32.xlu1 %v7975_v55, %s10377_s8 }
 0x816   : > { %8070 = vrot.lane.b32.xlu0 %v7976_v1, %s10377_s8 }
 0x818   : > { %8072 = vrot.lane.b32.xlu1 %v7977_v33, %s10377_s8 }
 0x84c   : > { %v8011_v19 = vpop.permute.xlu0 %8010 }
 0x84d   : > { %v8107_v30 = vsel %vm8106_vm3, %v12937_v4, %v8011_v19 }
 0x84e   : > { %v8013_v5 = vpop.permute.xlu1 %8012  ;;  %v8139_v8 = vsel %vm13694_vm4, %v8107_v30, 0.0  ;;  %vm13708_vm4 = vmmov %vm13509_vm0 }
 0x84f   : > { %v8108_v57 = vsel %vm8106_vm3, %v12943_v26, %v8013_v5 }
 0x850   : > { %v8140_v47 = vsel %vm13695_vm1, %v8108_v57, 0.0  ;;  %v8015_v60 = vpop.permute.xlu0 %8014  ;;  %vm13709_vm1 = vmmov %vm13509_vm0 }
 0x851   : > { %v8141_v17 = vadd.f32 %v8140_v47, %v8139_v8  ;;  %v8109_v7 = vsel %vm8106_vm3, %v12935_v20, %v8015_v60 }
 0x852   : > { %v8142_v45 = vsel %vm13696_vm15, %v8109_v7, 0.0  ;;  %v8017_v51 = vpop.permute.xlu1 %8016  ;;  %vm13710_vm15 = vmmov %vm13509_vm0 }
 0x853   : > { %v8143_v58 = vadd.f32 %v8142_v45, %v8141_v17  ;;  %v8110_v41 = vsel %vm8106_vm3, %v12941_v59, %v8017_v51 }
 0x854   : > { %v8144_v61 = vsel %vm13697_vm5, %v8110_v41, 0.0  ;;  %v8019_v32 = vpop.permute.xlu0 %8018  ;;  %vm13711_vm5 = vmmov %vm13509_vm0 }
 0x855   : > { %v8145_v46 = vadd.f32 %v8144_v61, %v8143_v58  ;;  %v8111_v43 = vsel %vm8106_vm3, %v12956_v35, %v8019_v32 }
 0x856   : > { %v8146_v14 = vsel %vm13698_vm6, %v8111_v43, 0.0  ;;  %v8021_v15 = vpop.permute.xlu1 %8020  ;;  %vm13712_vm6 = vmmov %vm13509_vm0 }
 0x857   : > { %v8147_v34 = vadd.f32 %v8146_v14, %v8145_v46  ;;  %v8112_v36 = vsel %vm8106_vm3, %v12963_v49, %v8021_v15 }
 0x858   : > { %v8148_v40 = vsel %vm13699_vm7, %v8112_v36, 0.0  ;;  %v8023_v11 = vpop.permute.xlu0 %8022  ;;  %vm13713_vm7 = vmmov %vm13509_vm0 }
 0x859   : > { %v8149_v39 = vadd.f32 %v8148_v40, %v8147_v34  ;;  %v8113_v44 = vsel %vm8106_vm3, %v12954_v37, %v8023_v11 }
 0x85a   : > { %v8150_v48 = vsel %vm13700_vm12, %v8113_v44, 0.0  ;;  %v8025_v42 = vpop.permute.xlu1 %8024  ;;  %vm13714_vm12 = vmmov %vm13509_vm0 }
 0x85b   : > { %v8151_v63 = vadd.f32 %v8150_v48, %v8149_v39  ;;  %v8114_v55 = vsel %vm8106_vm3, %v12961_v6, %v8025_v42 }
 0x85c   : > { %v8152_v1 = vsel %vm13701_vm13, %v8114_v55, 0.0  ;;  %v8027_v33 = vpop.permute.xlu0 %8026  ;;  %vm13715_vm13 = vmmov %vm13509_vm0 }
 0x85d   : > { %v8153_v19 = vadd.f32 %v8152_v1, %v8151_v63  ;;  %v8115_v30 = vsel %vm8106_vm3, %v12976_v56, %v8027_v33 }
 0x85e   : > { %v8154_v5 = vsel %vm13702_vm14, %v8115_v30, 0.0  ;;  %v8029_v57 = vpop.permute.xlu1 %8028  ;;  %vm13716_vm14 = vmmov %vm13509_vm0 }
 0x85f   : > { %v8155_v8 = vadd.f32 %v8154_v5, %v8153_v19  ;;  %v8116_v47 = vsel %vm8106_vm3, %v12983_v27, %v8029_v57 }
 0x860   : > { %v8156_v60 = vsel %vm13703_vm8, %v8116_v47, 0.0  ;;  %v8031_v17 = vpop.permute.xlu0 %8030  ;;  %vm13717_vm8 = vmmov %vm13509_vm0 }
 0x861   : > { %v8157_v7 = vadd.f32 %v8156_v60, %v8155_v8  ;;  %v8117_v45 = vsel %vm8106_vm3, %v12974_v62, %v8031_v17 }
 0x862   : > { %v8158_v51 = vsel %vm13704_vm9, %v8117_v45, 0.0  ;;  %v8033_v58 = vpop.permute.xlu1 %8032  ;;  %vm13718_vm9 = vmmov %vm13509_vm0 }
 0x863   : > { %v8159_v41 = vadd.f32 %v8158_v51, %v8157_v7  ;;  %v8118_v61 = vsel %vm8106_vm3, %v12981_v29, %v8033_v58 }
 0x864   : > { %v8160_v32 = vsel %vm13705_vm2, %v8118_v61, 0.0  ;;  %v8035_v46 = vpop.permute.xlu0 %8034  ;;  %vm13719_vm2 = vmmov %vm13509_vm0 }
 0x865   : > { %v8161_v43 = vadd.f32 %v8160_v32, %v8159_v41  ;;  %v8119_v14 = vsel %vm8106_vm3, %v12996_v0, %v8035_v46 }
 0x866   : > { %v8162_v15 = vsel %vm13706_vm10, %v8119_v14, 0.0  ;;  %v8037_v34 = vpop.permute.xlu1 %8036  ;;  %vm13720_vm10 = vmmov %vm13509_vm0 }
 0x867   : > { %v8163_v36 = vadd.f32 %v8162_v15, %v8161_v43  ;;  %v8120_v40 = vsel %vm8106_vm3, %v13003_v23, %v8037_v34 }
 0x868   : > { %v8164_v11 = vsel %vm13707_vm11, %v8120_v40, 0.0  ;;  %v8039_v39 = vpop.permute.xlu0 %8038  ;;  %vm13721_vm11 = vmmov %vm13509_vm0 }
 0x869   : > { %v8165_v44 = vadd.f32 %v8164_v11, %v8163_v36  ;;  %v8121_v48 = vsel %vm8106_vm3, %v12994_v9, %v8039_v39 }
 0x86a   : > { %v8166_v42 = vsel %vm13509_vm0, %v8121_v48, 0.0  ;;  %v8041_v63 = vpop.permute.xlu1 %8040 }
 0x86b   : > { %v8167_v55 = vadd.f32 %v8166_v42, %v8165_v44  ;;  %v8122_v1 = vsel %vm8106_vm3, %v13001_v2, %v8041_v63 }
 0x86c   : > { %v8168_v33 = vsel %vm13708_vm4, %v8122_v1, 0.0  ;;  %v8043_v19 = vpop.permute.xlu0 %8042  ;;  %vm13722_vm4 = vmmov %vm13509_vm0 }
 0x86d   : > { %v8169_v30 = vadd.f32 %v8168_v33, %v8167_v55  ;;  %v8123_v5 = vsel %vm8106_vm3, %v13016_v54, %v8043_v19 }
 0x86e   : > { %v8170_v57 = vsel %vm13709_vm1, %v8123_v5, 0.0  ;;  %v8045_v8 = vpop.permute.xlu1 %8044  ;;  %vm13723_vm1 = vmmov %vm13509_vm0 }
 0x86f   : > { %v8171_v47 = vadd.f32 %v8170_v57, %v8169_v30  ;;  %v8124_v60 = vsel %vm8106_vm3, %v13023_v12, %v8045_v8 }
 0x870   : > { %v8172_v17 = vsel %vm13710_vm15, %v8124_v60, 0.0  ;;  %v8047_v7 = vpop.permute.xlu0 %8046 }
 0x871   : > { %v8173_v45 = vadd.f32 %v8172_v17, %v8171_v47  ;;  %v8125_v51 = vsel %vm8106_vm3, %v13014_v25, %v8047_v7 }
 0x872   : > { %v8174_v58 = vsel %vm13711_vm5, %v8125_v51, 0.0  ;;  %v8049_v41 = vpop.permute.xlu1 %8048 }
 0x873   : > { %v8175_v61 = vadd.f32 %v8174_v58, %v8173_v45  ;;  %v8126_v32 = vsel %vm8106_vm3, %v13021_v16, %v8049_v41 }
 0x874   : > { %v8176_v46 = vsel %vm13712_vm6, %v8126_v32, 0.0  ;;  %v8051_v43 = vpop.permute.xlu0 %8050 }
 0x875   : > { %v8177_v14 = vadd.f32 %v8176_v46, %v8175_v61  ;;  %v8127_v15 = vsel %vm8106_vm3, %v13036_v28, %v8051_v43 }
 0x876   : > { %v8178_v34 = vsel %vm13713_vm7, %v8127_v15, 0.0  ;;  %v8053_v36 = vpop.permute.xlu1 %8052 }
 0x877   : > { %v8179_v40 = vadd.f32 %v8178_v34, %v8177_v14  ;;  %v8128_v11 = vsel %vm8106_vm3, %v13043_v52, %v8053_v36 }
 0x878   : > { %v8180_v39 = vsel %vm13714_vm12, %v8128_v11, 0.0  ;;  %v8055_v44 = vpop.permute.xlu0 %8054 }
 0x879   : > { %v8181_v48 = vadd.f32 %v8180_v39, %v8179_v40  ;;  %v8129_v42 = vsel %vm8106_vm3, %v13034_v10, %v8055_v44 }
 0x87a   : > { %v8182_v63 = vsel %vm13715_vm13, %v8129_v42, 0.0  ;;  %v8057_v55 = vpop.permute.xlu1 %8056 }
 0x87b   : > { %v8183_v1 = vadd.f32 %v8182_v63, %v8181_v48  ;;  %v8130_v33 = vsel %vm8106_vm3, %v13041_v53, %v8057_v55 }
 0x87c   : > { %v8184_v19 = vsel %vm13716_vm14, %v8130_v33, 0.0  ;;  %v8059_v30 = vpop.permute.xlu0 %8058 }
 0x87d   : > { %v8185_v5 = vadd.f32 %v8184_v19, %v8183_v1  ;;  %v8131_v57 = vsel %vm8106_vm3, %v13056_v50, %v8059_v30 }
 0x87e   : > { %v8186_v8 = vsel %vm13717_vm8, %v8131_v57, 0.0  ;;  %v8061_v47 = vpop.permute.xlu1 %8060 }
 0x87f   : > { %v8187_v60 = vadd.f32 %v8186_v8, %v8185_v5  ;;  %v8132_v17 = vsel %vm8106_vm3, %v13063_v31, %v8061_v47 }
 0x880   : > { %v8188_v7 = vsel %vm13718_vm9, %v8132_v17, 0.0  ;;  %v8063_v45 = vpop.permute.xlu0 %8062 }
 0x881   : > { %v8189_v51 = vadd.f32 %v8188_v7, %v8187_v60  ;;  %v8133_v58 = vsel %vm8106_vm3, %v13054_v18, %v8063_v45 }
 0x882   : > { %v8190_v41 = vsel %vm13719_vm2, %v8133_v58, 0.0  ;;  %v8065_v61 = vpop.permute.xlu1 %8064 }
 0x883   : > { %v8191_v32 = vadd.f32 %v8190_v41, %v8189_v51  ;;  %v8134_v46 = vsel %vm8106_vm3, %v13061_v21, %v8065_v61 }
 0x884   : > { %v8192_v43 = vsel %vm13720_vm10, %v8134_v46, 0.0  ;;  %v8067_v14 = vpop.permute.xlu0 %8066 }
 0x885   : > { %v8193_v15 = vadd.f32 %v8192_v43, %v8191_v32  ;;  %v8135_v34 = vsel %vm8106_vm3, %v13076_v38, %v8067_v14 }
 0x886   : > { %v8194_v36 = vsel %vm13721_vm11, %v8135_v34, 0.0  ;;  %v8069_v40 = vpop.permute.xlu1 %8068 }
 0x887   : > { %v8195_v11 = vadd.f32 %v8194_v36, %v8193_v15  ;;  %v8136_v39 = vsel %vm8106_vm3, %v13083_v22, %v8069_v40  ;;  %v7944_v15 = vld [vmem:[%s13329_s5] sm:$0x1] }
 0x888   : > { %v8196_v44 = vsel %vm13509_vm0, %v8136_v39, 0.0  ;;  %v8071_v48 = vpop.permute.xlu0 %8070  ;;  %v7945_v40 = vld [vmem:[%s13330_s6] sm:$0x1] }
 0x889   : > { %v8197_v42 = vadd.f32 %v8196_v44, %v8195_v11  ;;  %v8137_v63 = vsel %vm8106_vm3, %v13074_v13, %v8071_v48  ;;  %v13724_v44 = vld [vmem:[#allocation4_spill] sm:$0xff] }
 0x88a   : > { %v8198_v55 = vsel %vm13722_vm4, %v8137_v63, 0.0  ;;  %v8073_v1 = vpop.permute.xlu1 %8072 }
 0x88b   : > { %v8199_v33 = vadd.f32 %v8198_v55, %v8197_v42  ;;  %v8138_v19 = vsel %vm8106_vm3, %v13081_v3, %v8073_v1 }
 0x88c   : > { %v8200_v30 = vsel %vm13723_vm1, %v8138_v19, 0.0 }
 0x88d   : > { %v8201_v5 = vadd.f32 %v8200_v30, %v8199_v33 }
 0x88f   : > { %v8202_v57 = vrot.slane %v8201_v5, 4 }
 0x891   : > { %v8203_v8 = vadd.f32 %v8202_v57, %v8201_v5 }
 0x893   : > { %v8204_v47 = vrot.slane %v8203_v8, 2 }
 0x895   : > { %v8205_v60 = vadd.f32 %v8204_v47, %v8203_v8 }
 0x897   : > { %v8206_v17 = vrot.slane %v8205_v60, 1 }
 0x899   : > { %v8207_v7 = vadd.f32 %v8206_v17, %v8205_v60 }
 0x89b   : > { %v8208_v45 = vmul.f32 0.00390625, %v8207_v7 }
 0x89d   : > { %v8209_v51 = vmul.f32 %v8208_v45, %v8208_v45 }
 0x89f   : > { %8211 = vrot.lane.b32.xlu0 %v8209_v51, %s10377_s8 }
 0x911   : > { %v8212_v58 = vpop.permute.xlu0 %8211 }
 0x912   : > { %v8214_v41 = vsub.f32 %v8208_v45, %v8212_v58 }
 0x914   : > { %v8215_v61 = vmax.f32 %v8214_v41, 0.0 }
 0x916   : > { %v8216_v32 = vadd.f32 1e-05, %v8215_v61 }
 0x918   : > { %10362 = vrsqrt.f32 %v8216_v32 }
 0x922   : > { %v10363_v46 = vpop.eup %10362 }
 0x923   : > { %v8225_v43 = vrot.slane %v10363_v46, %v11763_v24 }
 0x925   : > { %v8232_v14 = vrot.slane %v8225_v43, %v11763_v24 }
 0x927   : > { %8233 = vrot.lane.b32.xlu1 %v8232_v14, %s10378_s9 }
 0x999   : > { %v8234_v34 = vpop.permute.xlu1 %8233 }
 0x99a   : > { %v8236_v36 = vmul.f32 %v8234_v34, %v7944_v15 }
 0x99c   : > { %v8237_v11 = vmul.f32 %v8236_v36, %v8208_v45  ;;  %v13201_v48 = vrot.slane %v8236_v36, %v13724_v44 }
 0x99e   : > { %v8238_v39 = vsub.f32 %v7945_v40, %v8237_v11  ;;  %v8259_v24 = vmul.f32 %v12994_v9, %v13201_v48  ;;  %v8260_v63 = vmul.f32 %v13001_v2, %v13201_v48  ;;  %v8261_v55 = vmul.f32 %v13201_v48, %v13016_v54 }
 0x99f   : > { %v8276_v1 = vmul.f32 %v13081_v3, %v13201_v48  ;;  %v8262_v30 = vmul.f32 %v13201_v48, %v13023_v12  ;;  %v8263_v9 = vmul.f32 %v13014_v25, %v13201_v48  ;;  %v8245_v3 = vmul.f32 %v13201_v48, %v12937_v4 }
 0x9a0   : > { %v13204_v42 = vrot.slane %v8238_v39, %v13724_v44  ;;  %v8246_v8 = vmul.f32 %v13201_v48, %v12943_v26  ;;  %v8264_v47 = vmul.f32 %v13021_v16, %v13201_v48  ;;  %v8247_v4 = vmul.f32 %v12935_v20, %v13201_v48 }
 0x9a1   : > { %v8265_v16 = vmul.f32 %v13201_v48, %v13036_v28  ;;  %v8248_v20 = vmul.f32 %v12941_v59, %v13201_v48  ;;  %v8266_v15 = vmul.f32 %v13201_v48, %v13043_v52  ;;  %v8249_v40 = vmul.f32 %v13201_v48, %v12956_v35 }
 0x9a2   : > { %v8299_v33 = vadd.f32 %v13204_v42, %v8261_v55  ;;  %v13218_v57 = vadd.f32 %v13204_v42, %v8259_v24  ;;  %v13223_v2 = vadd.f32 %v13204_v42, %v8260_v63  ;;  %v8300_v54 = vadd.f32 %v13204_v42, %v8262_v30 }
 0x9a3   : > { %v8301_v12 = vadd.f32 %v13204_v42, %v8263_v9  ;;  %v13234_v60 = vadd.f32 %v13204_v42, %v8276_v1  ;;  %v8284_v25 = vadd.f32 %v13204_v42, %v8246_v8  ;;  %v8283_v17 = vadd.f32 %v13204_v42, %v8245_v3 }
 0x9a4   : > { %vm8331_vm3 = vcmp.ge.f32.partialorder %v8299_v33, 0.0  ;;  %v8363_v19 = vmul.f32 0.01, %v8299_v33  ;;  %vm8332_vm15 = vcmp.ge.f32.partialorder %v8300_v54, 0.0  ;;  %v8364_v7 = vmul.f32 0.01, %v8300_v54 }
 0x9a5   : > { %v8302_v45 = vadd.f32 %v13204_v42, %v8264_v47  ;;  %vm8315_vm5 = vcmp.ge.f32.partialorder %v8283_v17, 0.0  ;;  %v8347_v26 = vmul.f32 0.01, %v8283_v17  ;;  %v8365_v58 = vmul.f32 0.01, %v8301_v12 }
 0x9a6   : > { %v8395_v5 = vsel %vm8331_vm3, %v8299_v33, %v8363_v19  ;;  %v8396_v51 = vsel %vm8332_vm15, %v8300_v54, %v8364_v7  ;;  %vm8333_vm6 = vcmp.ge.f32.partialorder %v8301_v12, 0.0  ;;  %v8285_v41 = vadd.f32 %v13204_v42, %v8247_v4 }
 0x9a7   : > { %8443 = vxpose.xlu1.b32.start [1/16] (narrow) %v8395_v5, 8  ;;  %v8379_v61 = vsel %vm8315_vm5, %v8283_v17, %v8347_v26  ;;  %v8348_v32 = vmul.f32 0.01, %v8284_v25  ;;  %vm8316_vm7 = vcmp.ge.f32.partialorder %v8284_v25, 0.0  ;;  %v8303_v46 = vadd.f32 %v13204_v42, %v8265_v16 }
 0x9a8   : > { %8411 = vxpose.xlu0.b32.start [1/16] (narrow) %v8379_v61, 8  ;;  %v8397_v43 = vsel %vm8333_vm6, %v8301_v12, %v8365_v58  ;;  %v8366_v14 = vmul.f32 0.01, %v8302_v45  ;;  %vm8334_vm12 = vcmp.ge.f32.partialorder %v8302_v45, 0.0  ;;  %v8286_v28 = vadd.f32 %v13204_v42, %v8248_v20 }
 0x9a9   : > { %v8380_v34 = vsel %vm8316_vm7, %v8284_v25, %v8348_v32  ;;  %v8349_v36 = vmul.f32 0.01, %v8285_v41  ;;  %vm8317_vm13 = vcmp.ge.f32.partialorder %v8285_v41, 0.0  ;;  %v8304_v59 = vadd.f32 %v13204_v42, %v8266_v15 }
 0x9aa   : > { %v8398_v11 = vsel %vm8334_vm12, %v8302_v45, %v8366_v14  ;;  %v8367_v39 = vmul.f32 0.01, %v8303_v46  ;;  %vm8335_vm14 = vcmp.ge.f32.partialorder %v8303_v46, 0.0  ;;  %v8267_v44 = vmul.f32 %v13034_v10, %v13201_v48 }
 0x9ab   : > { %8444 = vxpose.xlu1.b32.cont [2/16] (narrow) %v8396_v51, 8  ;;  %v8287_v52 = vadd.f32 %v13204_v42, %v8249_v40  ;;  %v8381_v24 = vsel %vm8317_vm13, %v8285_v41, %v8349_v36  ;;  %v8350_v63 = vmul.f32 0.01, %v8286_v28  ;;  %vm8318_vm8 = vcmp.ge.f32.partialorder %v8286_v28, 0.0 }
 0x9ac   : > { %8412 = vxpose.xlu0.b32.cont [2/16] (narrow) %v8380_v34, 8  ;;  %v8250_v55 = vmul.f32 %v13201_v48, %v12963_v49  ;;  %v8305_v35 = vadd.f32 %v13204_v42, %v8267_v44  ;;  %v8399_v1 = vsel %vm8335_vm14, %v8303_v46, %v8367_v39  ;;  %v8368_v33 = vmul.f32 0.01, %v8304_v59 }
 0x9ad   : > { %vm8336_vm9 = vcmp.ge.f32.partialorder %v8304_v59, 0.0  ;;  %v8268_v19 = vmul.f32 %v13041_v53, %v13201_v48  ;;  %v8382_v30 = vsel %vm8318_vm8, %v8286_v28, %v8350_v63  ;;  %v8351_v5 = vmul.f32 0.01, %v8287_v52 }
 0x9ae   : > { %v8288_v10 = vadd.f32 %v13204_v42, %v8250_v55  ;;  %vm8319_vm2 = vcmp.ge.f32.partialorder %v8287_v52, 0.0  ;;  %v8251_v9 = vmul.f32 %v12954_v37, %v13201_v48  ;;  %v8400_v54 = vsel %vm8336_vm9, %v8304_v59, %v8368_v33 }
 0x9af   : > { %8445 = vxpose.xlu1.b32.cont [3/16] (narrow) %v8397_v43, 8  ;;  %v8306_v49 = vadd.f32 %v13204_v42, %v8268_v19  ;;  %v8369_v3 = vmul.f32 0.01, %v8305_v35  ;;  %vm8337_vm10 = vcmp.ge.f32.partialorder %v8305_v35, 0.0  ;;  %v8269_v8 = vmul.f32 %v13201_v48, %v13056_v50 }
 0x9b0   : > { %8413 = vxpose.xlu0.b32.cont [3/16] (narrow) %v8381_v24, 8  ;;  %v8289_v53 = vadd.f32 %v13204_v42, %v8251_v9  ;;  %v8383_v12 = vsel %vm8319_vm2, %v8287_v52, %v8351_v5  ;;  %v8352_v47 = vmul.f32 0.01, %v8288_v10  ;;  %vm8320_vm11 = vcmp.ge.f32.partialorder %v8288_v10, 0.0 }
 0x9b1   : > { %v8252_v25 = vmul.f32 %v12961_v6, %v13201_v48  ;;  %v8307_v37 = vadd.f32 %v13204_v42, %v8269_v8  ;;  %v8401_v17 = vsel %vm8337_vm10, %v8305_v35, %v8369_v3  ;;  %v8370_v7 = vmul.f32 0.01, %v8306_v49 }
 0x9b2   : > { %vm8338_vm0 = vcmp.ge.f32.partialorder %v8306_v49, 0.0  ;;  %v8270_v4 = vmul.f32 %v13201_v48, %v13063_v31  ;;  %v8384_v45 = vsel %vm8320_vm11, %v8288_v10, %v8352_v47  ;;  %v8353_v26 = vmul.f32 0.01, %v8289_v53 }
 0x9b3   : > { %8446 = vxpose.xlu1.b32.cont [4/16] (narrow) %v8398_v11, 8  ;;  %v8290_v50 = vadd.f32 %v13204_v42, %v8252_v25  ;;  %vm8321_vm4 = vcmp.ge.f32.partialorder %v8289_v53, 0.0  ;;  %v8253_v51 = vmul.f32 %v13201_v48, %v12976_v56  ;;  %v8402_v58 = vsel %vm8338_vm0, %v8306_v49, %v8370_v7 }
 0x9b4   : > { %8414 = vxpose.xlu0.b32.cont [4/16] (narrow) %v8382_v30, 8  ;;  %v8308_v6 = vadd.f32 %v13204_v42, %v8270_v4  ;;  %v8371_v16 = vmul.f32 0.01, %v8307_v37  ;;  %vm8339_vm1 = vcmp.ge.f32.partialorder %v8307_v37, 0.0  ;;  %v8271_v41 = vmul.f32 %v13054_v18, %v13201_v48 }
 0x9b5   : > { %v8291_v31 = vadd.f32 %v13204_v42, %v8253_v51  ;;  %v8385_v61 = vsel %vm8321_vm4, %v8289_v53, %v8353_v26  ;;  %v8354_v32 = vmul.f32 0.01, %v8290_v50  ;;  %vm8322_vm3 = vcmp.ge.f32.partialorder %v8290_v50, 0.0 }
 0x9b6   : > { %v8254_v20 = vmul.f32 %v13201_v48, %v12983_v27  ;;  %v8309_v56 = vadd.f32 %v13204_v42, %v8271_v41  ;;  %v8403_v46 = vsel %vm8339_vm1, %v8307_v37, %v8371_v16  ;;  %v8372_v43 = vmul.f32 0.01, %v8308_v6 }
 0x9b7   : > { %8447 = vxpose.xlu1.b32.cont [5/16] (narrow) %v8399_v1, 8  ;;  %vm8340_vm15 = vcmp.ge.f32.partialorder %v8308_v6, 0.0  ;;  %v8272_v14 = vmul.f32 %v13061_v21, %v13201_v48  ;;  %v8386_v15 = vsel %vm8322_vm3, %v8290_v50, %v8354_v32  ;;  %v8355_v28 = vmul.f32 0.01, %v8291_v31 }
 0x9b8   : > { %8415 = vxpose.xlu0.b32.cont [5/16] (narrow) %v8383_v12, 8  ;;  %v8292_v18 = vadd.f32 %v13204_v42, %v8254_v20  ;;  %vm8323_vm5 = vcmp.ge.f32.partialorder %v8291_v31, 0.0  ;;  %v8255_v34 = vmul.f32 %v12974_v62, %v13201_v48  ;;  %v8404_v36 = vsel %vm8340_vm15, %v8308_v6, %v8372_v43 }
 0x9b9   : > { %v8310_v27 = vadd.f32 %v13204_v42, %v8272_v14  ;;  %v8373_v40 = vmul.f32 0.01, %v8309_v56  ;;  %vm8341_vm6 = vcmp.ge.f32.partialorder %v8309_v56, 0.0  ;;  %v8273_v59 = vmul.f32 %v13201_v48, %v13076_v38 }
 0x9ba   : > { %v8293_v21 = vadd.f32 %v13204_v42, %v8255_v34  ;;  %v8387_v11 = vsel %vm8323_vm5, %v8291_v31, %v8355_v28  ;;  %v8356_v39 = vmul.f32 0.01, %v8292_v18  ;;  %vm8324_vm7 = vcmp.ge.f32.partialorder %v8292_v18, 0.0 }
 0x9bb   : > { %8448 = vxpose.xlu1.b32.cont [6/16] (narrow) %v8400_v54, 8  ;;  %v8256_v44 = vmul.f32 %v12981_v29, %v13201_v48  ;;  %v8311_v62 = vadd.f32 %v13204_v42, %v8273_v59  ;;  %v8405_v52 = vsel %vm8341_vm6, %v8309_v56, %v8373_v40  ;;  %v8374_v24 = vmul.f32 0.01, %v8310_v27 }
 0x9bc   : > { %8416 = vxpose.xlu0.b32.cont [6/16] (narrow) %v8384_v45, 8  ;;  %vm8342_vm12 = vcmp.ge.f32.partialorder %v8310_v27, 0.0  ;;  %v8274_v63 = vmul.f32 %v13201_v48, %v13083_v22  ;;  %v8388_v55 = vsel %vm8324_vm7, %v8292_v18, %v8356_v39  ;;  %v8357_v35 = vmul.f32 0.01, %v8293_v21 }
 0x9bd   : > { %v8294_v38 = vadd.f32 %v13204_v42, %v8256_v44  ;;  %vm8325_vm13 = vcmp.ge.f32.partialorder %v8293_v21, 0.0  ;;  %v8257_v1 = vmul.f32 %v13201_v48, %v12996_v0  ;;  %v8406_v33 = vsel %vm8342_vm12, %v8310_v27, %v8374_v24 }
 0x9be   : > { %v8312_v29 = vadd.f32 %v13204_v42, %v8274_v63  ;;  %v8375_v19 = vmul.f32 0.01, %v8311_v62  ;;  %vm8343_vm14 = vcmp.ge.f32.partialorder %v8311_v62, 0.0  ;;  %v8275_v10 = vmul.f32 %v13074_v13, %v13201_v48 }
 0x9bf   : > { %8449 = vxpose.xlu1.b32.cont [7/16] (narrow) %v8401_v17, 8  ;;  %v8295_v22 = vadd.f32 %v13204_v42, %v8257_v1  ;;  %v8389_v30 = vsel %vm8325_vm13, %v8293_v21, %v8357_v35  ;;  %v8358_v5 = vmul.f32 0.01, %v8294_v38  ;;  %vm8326_vm8 = vcmp.ge.f32.partialorder %v8294_v38, 0.0 }
 0x9c0   : > { %8417 = vxpose.xlu0.b32.cont [7/16] (narrow) %v8385_v61, 8  ;;  %v8258_v9 = vmul.f32 %v13201_v48, %v13003_v23  ;;  %v8313_v0 = vadd.f32 %v13204_v42, %v8275_v10  ;;  %v8407_v49 = vsel %vm8343_vm14, %v8311_v62, %v8375_v19  ;;  %v8376_v54 = vmul.f32 0.01, %v8312_v29 }
 0x9c1   : > { %vm8344_vm9 = vcmp.ge.f32.partialorder %v8312_v29, 0.0  ;;  %v8390_v8 = vsel %vm8326_vm8, %v8294_v38, %v8358_v5  ;;  %v8359_v53 = vmul.f32 0.01, %v8295_v22  ;;  %vm8327_vm2 = vcmp.ge.f32.partialorder %v8295_v22, 0.0 }
 0x9c2   : > { %v8296_v3 = vadd.f32 %v13204_v42, %v8258_v9  ;;  %v8408_v13 = vsel %vm8344_vm9, %v8312_v29, %v8376_v54  ;;  %v8377_v12 = vmul.f32 0.01, %v8313_v0  ;;  %vm8345_vm10 = vcmp.ge.f32.partialorder %v8313_v0, 0.0 }
 0x9c3   : > { %8450 = vxpose.xlu1.b32.cont [8/16] (narrow) %v8402_v58, 8  ;;  %v8391_v47 = vsel %vm8327_vm2, %v8295_v22, %v8359_v53  ;;  %v8378_v48 = vmul.f32 0.01, %v13234_v60  ;;  %vm8346_vm0 = vcmp.ge.f32.partialorder %v13234_v60, 0.0  ;;  %v8361_v37 = vmul.f32 0.01, %v13218_v57 }
 0x9c4   : > { %8418 = vxpose.xlu0.b32.cont [8/16] (narrow) %v8386_v15, 8  ;;  %v8360_v25 = vmul.f32 0.01, %v8296_v3  ;;  %vm8328_vm11 = vcmp.ge.f32.partialorder %v8296_v3, 0.0  ;;  %v8409_v23 = vsel %vm8345_vm10, %v8313_v0, %v8377_v12  ;;  %vm8329_vm4 = vcmp.ge.f32.partialorder %v13218_v57, 0.0 }
 0x9c5   : > { %v8410_v17 = vsel %vm8346_vm0, %v13234_v60, %v8378_v48  ;;  %v8393_v7 = vsel %vm8329_vm4, %v13218_v57, %v8361_v37  ;;  %v8362_v4 = vmul.f32 0.01, %v13223_v2  ;;  %vm8330_vm1 = vcmp.ge.f32.partialorder %v13223_v2, 0.0 }
 0x9c6   : > { %v8392_v42 = vsel %vm8328_vm11, %v8296_v3, %v8360_v25 }
 0x9c7   : > { %8451 = vxpose.xlu1.b32.cont [9/16] (narrow) %v8403_v46, 8  ;;  %v8394_v50 = vsel %vm8330_vm1, %v13223_v2, %v8362_v4 }
 0x9c8   : > { %8419 = vxpose.xlu0.b32.cont [9/16] (narrow) %v8387_v11, 8 }
 0x9cb   : > { %8452 = vxpose.xlu1.b32.cont [10/16] (narrow) %v8404_v36, 8 }
 0x9cc   : > { %8420 = vxpose.xlu0.b32.cont [10/16] (narrow) %v8388_v55, 8 }
 0x9cf   : > { %8453 = vxpose.xlu1.b32.cont [11/16] (narrow) %v8405_v52, 8 }
 0x9d0   : > { %8421 = vxpose.xlu0.b32.cont [11/16] (narrow) %v8389_v30, 8 }
 0x9d3   : > { %8454 = vxpose.xlu1.b32.cont [12/16] (narrow) %v8406_v33, 8 }
 0x9d4   : > { %8422 = vxpose.xlu0.b32.cont [12/16] (narrow) %v8390_v8, 8 }
 0x9d7   : > { %8455 = vxpose.xlu1.b32.cont [13/16] (narrow) %v8407_v49, 8 }
 0x9d8   : > { %8423 = vxpose.xlu0.b32.cont [13/16] (narrow) %v8391_v47, 8 }
 0x9db   : > { %8456 = vxpose.xlu1.b32.cont [14/16] (narrow) %v8408_v13, 8 }
 0x9dc   : > { %8424 = vxpose.xlu0.b32.cont [14/16] (narrow) %v8392_v42, 8 }
 0x9df   : > { %8457 = vxpose.xlu1.b32.cont [15/16] (narrow) %v8409_v23, 8 }
 0x9e0   : > { %8425 = vxpose.xlu0.b32.cont [15/16] (narrow) %v8393_v7, 8 }
 0x9e3   : > { %8458 = vxpose.xlu1.b32.end [16/16] (narrow) %v8410_v17, 8 }
 0x9e4   : > { %8426 = vxpose.xlu0.b32.end [16/16] (narrow) %v8394_v50, 8 }
 0xa27   : > { %v8459_v45 = vpop.trf.xlu1 }
 0xa28   : > { %8476 = vst [vmem:[%s278_s17 + $0x8] sm:$0xff] %v8459_v45  ;;  %v8427_v26 = vpop.trf.xlu0 }
 0xa29   : > { %8475 = vst [vmem:[%s278_s17] sm:$0xff] %v8427_v26 }
 0xa2a PF: > { %s17_s24 = sadd.s32 1, %s10371_s24  }
 0xa2b   : > { %p14_p4 = scmp.ge.s32.totalorder %s17_s24, 4  }
 0xa2d   :  { %16 = sbr.rel (!%p14_p4) target bundleno = 1 (0x1), region = 100 }

</bundles_post_ra>
